<compile_context>
chip_gen: v7x
topology: tpu7x:2x2x1
jax: 0.10.0
libtpu: 0.0.40
codegen_flags: <defaults>
</compile_context>

<pallas_src>
import functools

import numpy as np
import jax
import jax.numpy as jnp
from jax import lax
from jax.experimental import pallas as pl
from jax.experimental.pallas import tpu as pltpu

_EPS = 1e-5                       # InstanceNorm2d default eps
_NEG_SLOPE = 0.2                  # LeakyReLU negative slope
_VMEM_LIMIT = 32 * 1024 * 1024    # fits every generation's physical VMEM


# --------------------------------------------------------------------------------------
# In-kernel replication-padded shift helpers on a (C, H*W) lane-flattened feature map.
# --------------------------------------------------------------------------------------
def _shift_rows(x, dy, H, W):
    """out[:, y*W + c] = x[:, clamp(y+dy, 0, H-1)*W + c]   (edge replication along H)."""
    hw = H * W
    if dy == 0:
        return x
    if dy > 0:   # dy == +1
        return jnp.concatenate([x[:, W:], x[:, hw - W:]], axis=1)
    # dy == -1
    return jnp.concatenate([x[:, :W], x[:, :hw - W]], axis=1)


def _shift_cols(x, dx, first_col, last_col):
    """out[:, y*W + c] = x[:, y*W + clamp(c+dx, 0, W-1)]   (edge replication along W)."""
    if dx == 0:
        return x
    if dx > 0:   # dx == +1: circular shift left, then replicate the last column
        rolled = jnp.concatenate([x[:, 1:], x[:, :1]], axis=1)
        return jnp.where(last_col, x, rolled)
    # dx == -1: circular shift right, then replicate the first column
    rolled = jnp.concatenate([x[:, -1:], x[:, :-1]], axis=1)
    return jnp.where(first_col, x, rolled)


def _col_masks(shape, W):
    col = lax.broadcasted_iota(jnp.int32, shape, dimension=1) % W
    return col == 0, col == W - 1


def _conv3x3_reppad(y, w9, H, W):
    """y: (Cin, H*W) activation, w9: (9, Cout, Cin).  Returns (Cout, H*W) f32 accumulator."""
    first_col, last_col = _col_masks(y.shape, W)
    rows = [_shift_rows(y, dy, H, W) for dy in (-1, 0, 1)]     # hoisted out of the tap loop
    acc = jnp.zeros((w9.shape[1], H * W), jnp.float32)
    for tap in range(9):
        dy = tap // 3 - 1
        dx = tap % 3 - 1
        sh = _shift_cols(rows[dy + 1], dx, first_col, last_col)
        acc = acc + jnp.dot(w9[tap], sh, preferred_element_type=jnp.float32)
    return acc


# --------------------------------------------------------------------------------------
# Kernels
# --------------------------------------------------------------------------------------
def _fuse_layer_kernel(h_ref, ze_ref, zf_ref, wf_ref, bf_ref, wm_ref, bm_ref, o_ref, *, H, W):
    """One batch element: InstanceNorm + 4x(1x1 conv) FiLM + 3x3 mask conv + sigmoid + blend."""
    HW = H * W
    h = h_ref[0].astype(jnp.float32)       # (Ch,  HW)
    ze = ze_ref[0].astype(jnp.float32)     # (Cef, HW)
    zf = zf_ref[0].astype(jnp.float32)     # (Cef, HW)
    wf = wf_ref[...].astype(jnp.float32)   # (4, Ch, Cef)  [E1, E2, F1, F2]  (loaded once)
    bf = bf_ref[...].astype(jnp.float32)   # (4, Ch, 1)
    wm = wm_ref[...].astype(jnp.float32)   # (Ch, 9)       mask conv weight
    bm = bm_ref[...].astype(jnp.float32)   # (1, 1)        mask conv bias

    # InstanceNorm2d(affine=False): per-channel mean / biased variance over spatial dims.
    mean = jnp.mean(h, axis=1, keepdims=True)
    cent = h - mean
    var = jnp.mean(cent * cent, axis=1, keepdims=True)
    hn = cent * lax.rsqrt(var + _EPS)                              # (Ch, HW)

    # 1x1 convs as MXU matmuls, weights on the LHS so results stay lane-dense.
    gE = jnp.dot(wf[0], ze, preferred_element_type=jnp.float32) + bf[0]
    bE = jnp.dot(wf[1], ze, preferred_element_type=jnp.float32) + bf[1]
    gF = jnp.dot(wf[2], zf, preferred_element_type=jnp.float32) + bf[2]
    bF = jnp.dot(wf[3], zf, preferred_element_type=jnp.float32) + bf[3]
    E = gE * hn + bE
    Fv = gF * hn + bF

    # Mask branch: replication-padded 3x3 conv of hn down to 1 channel, + bias, sigmoid.
    first_col, last_col = _col_masks(hn.shape, W)
    rows = [_shift_rows(hn, dy, H, W) for dy in (-1, 0, 1)]        # hoisted over taps
    m_acc = jnp.zeros((1, HW), jnp.float32)
    for tap in range(9):
        dy = tap // 3 - 1
        dx = tap % 3 - 1
        sh = _shift_cols(rows[dy + 1], dx, first_col, last_col)
        m_acc = m_acc + jnp.sum(wm[:, tap:tap + 1] * sh, axis=0, keepdims=True)
    logit = m_acc + bm                                             # (1, HW)
    M = 1.0 / (1.0 + jnp.exp(-logit))                              # sigmoid

    o_ref[0] = (M * E + (1.0 - M) * Fv).astype(o_ref.dtype)


def _lrelu_conv3x3_kernel(x_ref, w_ref, o_ref, *, H, W):
    """LeakyReLU(0.2) -> replication-pad(1) -> 3x3 conv (no bias), one batch element."""
    x = x_ref[0].astype(jnp.float32)
    y = jnp.where(x > 0, x, _NEG_SLOPE * x)
    w9 = w_ref[...].astype(jnp.float32)                            # (9, Cout, Cin), loaded once
    o_ref[0] = _conv3x3_reppad(y, w9, H, W).astype(o_ref.dtype)


def _lrelu_conv3x3_res_kernel(x_ref, res_ref, w_ref, o_ref, *, H, W):
    """Same as above with the FuseBlock residual add fused into the final store."""
    x = x_ref[0].astype(jnp.float32)
    y = jnp.where(x > 0, x, _NEG_SLOPE * x)
    w9 = w_ref[...].astype(jnp.float32)
    acc = _conv3x3_reppad(y, w9, H, W) + res_ref[0].astype(jnp.float32)
    o_ref[0] = acc.astype(o_ref.dtype)


# --------------------------------------------------------------------------------------
# Wrappers (pallas_call plumbing). All arrays travel as (B, C, H*W) — a free reshape of NCHW.
# --------------------------------------------------------------------------------------
def _fuse_layer(h, z_e, z_f, p, *, vmem_limit=_VMEM_LIMIT):
    B, Ch, H, W = h.shape
    Cef = z_e.shape[1]
    HW = H * W
    h2 = h.reshape(B, Ch, HW)
    ze2 = z_e.reshape(B, Cef, HW)
    zf2 = z_f.reshape(B, Cef, HW)
    w_film = jnp.stack([p["wE1"], p["wE2"], p["wF1"], p["wF2"]])           # (4, Ch, Cef)
    b_film = jnp.stack([p["bE1"], p["bE2"], p["bF1"], p["bF2"]])[..., None]  # (4, Ch, 1)
    w_mask = p["wM"].reshape(Ch, 9)                                        # (1,Ch,3,3) -> (Ch,9)
    b_mask = p["bM"].reshape(1, 1)

    kernel = functools.partial(_fuse_layer_kernel, H=H, W=W)
    out = pl.pallas_call(
        kernel,
        out_shape=jax.ShapeDtypeStruct((B, Ch, HW), h.dtype),
        grid=(B,),
        in_specs=[
            pl.BlockSpec((1, Ch, HW), lambda b: (b, 0, 0)),
            pl.BlockSpec((1, Cef, HW), lambda b: (b, 0, 0)),
            pl.BlockSpec((1, Cef, HW), lambda b: (b, 0, 0)),
            pl.BlockSpec((4, Ch, Cef), lambda b: (0, 0, 0)),
            pl.BlockSpec((4, Ch, 1), lambda b: (0, 0, 0)),
            pl.BlockSpec((Ch, 9), lambda b: (0, 0)),
            pl.BlockSpec((1, 1), lambda b: (0, 0)),
        ],
        out_specs=pl.BlockSpec((1, Ch, HW), lambda b: (b, 0, 0)),
        compiler_params=pltpu.CompilerParams(
            dimension_semantics=("parallel",),
            vmem_limit_bytes=vmem_limit),
    )(h2, ze2, zf2, w_film, b_film, w_mask, b_mask)
    return out.reshape(B, Ch, H, W)


def _lrelu_conv3x3(x, w, residual=None, *, vmem_limit=_VMEM_LIMIT):
    B, Cin, H, W = x.shape
    Cout = w.shape[0]
    HW = H * W
    x2 = x.reshape(B, Cin, HW)
    w9 = jnp.transpose(w, (2, 3, 0, 1)).reshape(9, Cout, Cin)   # tap = ky*3 + kx

    in_specs = [pl.BlockSpec((1, Cin, HW), lambda b: (b, 0, 0))]
    args = [x2]
    if residual is not None:
        in_specs.append(pl.BlockSpec((1, Cout, HW), lambda b: (b, 0, 0)))
        args.append(residual.reshape(B, Cout, HW))
        kernel = functools.partial(_lrelu_conv3x3_res_kernel, H=H, W=W)
    else:
        kernel = functools.partial(_lrelu_conv3x3_kernel, H=H, W=W)
    in_specs.append(pl.BlockSpec((9, Cout, Cin), lambda b: (0, 0, 0)))
    args.append(w9)

    out = pl.pallas_call(
        kernel,
        out_shape=jax.ShapeDtypeStruct((B, Cout, HW), x.dtype),
        grid=(B,),
        in_specs=in_specs,
        out_specs=pl.BlockSpec((1, Cout, HW), lambda b: (b, 0, 0)),
        compiler_params=pltpu.CompilerParams(
            dimension_semantics=("parallel",),
            vmem_limit_bytes=vmem_limit),
    )(*args)
    return out.reshape(B, Cout, H, W)


def fuse_block_forward(params, h, z_e, z_f, *, cin, cout):
    x = _fuse_layer(h, z_e, z_f, params["AAD1"])
    x = _lrelu_conv3x3(x, params["conv1_w"])
    x = _fuse_layer(x, z_e, z_f, params["AAD2"])
    if cin != cout:
        skip = _fuse_layer(h, z_e, z_f, params["AAD3"])
        skip = _lrelu_conv3x3(skip, params["conv3_w"])
    else:
        skip = h
    # conv2 with the `x + h` residual add fused into its output store.
    return _lrelu_conv3x3(x, params["conv2_w"], residual=skip)


# --------------------------------------------------------------------------------------
# Parameter init (deterministic; PyTorch stores 1x1 conv weights as (Cout,Cin,1,1) -- we keep
# the equivalent (Cout,Cin) matrices).
# --------------------------------------------------------------------------------------
def _init_fuse_layer(key, c_h, c_ef):
    ks = jax.random.split(key, 10)
    s1 = 1.0 / np.sqrt(c_ef)
    sm = 1.0 / np.sqrt(9 * c_h)

    def nrm(k, shape, s):
        return jax.random.normal(k, shape, jnp.float32) * s

    return {
        "wE1": nrm(ks[0], (c_h, c_ef), s1), "bE1": nrm(ks[1], (c_h,), 0.1),
        "wE2": nrm(ks[2], (c_h, c_ef), s1), "bE2": nrm(ks[3], (c_h,), 0.1),
        "wF1": nrm(ks[4], (c_h, c_ef), s1), "bF1": nrm(ks[5], (c_h,), 0.1),
        "wF2": nrm(ks[6], (c_h, c_ef), s1), "bF2": nrm(ks[7], (c_h,), 0.1),
        "wM": nrm(ks[8], (1, c_h, 3, 3), sm), "bM": nrm(ks[9], (1,), 0.1),
    }


def init_fuse_block(key, cin, cout, c_ef):
    ks = jax.random.split(key, 6)
    s3 = 1.0 / np.sqrt(9 * cin)
    params = {
        "AAD1": _init_fuse_layer(ks[0], cin, c_ef),
        "conv1_w": jax.random.normal(ks[1], (cin, cin, 3, 3), jnp.float32) * s3,
        "AAD2": _init_fuse_layer(ks[2], cin, c_ef),
        "conv2_w": jax.random.normal(ks[3], (cout, cin, 3, 3), jnp.float32) * s3,
    }
    if cin != cout:
        params["AAD3"] = _init_fuse_layer(ks[4], cin, c_ef)
        params["conv3_w"] = jax.random.normal(ks[5], (cout, cin, 3, 3), jnp.float32) * s3
    return params


# --------------------------------------------------------------------------------------
# Pure-JAX reference (no Pallas) for correctness checking.
# --------------------------------------------------------------------------------------
def _instance_norm_ref(x):
    mean = jnp.mean(x, axis=(2, 3), keepdims=True)
    var = jnp.mean(jnp.square(x - mean), axis=(2, 3), keepdims=True)
    return (x - mean) * lax.rsqrt(var + _EPS)


def _conv1x1_ref(z, w, b):
    return jnp.einsum("oc,bchw->bohw", w, z, precision="highest") + b[None, :, None, None]


def _conv3x3_reppad_ref(x, w, b=None):
    Bz, _, H, W = x.shape
    xp = jnp.pad(x, ((0, 0), (0, 0), (1, 1), (1, 1)), mode="edge")
    out = jnp.zeros((Bz, w.shape[0], H, W), jnp.float32)
    for ky in range(3):
        for kx in range(3):
            out = out + jnp.einsum("oi,bihw->bohw", w[:, :, ky, kx],
                                   xp[:, :, ky:ky + H, kx:kx + W], precision="highest")
    if b is not None:
        out = out + b[None, :, None, None]
    return out


def _fuse_layer_ref(p, h, z_e, z_f):
    hn = _instance_norm_ref(h)
    E = _conv1x1_ref(z_e, p["wE1"], p["bE1"]) * hn + _conv1x1_ref(z_e, p["wE2"], p["bE2"])
    Fv = _conv1x1_ref(z_f, p["wF1"], p["bF1"]) * hn + _conv1x1_ref(z_f, p["wF2"], p["bF2"])
    logit = _conv3x3_reppad_ref(hn, p["wM"], p["bM"])
    M = 1.0 / (1.0 + jnp.exp(-logit))
    return M * E + (1.0 - M) * Fv


def _lrelu_conv_ref(x, w):
    y = jnp.where(x > 0, x, _NEG_SLOPE * x)
    return _conv3x3_reppad_ref(y, w)


def fuse_block_ref(params, h, z_e, z_f, cin, cout):
    x = _fuse_layer_ref(params["AAD1"], h, z_e, z_f)
    x = _lrelu_conv_ref(x, params["conv1_w"])
    x = _fuse_layer_ref(params["AAD2"], x, z_e, z_f)
    x = _lrelu_conv_ref(x, params["conv2_w"])
    if cin != cout:
        h = _lrelu_conv_ref(_fuse_layer_ref(params["AAD3"], h, z_e, z_f), params["conv3_w"])
    return x + h


# --------------------------------------------------------------------------------------
if __name__ == "__main__":
    key = jax.random.PRNGKey(0)
    B, H, W = 2, 16, 16
    c_ef = 16

    # Exercise both FuseBlock branches: identity residual (cin == cout) and AAD3/conv3 residual.
    for cin, cout in ((32, 32), (32, 16)):
        kp, kh, ke, kf, key = jax.random.split(key, 5)
        params = init_fuse_block(kp, cin, cout, c_ef)
        h = jax.random.normal(kh, (B, cin, H, W), jnp.float32)
        z_e = jax.random.normal(ke, (B, c_ef, H, W), jnp.float32)
        z_f = jax.random.normal(kf, (B, c_ef, H, W), jnp.float32)

        fwd = jax.jit(functools.partial(fuse_block_forward, cin=cin, cout=cout))
        out = jax.block_until_ready(fwd(params, h, z_e, z_f))

        ref = fuse_block_ref(params, h, z_e, z_f, cin, cout)
        assert out.shape == (B, cout, H, W), (out.shape, (B, cout, H, W))
        np.testing.assert_allclose(np.asarray(out), np.asarray(ref), rtol=2e-2, atol=2e-2)

    print("KERNEL_OK")
</pallas_src>

<mosaic_0001>
module attributes {stable_mosaic.version = 11 : i64} {
  func.func @_lrelu_conv3x3_kernel(%arg0: i32, %arg1: memref<1x32x256xf32, #tpu.memory_space<vmem>>, %arg2: memref<9x32x32xf32, #tpu.memory_space<vmem>>, %arg3: memref<1x32x256xf32, #tpu.memory_space<vmem>>) attributes {dimension_semantics = [#tpu.dimension_semantics<parallel>], iteration_bounds = array<i64: 2>, scalar_prefetch = 0 : i64, scratch_operands = 0 : i64, tpu.core_type = #tpu.core_type<tc>, window_params = [{transform_indices = @transform_0, window_bounds = array<i64: 1, 32, 256>}, {pipeline_mode = #tpu.pipeline_mode<synchronous>, transform_indices = @transform_1, window_bounds = array<i64: 9, 32, 32>}, {transform_indices = @transform_2, window_bounds = array<i64: 1, 32, 256>}]} {
    %c0 = arith.constant 0 : index
    %c0_0 = arith.constant 0 : index
    %c0_1 = arith.constant 0 : index
    %0 = vector.load %arg1[%c0, %c0_0, %c0_1] : memref<1x32x256xf32, #tpu.memory_space<vmem>>, vector<1x32x256xf32>
    %1 = vector.shape_cast %0 : vector<1x32x256xf32> to vector<32x256xf32>
    %cst = arith.constant 0.000000e+00 : f32
    %2 = vector.broadcast %cst : f32 to vector<32x256xf32>
    %3 = arith.cmpf ogt, %1, %2 : vector<32x256xf32>
    %cst_2 = arith.constant 2.000000e-01 : f32
    %4 = vector.broadcast %cst_2 : f32 to vector<32x256xf32>
    %5 = arith.mulf %4, %1 : vector<32x256xf32>
    %6 = arith.select %3, %1, %5 : vector<32x256xi1>, vector<32x256xf32>
    %c0_3 = arith.constant 0 : index
    %c0_4 = arith.constant 0 : index
    %c0_5 = arith.constant 0 : index
    %7 = vector.load %arg2[%c0_3, %c0_4, %c0_5] : memref<9x32x32xf32, #tpu.memory_space<vmem>>, vector<9x32x32xf32>
    %8 = tpu.iota {dimensions = array<i32: 1>} : vector<32x256xi32>
    %c16_i32 = arith.constant 16 : i32
    %c0_i32 = arith.constant 0 : i32
    %9 = arith.cmpi eq, %c16_i32, %c0_i32 : i32
    %c1_i32 = arith.constant 1 : i32
    %10 = arith.select %9, %c1_i32, %c16_i32 : i32
    %11 = vector.broadcast %10 : i32 to vector<32x256xi32>
    %12 = arith.remsi %8, %11 : vector<32x256xi32>
    %c0_i32_6 = arith.constant 0 : i32
    %13 = vector.broadcast %c0_i32_6 : i32 to vector<32x256xi32>
    %14 = arith.cmpi ne, %12, %13 : vector<32x256xi32>
    %c0_i32_7 = arith.constant 0 : i32
    %15 = vector.broadcast %c0_i32_7 : i32 to vector<32x256xi32>
    %16 = arith.cmpi slt, %12, %15 : vector<32x256xi32>
    %c0_i32_8 = arith.constant 0 : i32
    %17 = arith.cmpi slt, %10, %c0_i32_8 : i32
    %18 = vector.broadcast %17 : i1 to vector<32x256xi1>
    %19 = vector.broadcast %18 : vector<32x256xi1> to vector<32x256xi1>
    %20 = arith.xori %16, %19 : vector<32x256xi1>
    %21 = arith.andi %20, %14 : vector<32x256xi1>
    %22 = vector.broadcast %10 : i32 to vector<32x256xi32>
    %23 = arith.addi %12, %22 : vector<32x256xi32>
    %24 = arith.select %21, %23, %12 : vector<32x256xi1>, vector<32x256xi32>
    %c0_i32_9 = arith.constant 0 : i32
    %25 = vector.broadcast %c0_i32_9 : i32 to vector<32x256xi32>
    %26 = arith.cmpi eq, %24, %25 : vector<32x256xi32>
    %c15_i32 = arith.constant 15 : i32
    %27 = vector.broadcast %c15_i32 : i32 to vector<32x256xi32>
    %28 = arith.cmpi eq, %24, %27 : vector<32x256xi32>
    %29 = vector.extract_strided_slice %6 {offsets = [0, 0], sizes = [32, 16], strides = [1, 1]} : vector<32x256xf32> to vector<32x16xf32>
    %30 = vector.extract_strided_slice %6 {offsets = [0, 0], sizes = [32, 240], strides = [1, 1]} : vector<32x256xf32> to vector<32x240xf32>
    %31 = tpu.concatenate %29, %30 in 1 : vector<32x16xf32>, vector<32x240xf32> -> vector<32x256xf32>
    %32 = vector.extract_strided_slice %6 {offsets = [0, 16], sizes = [32, 240], strides = [1, 1]} : vector<32x256xf32> to vector<32x240xf32>
    %33 = vector.extract_strided_slice %6 {offsets = [0, 240], sizes = [32, 16], strides = [1, 1]} : vector<32x256xf32> to vector<32x16xf32>
    %34 = tpu.concatenate %32, %33 in 1 : vector<32x240xf32>, vector<32x16xf32> -> vector<32x256xf32>
    %cst_10 = arith.constant 0.000000e+00 : f32
    %35 = vector.broadcast %cst_10 : f32 to vector<32x256xf32>
    %36 = vector.extract_strided_slice %31 {offsets = [0, 255], sizes = [32, 1], strides = [1, 1]} : vector<32x256xf32> to vector<32x1xf32>
    %37 = vector.extract_strided_slice %31 {offsets = [0, 0], sizes = [32, 255], strides = [1, 1]} : vector<32x256xf32> to vector<32x255xf32>
    %38 = tpu.concatenate %36, %37 in 1 : vector<32x1xf32>, vector<32x255xf32> -> vector<32x256xf32>
    %39 = arith.select %26, %31, %38 : vector<32x256xi1>, vector<32x256xf32>
    %40 = vector.extract_strided_slice %7 {offsets = [0, 0, 0], sizes = [1, 32, 32], strides = [1, 1, 1]} : vector<9x32x32xf32> to vector<1x32x32xf32>
    %41 = vector.shape_cast %40 : vector<1x32x32xf32> to vector<32x32xf32>
    %cst_11 = arith.constant dense<0.000000e+00> : vector<32x256xf32>
    %42 = tpu.matmul %41, %39, %cst_11 {dimension_numbers = #tpu.dot_dimension_numbers<[1], [0], [0], [1], [0, 0, 1, 1], [], []>} : vector<32x32xf32>, vector<32x256xf32>, vector<32x256xf32> -> vector<32x256xf32>
    %43 = arith.addf %35, %42 : vector<32x256xf32>
    %44 = vector.extract_strided_slice %7 {offsets = [1, 0, 0], sizes = [1, 32, 32], strides = [1, 1, 1]} : vector<9x32x32xf32> to vector<1x32x32xf32>
    %45 = vector.shape_cast %44 : vector<1x32x32xf32> to vector<32x32xf32>
    %cst_12 = arith.constant dense<0.000000e+00> : vector<32x256xf32>
    %46 = tpu.matmul %45, %31, %cst_12 {dimension_numbers = #tpu.dot_dimension_numbers<[1], [0], [0], [1], [0, 0, 1, 1], [], []>} : vector<32x32xf32>, vector<32x256xf32>, vector<32x256xf32> -> vector<32x256xf32>
    %47 = arith.addf %43, %46 : vector<32x256xf32>
    %48 = vector.extract_strided_slice %31 {offsets = [0, 1], sizes = [32, 255], strides = [1, 1]} : vector<32x256xf32> to vector<32x255xf32>
    %49 = vector.extract_strided_slice %31 {offsets = [0, 0], sizes = [32, 1], strides = [1, 1]} : vector<32x256xf32> to vector<32x1xf32>
    %50 = tpu.concatenate %48, %49 in 1 : vector<32x255xf32>, vector<32x1xf32> -> vector<32x256xf32>
    %51 = arith.select %28, %31, %50 : vector<32x256xi1>, vector<32x256xf32>
    %52 = vector.extract_strided_slice %7 {offsets = [2, 0, 0], sizes = [1, 32, 32], strides = [1, 1, 1]} : vector<9x32x32xf32> to vector<1x32x32xf32>
    %53 = vector.shape_cast %52 : vector<1x32x32xf32> to vector<32x32xf32>
    %cst_13 = arith.constant dense<0.000000e+00> : vector<32x256xf32>
    %54 = tpu.matmul %53, %51, %cst_13 {dimension_numbers = #tpu.dot_dimension_numbers<[1], [0], [0], [1], [0, 0, 1, 1], [], []>} : vector<32x32xf32>, vector<32x256xf32>, vector<32x256xf32> -> vector<32x256xf32>
    %55 = arith.addf %47, %54 : vector<32x256xf32>
    %56 = vector.extract_strided_slice %6 {offsets = [0, 255], sizes = [32, 1], strides = [1, 1]} : vector<32x256xf32> to vector<32x1xf32>
    %57 = vector.extract_strided_slice %6 {offsets = [0, 0], sizes = [32, 255], strides = [1, 1]} : vector<32x256xf32> to vector<32x255xf32>
    %58 = tpu.concatenate %56, %57 in 1 : vector<32x1xf32>, vector<32x255xf32> -> vector<32x256xf32>
    %59 = arith.select %26, %6, %58 : vector<32x256xi1>, vector<32x256xf32>
    %60 = vector.extract_strided_slice %7 {offsets = [3, 0, 0], sizes = [1, 32, 32], strides = [1, 1, 1]} : vector<9x32x32xf32> to vector<1x32x32xf32>
    %61 = vector.shape_cast %60 : vector<1x32x32xf32> to vector<32x32xf32>
    %cst_14 = arith.constant dense<0.000000e+00> : vector<32x256xf32>
    %62 = tpu.matmul %61, %59, %cst_14 {dimension_numbers = #tpu.dot_dimension_numbers<[1], [0], [0], [1], [0, 0, 1, 1], [], []>} : vector<32x32xf32>, vector<32x256xf32>, vector<32x256xf32> -> vector<32x256xf32>
    %63 = arith.addf %55, %62 : vector<32x256xf32>
    %64 = vector.extract_strided_slice %7 {offsets = [4, 0, 0], sizes = [1, 32, 32], strides = [1, 1, 1]} : vector<9x32x32xf32> to vector<1x32x32xf32>
    %65 = vector.shape_cast %64 : vector<1x32x32xf32> to vector<32x32xf32>
    %cst_15 = arith.constant dense<0.000000e+00> : vector<32x256xf32>
    %66 = tpu.matmul %65, %6, %cst_15 {dimension_numbers = #tpu.dot_dimension_numbers<[1], [0], [0], [1], [0, 0, 1, 1], [], []>} : vector<32x32xf32>, vector<32x256xf32>, vector<32x256xf32> -> vector<32x256xf32>
    %67 = arith.addf %63, %66 : vector<32x256xf32>
    %68 = vector.extract_strided_slice %6 {offsets = [0, 1], sizes = [32, 255], strides = [1, 1]} : vector<32x256xf32> to vector<32x255xf32>
    %69 = vector.extract_strided_slice %6 {offsets = [0, 0], sizes = [32, 1], strides = [1, 1]} : vector<32x256xf32> to vector<32x1xf32>
    %70 = tpu.concatenate %68, %69 in 1 : vector<32x255xf32>, vector<32x1xf32> -> vector<32x256xf32>
    %71 = arith.select %28, %6, %70 : vector<32x256xi1>, vector<32x256xf32>
    %72 = vector.extract_strided_slice %7 {offsets = [5, 0, 0], sizes = [1, 32, 32], strides = [1, 1, 1]} : vector<9x32x32xf32> to vector<1x32x32xf32>
    %73 = vector.shape_cast %72 : vector<1x32x32xf32> to vector<32x32xf32>
    %cst_16 = arith.constant dense<0.000000e+00> : vector<32x256xf32>
    %74 = tpu.matmul %73, %71, %cst_16 {dimension_numbers = #tpu.dot_dimension_numbers<[1], [0], [0], [1], [0, 0, 1, 1], [], []>} : vector<32x32xf32>, vector<32x256xf32>, vector<32x256xf32> -> vector<32x256xf32>
    %75 = arith.addf %67, %74 : vector<32x256xf32>
    %76 = vector.extract_strided_slice %34 {offsets = [0, 255], sizes = [32, 1], strides = [1, 1]} : vector<32x256xf32> to vector<32x1xf32>
    %77 = vector.extract_strided_slice %34 {offsets = [0, 0], sizes = [32, 255], strides = [1, 1]} : vector<32x256xf32> to vector<32x255xf32>
    %78 = tpu.concatenate %76, %77 in 1 : vector<32x1xf32>, vector<32x255xf32> -> vector<32x256xf32>
    %79 = arith.select %26, %34, %78 : vector<32x256xi1>, vector<32x256xf32>
    %80 = vector.extract_strided_slice %7 {offsets = [6, 0, 0], sizes = [1, 32, 32], strides = [1, 1, 1]} : vector<9x32x32xf32> to vector<1x32x32xf32>
    %81 = vector.shape_cast %80 : vector<1x32x32xf32> to vector<32x32xf32>
    %cst_17 = arith.constant dense<0.000000e+00> : vector<32x256xf32>
    %82 = tpu.matmul %81, %79, %cst_17 {dimension_numbers = #tpu.dot_dimension_numbers<[1], [0], [0], [1], [0, 0, 1, 1], [], []>} : vector<32x32xf32>, vector<32x256xf32>, vector<32x256xf32> -> vector<32x256xf32>
    %83 = arith.addf %75, %82 : vector<32x256xf32>
    %84 = vector.extract_strided_slice %7 {offsets = [7, 0, 0], sizes = [1, 32, 32], strides = [1, 1, 1]} : vector<9x32x32xf32> to vector<1x32x32xf32>
    %85 = vector.shape_cast %84 : vector<1x32x32xf32> to vector<32x32xf32>
    %cst_18 = arith.constant dense<0.000000e+00> : vector<32x256xf32>
    %86 = tpu.matmul %85, %34, %cst_18 {dimension_numbers = #tpu.dot_dimension_numbers<[1], [0], [0], [1], [0, 0, 1, 1], [], []>} : vector<32x32xf32>, vector<32x256xf32>, vector<32x256xf32> -> vector<32x256xf32>
    %87 = arith.addf %83, %86 : vector<32x256xf32>
    %88 = vector.extract_strided_slice %34 {offsets = [0, 1], sizes = [32, 255], strides = [1, 1]} : vector<32x256xf32> to vector<32x255xf32>
    %89 = vector.extract_strided_slice %34 {offsets = [0, 0], sizes = [32, 1], strides = [1, 1]} : vector<32x256xf32> to vector<32x1xf32>
    %90 = tpu.concatenate %88, %89 in 1 : vector<32x255xf32>, vector<32x1xf32> -> vector<32x256xf32>
    %91 = arith.select %28, %34, %90 : vector<32x256xi1>, vector<32x256xf32>
    %92 = vector.extract_strided_slice %7 {offsets = [8, 0, 0], sizes = [1, 32, 32], strides = [1, 1, 1]} : vector<9x32x32xf32> to vector<1x32x32xf32>
    %93 = vector.shape_cast %92 : vector<1x32x32xf32> to vector<32x32xf32>
    %cst_19 = arith.constant dense<0.000000e+00> : vector<32x256xf32>
    %94 = tpu.matmul %93, %91, %cst_19 {dimension_numbers = #tpu.dot_dimension_numbers<[1], [0], [0], [1], [0, 0, 1, 1], [], []>} : vector<32x32xf32>, vector<32x256xf32>, vector<32x256xf32> -> vector<32x256xf32>
    %95 = arith.addf %87, %94 : vector<32x256xf32>
    %c0_20 = arith.constant 0 : index
    %c0_21 = arith.constant 0 : index
    %c0_22 = arith.constant 0 : index
    %96 = vector.load %arg3[%c0_20, %c0_21, %c0_22] : memref<1x32x256xf32, #tpu.memory_space<vmem>>, vector<1x32x256xf32>
    %97 = vector.shape_cast %96 : vector<1x32x256xf32> to vector<32x256xf32>
    %98 = vector.shape_cast %95 : vector<32x256xf32> to vector<1x32x256xf32>
    tpu.vector_store %arg3[%c0_20, %c0_21, %c0_22], %98 {strides = array<i32>} : memref<1x32x256xf32, #tpu.memory_space<vmem>>, vector<1x32x256xf32>,
    return
  }
  func.func @transform_0(%arg0: i32) -> (i32, i32, i32) {
    %c0_i32 = arith.constant 0 : i32
    %c0_i32_0 = arith.constant 0 : i32
    %c0_i32_1 = arith.constant 0 : i32
    return %arg0, %c0_i32, %c0_i32_0 : i32, i32, i32
  }
  func.func @transform_1(%arg0: i32) -> (i32, i32, i32) {
    %c0_i32 = arith.constant 0 : i32
    %c0_i32_0 = arith.constant 0 : i32
    %c0_i32_1 = arith.constant 0 : i32
    %c0_i32_2 = arith.constant 0 : i32
    return %c0_i32, %c0_i32_0, %c0_i32_1 : i32, i32, i32
  }
  func.func @transform_2(%arg0: i32) -> (i32, i32, i32) {
    %c0_i32 = arith.constant 0 : i32
    %c0_i32_0 = arith.constant 0 : i32
    %c0_i32_1 = arith.constant 0 : i32
    return %arg0, %c0_i32, %c0_i32_0 : i32, i32, i32
  }
}

module attributes {stable_mosaic.version = 11 : i64} {
  func.func @_lrelu_conv3x3_res_kernel(%arg0: i32, %arg1: memref<1x32x256xf32, #tpu.memory_space<vmem>>, %arg2: memref<1x32x256xf32, #tpu.memory_space<vmem>>, %arg3: memref<9x32x32xf32, #tpu.memory_space<vmem>>, %arg4: memref<1x32x256xf32, #tpu.memory_space<vmem>>) attributes {dimension_semantics = [#tpu.dimension_semantics<parallel>], iteration_bounds = array<i64: 2>, scalar_prefetch = 0 : i64, scratch_operands = 0 : i64, tpu.core_type = #tpu.core_type<tc>, window_params = [{transform_indices = @transform_0, window_bounds = array<i64: 1, 32, 256>}, {transform_indices = @transform_1, window_bounds = array<i64: 1, 32, 256>}, {pipeline_mode = #tpu.pipeline_mode<synchronous>, transform_indices = @transform_2, window_bounds = array<i64: 9, 32, 32>}, {transform_indices = @transform_3, window_bounds = array<i64: 1, 32, 256>}]} {
    %c0 = arith.constant 0 : index
    %c0_0 = arith.constant 0 : index
    %c0_1 = arith.constant 0 : index
    %0 = vector.load %arg1[%c0, %c0_0, %c0_1] : memref<1x32x256xf32, #tpu.memory_space<vmem>>, vector<1x32x256xf32>
    %1 = vector.shape_cast %0 : vector<1x32x256xf32> to vector<32x256xf32>
    %cst = arith.constant 0.000000e+00 : f32
    %2 = vector.broadcast %cst : f32 to vector<32x256xf32>
    %3 = arith.cmpf ogt, %1, %2 : vector<32x256xf32>
    %cst_2 = arith.constant 2.000000e-01 : f32
    %4 = vector.broadcast %cst_2 : f32 to vector<32x256xf32>
    %5 = arith.mulf %4, %1 : vector<32x256xf32>
    %6 = arith.select %3, %1, %5 : vector<32x256xi1>, vector<32x256xf32>
    %c0_3 = arith.constant 0 : index
    %c0_4 = arith.constant 0 : index
    %c0_5 = arith.constant 0 : index
    %7 = vector.load %arg3[%c0_3, %c0_4, %c0_5] : memref<9x32x32xf32, #tpu.memory_space<vmem>>, vector<9x32x32xf32>
    %8 = tpu.iota {dimensions = array<i32: 1>} : vector<32x256xi32>
    %c16_i32 = arith.constant 16 : i32
    %c0_i32 = arith.constant 0 : i32
    %9 = arith.cmpi eq, %c16_i32, %c0_i32 : i32
    %c1_i32 = arith.constant 1 : i32
    %10 = arith.select %9, %c1_i32, %c16_i32 : i32
    %11 = vector.broadcast %10 : i32 to vector<32x256xi32>
    %12 = arith.remsi %8, %11 : vector<32x256xi32>
    %c0_i32_6 = arith.constant 0 : i32
    %13 = vector.broadcast %c0_i32_6 : i32 to vector<32x256xi32>
    %14 = arith.cmpi ne, %12, %13 : vector<32x256xi32>
    %c0_i32_7 = arith.constant 0 : i32
    %15 = vector.broadcast %c0_i32_7 : i32 to vector<32x256xi32>
    %16 = arith.cmpi slt, %12, %15 : vector<32x256xi32>
    %c0_i32_8 = arith.constant 0 : i32
    %17 = arith.cmpi slt, %10, %c0_i32_8 : i32
    %18 = vector.broadcast %17 : i1 to vector<32x256xi1>
    %19 = vector.broadcast %18 : vector<32x256xi1> to vector<32x256xi1>
    %20 = arith.xori %16, %19 : vector<32x256xi1>
    %21 = arith.andi %20, %14 : vector<32x256xi1>
    %22 = vector.broadcast %10 : i32 to vector<32x256xi32>
    %23 = arith.addi %12, %22 : vector<32x256xi32>
    %24 = arith.select %21, %23, %12 : vector<32x256xi1>, vector<32x256xi32>
    %c0_i32_9 = arith.constant 0 : i32
    %25 = vector.broadcast %c0_i32_9 : i32 to vector<32x256xi32>
    %26 = arith.cmpi eq, %24, %25 : vector<32x256xi32>
    %c15_i32 = arith.constant 15 : i32
    %27 = vector.broadcast %c15_i32 : i32 to vector<32x256xi32>
    %28 = arith.cmpi eq, %24, %27 : vector<32x256xi32>
    %29 = vector.extract_strided_slice %6 {offsets = [0, 0], sizes = [32, 16], strides = [1, 1]} : vector<32x256xf32> to vector<32x16xf32>
    %30 = vector.extract_strided_slice %6 {offsets = [0, 0], sizes = [32, 240], strides = [1, 1]} : vector<32x256xf32> to vector<32x240xf32>
    %31 = tpu.concatenate %29, %30 in 1 : vector<32x16xf32>, vector<32x240xf32> -> vector<32x256xf32>
    %32 = vector.extract_strided_slice %6 {offsets = [0, 16], sizes = [32, 240], strides = [1, 1]} : vector<32x256xf32> to vector<32x240xf32>
    %33 = vector.extract_strided_slice %6 {offsets = [0, 240], sizes = [32, 16], strides = [1, 1]} : vector<32x256xf32> to vector<32x16xf32>
    %34 = tpu.concatenate %32, %33 in 1 : vector<32x240xf32>, vector<32x16xf32> -> vector<32x256xf32>
    %cst_10 = arith.constant 0.000000e+00 : f32
    %35 = vector.broadcast %cst_10 : f32 to vector<32x256xf32>
    %36 = vector.extract_strided_slice %31 {offsets = [0, 255], sizes = [32, 1], strides = [1, 1]} : vector<32x256xf32> to vector<32x1xf32>
    %37 = vector.extract_strided_slice %31 {offsets = [0, 0], sizes = [32, 255], strides = [1, 1]} : vector<32x256xf32> to vector<32x255xf32>
    %38 = tpu.concatenate %36, %37 in 1 : vector<32x1xf32>, vector<32x255xf32> -> vector<32x256xf32>
    %39 = arith.select %26, %31, %38 : vector<32x256xi1>, vector<32x256xf32>
    %40 = vector.extract_strided_slice %7 {offsets = [0, 0, 0], sizes = [1, 32, 32], strides = [1, 1, 1]} : vector<9x32x32xf32> to vector<1x32x32xf32>
    %41 = vector.shape_cast %40 : vector<1x32x32xf32> to vector<32x32xf32>
    %cst_11 = arith.constant dense<0.000000e+00> : vector<32x256xf32>
    %42 = tpu.matmul %41, %39, %cst_11 {dimension_numbers = #tpu.dot_dimension_numbers<[1], [0], [0], [1], [0, 0, 1, 1], [], []>} : vector<32x32xf32>, vector<32x256xf32>, vector<32x256xf32> -> vector<32x256xf32>
    %43 = arith.addf %35, %42 : vector<32x256xf32>
    %44 = vector.extract_strided_slice %7 {offsets = [1, 0, 0], sizes = [1, 32, 32], strides = [1, 1, 1]} : vector<9x32x32xf32> to vector<1x32x32xf32>
    %45 = vector.shape_cast %44 : vector<1x32x32xf32> to vector<32x32xf32>
    %cst_12 = arith.constant dense<0.000000e+00> : vector<32x256xf32>
    %46 = tpu.matmul %45, %31, %cst_12 {dimension_numbers = #tpu.dot_dimension_numbers<[1], [0], [0], [1], [0, 0, 1, 1], [], []>} : vector<32x32xf32>, vector<32x256xf32>, vector<32x256xf32> -> vector<32x256xf32>
    %47 = arith.addf %43, %46 : vector<32x256xf32>
    %48 = vector.extract_strided_slice %31 {offsets = [0, 1], sizes = [32, 255], strides = [1, 1]} : vector<32x256xf32> to vector<32x255xf32>
    %49 = vector.extract_strided_slice %31 {offsets = [0, 0], sizes = [32, 1], strides = [1, 1]} : vector<32x256xf32> to vector<32x1xf32>
    %50 = tpu.concatenate %48, %49 in 1 : vector<32x255xf32>, vector<32x1xf32> -> vector<32x256xf32>
    %51 = arith.select %28, %31, %50 : vector<32x256xi1>, vector<32x256xf32>
    %52 = vector.extract_strided_slice %7 {offsets = [2, 0, 0], sizes = [1, 32, 32], strides = [1, 1, 1]} : vector<9x32x32xf32> to vector<1x32x32xf32>
    %53 = vector.shape_cast %52 : vector<1x32x32xf32> to vector<32x32xf32>
    %cst_13 = arith.constant dense<0.000000e+00> : vector<32x256xf32>
    %54 = tpu.matmul %53, %51, %cst_13 {dimension_numbers = #tpu.dot_dimension_numbers<[1], [0], [0], [1], [0, 0, 1, 1], [], []>} : vector<32x32xf32>, vector<32x256xf32>, vector<32x256xf32> -> vector<32x256xf32>
    %55 = arith.addf %47, %54 : vector<32x256xf32>
    %56 = vector.extract_strided_slice %6 {offsets = [0, 255], sizes = [32, 1], strides = [1, 1]} : vector<32x256xf32> to vector<32x1xf32>
    %57 = vector.extract_strided_slice %6 {offsets = [0, 0], sizes = [32, 255], strides = [1, 1]} : vector<32x256xf32> to vector<32x255xf32>
    %58 = tpu.concatenate %56, %57 in 1 : vector<32x1xf32>, vector<32x255xf32> -> vector<32x256xf32>
    %59 = arith.select %26, %6, %58 : vector<32x256xi1>, vector<32x256xf32>
    %60 = vector.extract_strided_slice %7 {offsets = [3, 0, 0], sizes = [1, 32, 32], strides = [1, 1, 1]} : vector<9x32x32xf32> to vector<1x32x32xf32>
    %61 = vector.shape_cast %60 : vector<1x32x32xf32> to vector<32x32xf32>
    %cst_14 = arith.constant dense<0.000000e+00> : vector<32x256xf32>
    %62 = tpu.matmul %61, %59, %cst_14 {dimension_numbers = #tpu.dot_dimension_numbers<[1], [0], [0], [1], [0, 0, 1, 1], [], []>} : vector<32x32xf32>, vector<32x256xf32>, vector<32x256xf32> -> vector<32x256xf32>
    %63 = arith.addf %55, %62 : vector<32x256xf32>
    %64 = vector.extract_strided_slice %7 {offsets = [4, 0, 0], sizes = [1, 32, 32], strides = [1, 1, 1]} : vector<9x32x32xf32> to vector<1x32x32xf32>
    %65 = vector.shape_cast %64 : vector<1x32x32xf32> to vector<32x32xf32>
    %cst_15 = arith.constant dense<0.000000e+00> : vector<32x256xf32>
    %66 = tpu.matmul %65, %6, %cst_15 {dimension_numbers = #tpu.dot_dimension_numbers<[1], [0], [0], [1], [0, 0, 1, 1], [], []>} : vector<32x32xf32>, vector<32x256xf32>, vector<32x256xf32> -> vector<32x256xf32>
    %67 = arith.addf %63, %66 : vector<32x256xf32>
    %68 = vector.extract_strided_slice %6 {offsets = [0, 1], sizes = [32, 255], strides = [1, 1]} : vector<32x256xf32> to vector<32x255xf32>
    %69 = vector.extract_strided_slice %6 {offsets = [0, 0], sizes = [32, 1], strides = [1, 1]} : vector<32x256xf32> to vector<32x1xf32>
    %70 = tpu.concatenate %68, %69 in 1 : vector<32x255xf32>, vector<32x1xf32> -> vector<32x256xf32>
    %71 = arith.select %28, %6, %70 : vector<32x256xi1>, vector<32x256xf32>
    %72 = vector.extract_strided_slice %7 {offsets = [5, 0, 0], sizes = [1, 32, 32], strides = [1, 1, 1]} : vector<9x32x32xf32> to vector<1x32x32xf32>
    %73 = vector.shape_cast %72 : vector<1x32x32xf32> to vector<32x32xf32>
    %cst_16 = arith.constant dense<0.000000e+00> : vector<32x256xf32>
    %74 = tpu.matmul %73, %71, %cst_16 {dimension_numbers = #tpu.dot_dimension_numbers<[1], [0], [0], [1], [0, 0, 1, 1], [], []>} : vector<32x32xf32>, vector<32x256xf32>, vector<32x256xf32> -> vector<32x256xf32>
    %75 = arith.addf %67, %74 : vector<32x256xf32>
    %76 = vector.extract_strided_slice %34 {offsets = [0, 255], sizes = [32, 1], strides = [1, 1]} : vector<32x256xf32> to vector<32x1xf32>
    %77 = vector.extract_strided_slice %34 {offsets = [0, 0], sizes = [32, 255], strides = [1, 1]} : vector<32x256xf32> to vector<32x255xf32>
    %78 = tpu.concatenate %76, %77 in 1 : vector<32x1xf32>, vector<32x255xf32> -> vector<32x256xf32>
    %79 = arith.select %26, %34, %78 : vector<32x256xi1>, vector<32x256xf32>
    %80 = vector.extract_strided_slice %7 {offsets = [6, 0, 0], sizes = [1, 32, 32], strides = [1, 1, 1]} : vector<9x32x32xf32> to vector<1x32x32xf32>
    %81 = vector.shape_cast %80 : vector<1x32x32xf32> to vector<32x32xf32>
    %cst_17 = arith.constant dense<0.000000e+00> : vector<32x256xf32>
    %82 = tpu.matmul %81, %79, %cst_17 {dimension_numbers = #tpu.dot_dimension_numbers<[1], [0], [0], [1], [0, 0, 1, 1], [], []>} : vector<32x32xf32>, vector<32x256xf32>, vector<32x256xf32> -> vector<32x256xf32>
    %83 = arith.addf %75, %82 : vector<32x256xf32>
    %84 = vector.extract_strided_slice %7 {offsets = [7, 0, 0], sizes = [1, 32, 32], strides = [1, 1, 1]} : vector<9x32x32xf32> to vector<1x32x32xf32>
    %85 = vector.shape_cast %84 : vector<1x32x32xf32> to vector<32x32xf32>
    %cst_18 = arith.constant dense<0.000000e+00> : vector<32x256xf32>
    %86 = tpu.matmul %85, %34, %cst_18 {dimension_numbers = #tpu.dot_dimension_numbers<[1], [0], [0], [1], [0, 0, 1, 1], [], []>} : vector<32x32xf32>, vector<32x256xf32>, vector<32x256xf32> -> vector<32x256xf32>
    %87 = arith.addf %83, %86 : vector<32x256xf32>
    %88 = vector.extract_strided_slice %34 {offsets = [0, 1], sizes = [32, 255], strides = [1, 1]} : vector<32x256xf32> to vector<32x255xf32>
    %89 = vector.extract_strided_slice %34 {offsets = [0, 0], sizes = [32, 1], strides = [1, 1]} : vector<32x256xf32> to vector<32x1xf32>
    %90 = tpu.concatenate %88, %89 in 1 : vector<32x255xf32>, vector<32x1xf32> -> vector<32x256xf32>
    %91 = arith.select %28, %34, %90 : vector<32x256xi1>, vector<32x256xf32>
    %92 = vector.extract_strided_slice %7 {offsets = [8, 0, 0], sizes = [1, 32, 32], strides = [1, 1, 1]} : vector<9x32x32xf32> to vector<1x32x32xf32>
    %93 = vector.shape_cast %92 : vector<1x32x32xf32> to vector<32x32xf32>
    %cst_19 = arith.constant dense<0.000000e+00> : vector<32x256xf32>
    %94 = tpu.matmul %93, %91, %cst_19 {dimension_numbers = #tpu.dot_dimension_numbers<[1], [0], [0], [1], [0, 0, 1, 1], [], []>} : vector<32x32xf32>, vector<32x256xf32>, vector<32x256xf32> -> vector<32x256xf32>
    %95 = arith.addf %87, %94 : vector<32x256xf32>
    %c0_20 = arith.constant 0 : index
    %c0_21 = arith.constant 0 : index
    %c0_22 = arith.constant 0 : index
    %96 = vector.load %arg2[%c0_20, %c0_21, %c0_22] : memref<1x32x256xf32, #tpu.memory_space<vmem>>, vector<1x32x256xf32>
    %97 = vector.shape_cast %96 : vector<1x32x256xf32> to vector<32x256xf32>
    %98 = arith.addf %95, %97 : vector<32x256xf32>
    %c0_23 = arith.constant 0 : index
    %c0_24 = arith.constant 0 : index
    %c0_25 = arith.constant 0 : index
    %99 = vector.load %arg4[%c0_23, %c0_24, %c0_25] : memref<1x32x256xf32, #tpu.memory_space<vmem>>, vector<1x32x256xf32>
    %100 = vector.shape_cast %99 : vector<1x32x256xf32> to vector<32x256xf32>
    %101 = vector.shape_cast %98 : vector<32x256xf32> to vector<1x32x256xf32>
    tpu.vector_store %arg4[%c0_23, %c0_24, %c0_25], %101 {strides = array<i32>} : memref<1x32x256xf32, #tpu.memory_space<vmem>>, vector<1x32x256xf32>,
    return
  }
  func.func @transform_0(%arg0: i32) -> (i32, i32, i32) {
    %c0_i32 = arith.constant 0 : i32
    %c0_i32_0 = arith.constant 0 : i32
    %c0_i32_1 = arith.constant 0 : i32
    return %arg0, %c0_i32, %c0_i32_0 : i32, i32, i32
  }
  func.func @transform_1(%arg0: i32) -> (i32, i32, i32) {
    %c0_i32 = arith.constant 0 : i32
    %c0_i32_0 = arith.constant 0 : i32
    %c0_i32_1 = arith.constant 0 : i32
    return %arg0, %c0_i32, %c0_i32_0 : i32, i32, i32
  }
  func.func @transform_2(%arg0: i32) -> (i32, i32, i32) {
    %c0_i32 = arith.constant 0 : i32
    %c0_i32_0 = arith.constant 0 : i32
    %c0_i32_1 = arith.constant 0 : i32
    %c0_i32_2 = arith.constant 0 : i32
    return %c0_i32, %c0_i32_0, %c0_i32_1 : i32, i32, i32
  }
  func.func @transform_3(%arg0: i32) -> (i32, i32, i32) {
    %c0_i32 = arith.constant 0 : i32
    %c0_i32_0 = arith.constant 0 : i32
    %c0_i32_1 = arith.constant 0 : i32
    return %arg0, %c0_i32, %c0_i32_0 : i32, i32, i32
  }
}

module attributes {stable_mosaic.version = 11 : i64} {
  func.func @_fuse_layer_kernel(%arg0: i32, %arg1: memref<1x32x256xf32, #tpu.memory_space<vmem>>, %arg2: memref<1x16x256xf32, #tpu.memory_space<vmem>>, %arg3: memref<1x16x256xf32, #tpu.memory_space<vmem>>, %arg4: memref<4x32x16xf32, #tpu.memory_space<vmem>>, %arg5: memref<4x32x1xf32, #tpu.memory_space<vmem>>, %arg6: memref<32x9xf32, #tpu.memory_space<vmem>>, %arg7: memref<1x1xf32, #tpu.memory_space<vmem>>, %arg8: memref<1x32x256xf32, #tpu.memory_space<vmem>>) attributes {dimension_semantics = [#tpu.dimension_semantics<parallel>], iteration_bounds = array<i64: 2>, scalar_prefetch = 0 : i64, scratch_operands = 0 : i64, tpu.core_type = #tpu.core_type<tc>, window_params = [{transform_indices = @transform_0, window_bounds = array<i64: 1, 32, 256>}, {transform_indices = @transform_1, window_bounds = array<i64: 1, 16, 256>}, {transform_indices = @transform_2, window_bounds = array<i64: 1, 16, 256>}, {pipeline_mode = #tpu.pipeline_mode<synchronous>, transform_indices = @transform_3, window_bounds = array<i64: 4, 32, 16>}, {pipeline_mode = #tpu.pipeline_mode<synchronous>, transform_indices = @transform_4, window_bounds = array<i64: 4, 32, 1>}, {pipeline_mode = #tpu.pipeline_mode<synchronous>, transform_indices = @transform_5, window_bounds = array<i64: 32, 9>}, {pipeline_mode = #tpu.pipeline_mode<synchronous>, transform_indices = @transform_6, window_bounds = array<i64: 1, 1>}, {transform_indices = @transform_7, window_bounds = array<i64: 1, 32, 256>}]} {
    %c0 = arith.constant 0 : index
    %c0_0 = arith.constant 0 : index
    %c0_1 = arith.constant 0 : index
    %0 = vector.load %arg1[%c0, %c0_0, %c0_1] : memref<1x32x256xf32, #tpu.memory_space<vmem>>, vector<1x32x256xf32>
    %1 = vector.shape_cast %0 : vector<1x32x256xf32> to vector<32x256xf32>
    %c0_2 = arith.constant 0 : index
    %c0_3 = arith.constant 0 : index
    %c0_4 = arith.constant 0 : index
    %2 = vector.load %arg2[%c0_2, %c0_3, %c0_4] : memref<1x16x256xf32, #tpu.memory_space<vmem>>, vector<1x16x256xf32>
    %3 = vector.shape_cast %2 : vector<1x16x256xf32> to vector<16x256xf32>
    %c0_5 = arith.constant 0 : index
    %c0_6 = arith.constant 0 : index
    %c0_7 = arith.constant 0 : index
    %4 = vector.load %arg3[%c0_5, %c0_6, %c0_7] : memref<1x16x256xf32, #tpu.memory_space<vmem>>, vector<1x16x256xf32>
    %5 = vector.shape_cast %4 : vector<1x16x256xf32> to vector<16x256xf32>
    %c0_8 = arith.constant 0 : index
    %c0_9 = arith.constant 0 : index
    %c0_10 = arith.constant 0 : index
    %6 = vector.load %arg4[%c0_8, %c0_9, %c0_10] : memref<4x32x16xf32, #tpu.memory_space<vmem>>, vector<4x32x16xf32>
    %c0_11 = arith.constant 0 : index
    %c0_12 = arith.constant 0 : index
    %c0_13 = arith.constant 0 : index
    %7 = vector.load %arg5[%c0_11, %c0_12, %c0_13] : memref<4x32x1xf32, #tpu.memory_space<vmem>>, vector<4x32x1xf32>
    %c0_14 = arith.constant 0 : index
    %c0_15 = arith.constant 0 : index
    %8 = vector.load %arg6[%c0_14, %c0_15] : memref<32x9xf32, #tpu.memory_space<vmem>>, vector<32x9xf32>
    %c0_16 = arith.constant 0 : index
    %c0_17 = arith.constant 0 : index
    %9 = vector.load %arg7[%c0_16, %c0_17] : memref<1x1xf32, #tpu.memory_space<vmem>>, vector<1x1xf32>
    %cst = arith.constant dense<0.000000e+00> : vector<32xf32>
    %10 = vector.multi_reduction <add>, %1, %cst [1] : vector<32x256xf32> to vector<32xf32>
    %11 = vector.shape_cast %10 : vector<32xf32> to vector<32x1xf32>
    %cst_18 = arith.constant 2.560000e+02 : f32
    %12 = vector.broadcast %cst_18 : f32 to vector<32x1xf32>
    %13 = arith.divf %11, %12 : vector<32x1xf32>
    %14 = vector.broadcast %13 : vector<32x1xf32> to vector<32x256xf32>
    %15 = arith.subf %1, %14 : vector<32x256xf32>
    %16 = arith.mulf %15, %15 : vector<32x256xf32>
    %cst_19 = arith.constant dense<0.000000e+00> : vector<32xf32>
    %17 = vector.multi_reduction <add>, %16, %cst_19 [1] : vector<32x256xf32> to vector<32xf32>
    %18 = vector.shape_cast %17 : vector<32xf32> to vector<32x1xf32>
    %cst_20 = arith.constant 2.560000e+02 : f32
    %19 = vector.broadcast %cst_20 : f32 to vector<32x1xf32>
    %20 = arith.divf %18, %19 : vector<32x1xf32>
    %cst_21 = arith.constant 9.99999974E-6 : f32
    %21 = vector.broadcast %cst_21 : f32 to vector<32x1xf32>
    %22 = arith.addf %20, %21 : vector<32x1xf32>
    %23 = math.rsqrt %22 : vector<32x1xf32>
    %24 = vector.broadcast %23 : vector<32x1xf32> to vector<32x256xf32>
    %25 = arith.mulf %15, %24 : vector<32x256xf32>
    %26 = vector.extract_strided_slice %6 {offsets = [0, 0, 0], sizes = [1, 32, 16], strides = [1, 1, 1]} : vector<4x32x16xf32> to vector<1x32x16xf32>
    %27 = vector.shape_cast %26 : vector<1x32x16xf32> to vector<32x16xf32>
    %cst_22 = arith.constant dense<0.000000e+00> : vector<32x256xf32>
    %28 = tpu.matmul %27, %3, %cst_22 {dimension_numbers = #tpu.dot_dimension_numbers<[1], [0], [0], [1], [0, 0, 1, 1], [], []>} : vector<32x16xf32>, vector<16x256xf32>, vector<32x256xf32> -> vector<32x256xf32>
    %29 = vector.extract_strided_slice %7 {offsets = [0, 0, 0], sizes = [1, 32, 1], strides = [1, 1, 1]} : vector<4x32x1xf32> to vector<1x32x1xf32>
    %30 = vector.shape_cast %29 : vector<1x32x1xf32> to vector<32x1xf32>
    %31 = vector.broadcast %30 : vector<32x1xf32> to vector<32x256xf32>
    %32 = arith.addf %28, %31 : vector<32x256xf32>
    %33 = vector.extract_strided_slice %6 {offsets = [1, 0, 0], sizes = [1, 32, 16], strides = [1, 1, 1]} : vector<4x32x16xf32> to vector<1x32x16xf32>
    %34 = vector.shape_cast %33 : vector<1x32x16xf32> to vector<32x16xf32>
    %cst_23 = arith.constant dense<0.000000e+00> : vector<32x256xf32>
    %35 = tpu.matmul %34, %3, %cst_23 {dimension_numbers = #tpu.dot_dimension_numbers<[1], [0], [0], [1], [0, 0, 1, 1], [], []>} : vector<32x16xf32>, vector<16x256xf32>, vector<32x256xf32> -> vector<32x256xf32>
    %36 = vector.extract_strided_slice %7 {offsets = [1, 0, 0], sizes = [1, 32, 1], strides = [1, 1, 1]} : vector<4x32x1xf32> to vector<1x32x1xf32>
    %37 = vector.shape_cast %36 : vector<1x32x1xf32> to vector<32x1xf32>
    %38 = vector.broadcast %37 : vector<32x1xf32> to vector<32x256xf32>
    %39 = arith.addf %35, %38 : vector<32x256xf32>
    %40 = vector.extract_strided_slice %6 {offsets = [2, 0, 0], sizes = [1, 32, 16], strides = [1, 1, 1]} : vector<4x32x16xf32> to vector<1x32x16xf32>
    %41 = vector.shape_cast %40 : vector<1x32x16xf32> to vector<32x16xf32>
    %cst_24 = arith.constant dense<0.000000e+00> : vector<32x256xf32>
    %42 = tpu.matmul %41, %5, %cst_24 {dimension_numbers = #tpu.dot_dimension_numbers<[1], [0], [0], [1], [0, 0, 1, 1], [], []>} : vector<32x16xf32>, vector<16x256xf32>, vector<32x256xf32> -> vector<32x256xf32>
    %43 = vector.extract_strided_slice %7 {offsets = [2, 0, 0], sizes = [1, 32, 1], strides = [1, 1, 1]} : vector<4x32x1xf32> to vector<1x32x1xf32>
    %44 = vector.shape_cast %43 : vector<1x32x1xf32> to vector<32x1xf32>
    %45 = vector.broadcast %44 : vector<32x1xf32> to vector<32x256xf32>
    %46 = arith.addf %42, %45 : vector<32x256xf32>
    %47 = vector.extract_strided_slice %6 {offsets = [3, 0, 0], sizes = [1, 32, 16], strides = [1, 1, 1]} : vector<4x32x16xf32> to vector<1x32x16xf32>
    %48 = vector.shape_cast %47 : vector<1x32x16xf32> to vector<32x16xf32>
    %cst_25 = arith.constant dense<0.000000e+00> : vector<32x256xf32>
    %49 = tpu.matmul %48, %5, %cst_25 {dimension_numbers = #tpu.dot_dimension_numbers<[1], [0], [0], [1], [0, 0, 1, 1], [], []>} : vector<32x16xf32>, vector<16x256xf32>, vector<32x256xf32> -> vector<32x256xf32>
    %50 = vector.extract_strided_slice %7 {offsets = [3, 0, 0], sizes = [1, 32, 1], strides = [1, 1, 1]} : vector<4x32x1xf32> to vector<1x32x1xf32>
    %51 = vector.shape_cast %50 : vector<1x32x1xf32> to vector<32x1xf32>
    %52 = vector.broadcast %51 : vector<32x1xf32> to vector<32x256xf32>
    %53 = arith.addf %49, %52 : vector<32x256xf32>
    %54 = arith.mulf %32, %25 : vector<32x256xf32>
    %55 = arith.addf %54, %39 : vector<32x256xf32>
    %56 = arith.mulf %46, %25 : vector<32x256xf32>
    %57 = arith.addf %56, %53 : vector<32x256xf32>
    %58 = tpu.iota {dimensions = array<i32: 1>} : vector<32x256xi32>
    %c16_i32 = arith.constant 16 : i32
    %c0_i32 = arith.constant 0 : i32
    %59 = arith.cmpi eq, %c16_i32, %c0_i32 : i32
    %c1_i32 = arith.constant 1 : i32
    %60 = arith.select %59, %c1_i32, %c16_i32 : i32
    %61 = vector.broadcast %60 : i32 to vector<32x256xi32>
    %62 = arith.remsi %58, %61 : vector<32x256xi32>
    %c0_i32_26 = arith.constant 0 : i32
    %63 = vector.broadcast %c0_i32_26 : i32 to vector<32x256xi32>
    %64 = arith.cmpi ne, %62, %63 : vector<32x256xi32>
    %c0_i32_27 = arith.constant 0 : i32
    %65 = vector.broadcast %c0_i32_27 : i32 to vector<32x256xi32>
    %66 = arith.cmpi slt, %62, %65 : vector<32x256xi32>
    %c0_i32_28 = arith.constant 0 : i32
    %67 = arith.cmpi slt, %60, %c0_i32_28 : i32
    %68 = vector.broadcast %67 : i1 to vector<32x256xi1>
    %69 = vector.broadcast %68 : vector<32x256xi1> to vector<32x256xi1>
    %70 = arith.xori %66, %69 : vector<32x256xi1>
    %71 = arith.andi %70, %64 : vector<32x256xi1>
    %72 = vector.broadcast %60 : i32 to vector<32x256xi32>
    %73 = arith.addi %62, %72 : vector<32x256xi32>
    %74 = arith.select %71, %73, %62 : vector<32x256xi1>, vector<32x256xi32>
    %c0_i32_29 = arith.constant 0 : i32
    %75 = vector.broadcast %c0_i32_29 : i32 to vector<32x256xi32>
    %76 = arith.cmpi eq, %74, %75 : vector<32x256xi32>
    %c15_i32 = arith.constant 15 : i32
    %77 = vector.broadcast %c15_i32 : i32 to vector<32x256xi32>
    %78 = arith.cmpi eq, %74, %77 : vector<32x256xi32>
    %79 = vector.extract_strided_slice %25 {offsets = [0, 0], sizes = [32, 16], strides = [1, 1]} : vector<32x256xf32> to vector<32x16xf32>
    %80 = vector.extract_strided_slice %25 {offsets = [0, 0], sizes = [32, 240], strides = [1, 1]} : vector<32x256xf32> to vector<32x240xf32>
    %81 = tpu.concatenate %79, %80 in 1 : vector<32x16xf32>, vector<32x240xf32> -> vector<32x256xf32>
    %82 = vector.extract_strided_slice %25 {offsets = [0, 16], sizes = [32, 240], strides = [1, 1]} : vector<32x256xf32> to vector<32x240xf32>
    %83 = vector.extract_strided_slice %25 {offsets = [0, 240], sizes = [32, 16], strides = [1, 1]} : vector<32x256xf32> to vector<32x16xf32>
    %84 = tpu.concatenate %82, %83 in 1 : vector<32x240xf32>, vector<32x16xf32> -> vector<32x256xf32>
    %cst_30 = arith.constant 0.000000e+00 : f32
    %85 = vector.broadcast %cst_30 : f32 to vector<1x256xf32>
    %86 = vector.extract_strided_slice %81 {offsets = [0, 255], sizes = [32, 1], strides = [1, 1]} : vector<32x256xf32> to vector<32x1xf32>
    %87 = vector.extract_strided_slice %81 {offsets = [0, 0], sizes = [32, 255], strides = [1, 1]} : vector<32x256xf32> to vector<32x255xf32>
    %88 = tpu.concatenate %86, %87 in 1 : vector<32x1xf32>, vector<32x255xf32> -> vector<32x256xf32>
    %89 = arith.select %76, %81, %88 : vector<32x256xi1>, vector<32x256xf32>
    %90 = vector.extract_strided_slice %8 {offsets = [0, 0], sizes = [32, 1], strides = [1, 1]} : vector<32x9xf32> to vector<32x1xf32>
    %91 = vector.broadcast %90 : vector<32x1xf32> to vector<32x256xf32>
    %92 = arith.mulf %91, %89 : vector<32x256xf32>
    %cst_31 = arith.constant dense<0.000000e+00> : vector<256xf32>
    %93 = vector.multi_reduction <add>, %92, %cst_31 [0] : vector<32x256xf32> to vector<256xf32>
    %94 = vector.shape_cast %93 : vector<256xf32> to vector<1x256xf32>
    %95 = arith.addf %85, %94 : vector<1x256xf32>
    %96 = vector.extract_strided_slice %8 {offsets = [0, 1], sizes = [32, 1], strides = [1, 1]} : vector<32x9xf32> to vector<32x1xf32>
    %97 = vector.broadcast %96 : vector<32x1xf32> to vector<32x256xf32>
    %98 = arith.mulf %97, %81 : vector<32x256xf32>
    %cst_32 = arith.constant dense<0.000000e+00> : vector<256xf32>
    %99 = vector.multi_reduction <add>, %98, %cst_32 [0] : vector<32x256xf32> to vector<256xf32>
    %100 = vector.shape_cast %99 : vector<256xf32> to vector<1x256xf32>
    %101 = arith.addf %95, %100 : vector<1x256xf32>
    %102 = vector.extract_strided_slice %81 {offsets = [0, 1], sizes = [32, 255], strides = [1, 1]} : vector<32x256xf32> to vector<32x255xf32>
    %103 = vector.extract_strided_slice %81 {offsets = [0, 0], sizes = [32, 1], strides = [1, 1]} : vector<32x256xf32> to vector<32x1xf32>
    %104 = tpu.concatenate %102, %103 in 1 : vector<32x255xf32>, vector<32x1xf32> -> vector<32x256xf32>
    %105 = arith.select %78, %81, %104 : vector<32x256xi1>, vector<32x256xf32>
    %106 = vector.extract_strided_slice %8 {offsets = [0, 2], sizes = [32, 1], strides = [1, 1]} : vector<32x9xf32> to vector<32x1xf32>
    %107 = vector.broadcast %106 : vector<32x1xf32> to vector<32x256xf32>
    %108 = arith.mulf %107, %105 : vector<32x256xf32>
    %cst_33 = arith.constant dense<0.000000e+00> : vector<256xf32>
    %109 = vector.multi_reduction <add>, %108, %cst_33 [0] : vector<32x256xf32> to vector<256xf32>
    %110 = vector.shape_cast %109 : vector<256xf32> to vector<1x256xf32>
    %111 = arith.addf %101, %110 : vector<1x256xf32>
    %112 = vector.extract_strided_slice %25 {offsets = [0, 255], sizes = [32, 1], strides = [1, 1]} : vector<32x256xf32> to vector<32x1xf32>
    %113 = vector.extract_strided_slice %25 {offsets = [0, 0], sizes = [32, 255], strides = [1, 1]} : vector<32x256xf32> to vector<32x255xf32>
    %114 = tpu.concatenate %112, %113 in 1 : vector<32x1xf32>, vector<32x255xf32> -> vector<32x256xf32>
    %115 = arith.select %76, %25, %114 : vector<32x256xi1>, vector<32x256xf32>
    %116 = vector.extract_strided_slice %8 {offsets = [0, 3], sizes = [32, 1], strides = [1, 1]} : vector<32x9xf32> to vector<32x1xf32>
    %117 = vector.broadcast %116 : vector<32x1xf32> to vector<32x256xf32>
    %118 = arith.mulf %117, %115 : vector<32x256xf32>
    %cst_34 = arith.constant dense<0.000000e+00> : vector<256xf32>
    %119 = vector.multi_reduction <add>, %118, %cst_34 [0] : vector<32x256xf32> to vector<256xf32>
    %120 = vector.shape_cast %119 : vector<256xf32> to vector<1x256xf32>
    %121 = arith.addf %111, %120 : vector<1x256xf32>
    %122 = vector.extract_strided_slice %8 {offsets = [0, 4], sizes = [32, 1], strides = [1, 1]} : vector<32x9xf32> to vector<32x1xf32>
    %123 = vector.broadcast %122 : vector<32x1xf32> to vector<32x256xf32>
    %124 = arith.mulf %123, %25 : vector<32x256xf32>
    %cst_35 = arith.constant dense<0.000000e+00> : vector<256xf32>
    %125 = vector.multi_reduction <add>, %124, %cst_35 [0] : vector<32x256xf32> to vector<256xf32>
    %126 = vector.shape_cast %125 : vector<256xf32> to vector<1x256xf32>
    %127 = arith.addf %121, %126 : vector<1x256xf32>
    %128 = vector.extract_strided_slice %25 {offsets = [0, 1], sizes = [32, 255], strides = [1, 1]} : vector<32x256xf32> to vector<32x255xf32>
    %129 = vector.extract_strided_slice %25 {offsets = [0, 0], sizes = [32, 1], strides = [1, 1]} : vector<32x256xf32> to vector<32x1xf32>
    %130 = tpu.concatenate %128, %129 in 1 : vector<32x255xf32>, vector<32x1xf32> -> vector<32x256xf32>
    %131 = arith.select %78, %25, %130 : vector<32x256xi1>, vector<32x256xf32>
    %132 = vector.extract_strided_slice %8 {offsets = [0, 5], sizes = [32, 1], strides = [1, 1]} : vector<32x9xf32> to vector<32x1xf32>
    %133 = vector.broadcast %132 : vector<32x1xf32> to vector<32x256xf32>
    %134 = arith.mulf %133, %131 : vector<32x256xf32>
    %cst_36 = arith.constant dense<0.000000e+00> : vector<256xf32>
    %135 = vector.multi_reduction <add>, %134, %cst_36 [0] : vector<32x256xf32> to vector<256xf32>
    %136 = vector.shape_cast %135 : vector<256xf32> to vector<1x256xf32>
    %137 = arith.addf %127, %136 : vector<1x256xf32>
    %138 = vector.extract_strided_slice %84 {offsets = [0, 255], sizes = [32, 1], strides = [1, 1]} : vector<32x256xf32> to vector<32x1xf32>
    %139 = vector.extract_strided_slice %84 {offsets = [0, 0], sizes = [32, 255], strides = [1, 1]} : vector<32x256xf32> to vector<32x255xf32>
    %140 = tpu.concatenate %138, %139 in 1 : vector<32x1xf32>, vector<32x255xf32> -> vector<32x256xf32>
    %141 = arith.select %76, %84, %140 : vector<32x256xi1>, vector<32x256xf32>
    %142 = vector.extract_strided_slice %8 {offsets = [0, 6], sizes = [32, 1], strides = [1, 1]} : vector<32x9xf32> to vector<32x1xf32>
    %143 = vector.broadcast %142 : vector<32x1xf32> to vector<32x256xf32>
    %144 = arith.mulf %143, %141 : vector<32x256xf32>
    %cst_37 = arith.constant dense<0.000000e+00> : vector<256xf32>
    %145 = vector.multi_reduction <add>, %144, %cst_37 [0] : vector<32x256xf32> to vector<256xf32>
    %146 = vector.shape_cast %145 : vector<256xf32> to vector<1x256xf32>
    %147 = arith.addf %137, %146 : vector<1x256xf32>
    %148 = vector.extract_strided_slice %8 {offsets = [0, 7], sizes = [32, 1], strides = [1, 1]} : vector<32x9xf32> to vector<32x1xf32>
    %149 = vector.broadcast %148 : vector<32x1xf32> to vector<32x256xf32>
    %150 = arith.mulf %149, %84 : vector<32x256xf32>
    %cst_38 = arith.constant dense<0.000000e+00> : vector<256xf32>
    %151 = vector.multi_reduction <add>, %150, %cst_38 [0] : vector<32x256xf32> to vector<256xf32>
    %152 = vector.shape_cast %151 : vector<256xf32> to vector<1x256xf32>
    %153 = arith.addf %147, %152 : vector<1x256xf32>
    %154 = vector.extract_strided_slice %84 {offsets = [0, 1], sizes = [32, 255], strides = [1, 1]} : vector<32x256xf32> to vector<32x255xf32>
    %155 = vector.extract_strided_slice %84 {offsets = [0, 0], sizes = [32, 1], strides = [1, 1]} : vector<32x256xf32> to vector<32x1xf32>
    %156 = tpu.concatenate %154, %155 in 1 : vector<32x255xf32>, vector<32x1xf32> -> vector<32x256xf32>
    %157 = arith.select %78, %84, %156 : vector<32x256xi1>, vector<32x256xf32>
    %158 = vector.extract_strided_slice %8 {offsets = [0, 8], sizes = [32, 1], strides = [1, 1]} : vector<32x9xf32> to vector<32x1xf32>
    %159 = vector.broadcast %158 : vector<32x1xf32> to vector<32x256xf32>
    %160 = arith.mulf %159, %157 : vector<32x256xf32>
    %cst_39 = arith.constant dense<0.000000e+00> : vector<256xf32>
    %161 = vector.multi_reduction <add>, %160, %cst_39 [0] : vector<32x256xf32> to vector<256xf32>
    %162 = vector.shape_cast %161 : vector<256xf32> to vector<1x256xf32>
    %163 = arith.addf %153, %162 : vector<1x256xf32>
    %164 = vector.broadcast %9 : vector<1x1xf32> to vector<1x256xf32>
    %165 = arith.addf %163, %164 : vector<1x256xf32>
    %cst_40 = arith.constant 0.000000e+00 : f32
    %166 = vector.broadcast %cst_40 : f32 to vector<1x256xf32>
    %167 = arith.subf %166, %165 : vector<1x256xf32>
    %168 = math.exp %167 : vector<1x256xf32>
    %cst_41 = arith.constant 1.000000e+00 : f32
    %169 = vector.broadcast %cst_41 : f32 to vector<1x256xf32>
    %170 = arith.addf %169, %168 : vector<1x256xf32>
    %cst_42 = arith.constant 1.000000e+00 : f32
    %171 = vector.broadcast %cst_42 : f32 to vector<1x256xf32>
    %172 = arith.divf %171, %170 : vector<1x256xf32>
    %173 = vector.broadcast %172 : vector<1x256xf32> to vector<32x256xf32>
    %174 = arith.mulf %173, %55 : vector<32x256xf32>
    %cst_43 = arith.constant 1.000000e+00 : f32
    %175 = vector.broadcast %cst_43 : f32 to vector<1x256xf32>
    %176 = arith.subf %175, %172 : vector<1x256xf32>
    %177 = vector.broadcast %176 : vector<1x256xf32> to vector<32x256xf32>
    %178 = arith.mulf %177, %57 : vector<32x256xf32>
    %179 = arith.addf %174, %178 : vector<32x256xf32>
    %c0_44 = arith.constant 0 : index
    %c0_45 = arith.constant 0 : index
    %c0_46 = arith.constant 0 : index
    %180 = vector.load %arg8[%c0_44, %c0_45, %c0_46] : memref<1x32x256xf32, #tpu.memory_space<vmem>>, vector<1x32x256xf32>
    %181 = vector.shape_cast %180 : vector<1x32x256xf32> to vector<32x256xf32>
    %182 = vector.shape_cast %179 : vector<32x256xf32> to vector<1x32x256xf32>
    tpu.vector_store %arg8[%c0_44, %c0_45, %c0_46], %182 {strides = array<i32>} : memref<1x32x256xf32, #tpu.memory_space<vmem>>, vector<1x32x256xf32>,
    return
  }
  func.func @transform_0(%arg0: i32) -> (i32, i32, i32) {
    %c0_i32 = arith.constant 0 : i32
    %c0_i32_0 = arith.constant 0 : i32
    %c0_i32_1 = arith.constant 0 : i32
    return %arg0, %c0_i32, %c0_i32_0 : i32, i32, i32
  }
  func.func @transform_1(%arg0: i32) -> (i32, i32, i32) {
    %c0_i32 = arith.constant 0 : i32
    %c0_i32_0 = arith.constant 0 : i32
    %c0_i32_1 = arith.constant 0 : i32
    return %arg0, %c0_i32, %c0_i32_0 : i32, i32, i32
  }
  func.func @transform_2(%arg0: i32) -> (i32, i32, i32) {
    %c0_i32 = arith.constant 0 : i32
    %c0_i32_0 = arith.constant 0 : i32
    %c0_i32_1 = arith.constant 0 : i32
    return %arg0, %c0_i32, %c0_i32_0 : i32, i32, i32
  }
  func.func @transform_3(%arg0: i32) -> (i32, i32, i32) {
    %c0_i32 = arith.constant 0 : i32
    %c0_i32_0 = arith.constant 0 : i32
    %c0_i32_1 = arith.constant 0 : i32
    %c0_i32_2 = arith.constant 0 : i32
    return %c0_i32, %c0_i32_0, %c0_i32_1 : i32, i32, i32
  }
  func.func @transform_4(%arg0: i32) -> (i32, i32, i32) {
    %c0_i32 = arith.constant 0 : i32
    %c0_i32_0 = arith.constant 0 : i32
    %c0_i32_1 = arith.constant 0 : i32
    %c0_i32_2 = arith.constant 0 : i32
    return %c0_i32, %c0_i32_0, %c0_i32_1 : i32, i32, i32
  }
  func.func @transform_5(%arg0: i32) -> (i32, i32) {
    %c0_i32 = arith.constant 0 : i32
    %c0_i32_0 = arith.constant 0 : i32
    %c0_i32_1 = arith.constant 0 : i32
    return %c0_i32, %c0_i32_0 : i32, i32
  }
  func.func @transform_6(%arg0: i32) -> (i32, i32) {
    %c0_i32 = arith.constant 0 : i32
    %c0_i32_0 = arith.constant 0 : i32
    %c0_i32_1 = arith.constant 0 : i32
    return %c0_i32, %c0_i32_0 : i32, i32
  }
  func.func @transform_7(%arg0: i32) -> (i32, i32, i32) {
    %c0_i32 = arith.constant 0 : i32
    %c0_i32_0 = arith.constant 0 : i32
    %c0_i32_1 = arith.constant 0 : i32
    return %arg0, %c0_i32, %c0_i32_0 : i32, i32, i32
  }
}

</mosaic_0001>

<bundles_post_ra>
// kernel: fuse_block_forward.4
= control target key start
LH: loop header
LB: loop body
LE: loop exit
PB: predicated region body
PF: predicated region fallthrough
CT: control target
= control target key end

     0   :  { %s2046_s26 = smov 0   ;;  %s3196_s0 = inlined_call_operand.vmem [shape: f32[2,32,256], index: 0, kind: input, shape index: {}]   ;;  %s3197_s1 = inlined_call_operand.vmem [shape: f32[2,16,256], index: 1, kind: input, shape index: {}]   ;;  %s3198_s2 = inlined_call_operand.vmem [shape: f32[2,16,256], index: 2, kind: input, shape index: {}]   ;;  %s3199_s3 = inlined_call_operand.vmem [shape: f32[4,32,16], index: 3, kind: input, shape index: {}]   ;;  %s3200_s4 = inlined_call_operand.vmem [shape: f32[4,32,1], index: 4, kind: input, shape index: {}]   ;;  %s3201_s5 = inlined_call_operand.vmem [shape: f32[32,9], index: 5, kind: input, shape index: {}]   ;;  %s3202_s6 = inlined_call_operand.<no memory space> [shape: f32[1,1], index: 6, kind: input, shape index: {}]   ;;  %s3203_s7 = inlined_call_operand.vmem [shape: f32[2,32,256], index: 7, kind: output, shape index: {}]  }
   0x1   :  { %v12_v0 = vstv %s3202_s6 }
   0x2   :  { %13 = vst [vmem:[#allocation2] sm:$0x1] %v12_v0 }
   0x3 LB: > { %s1870_s27 = sadd.s32 4294967295, %s1987_s26   ;;  %p1874_p0 = scmp.ge.s32.totalorder %s1987_s26, 1  ;;  %s1987_s26 = sphi %s2046_s26, %s19_s26  }
   0x4   : > { %p259_p1 = scmp.lt.s32.totalorder %s1987_s26, 3 }
   0x6   : > { %p260_p2 = pnand %p1874_p0, %p259_p1 }
   0x8   : > { %263 = sbr.rel (%p260_p2) target bundleno = 780 (0x30c), region = 48 }
   0xf   : > { %p301_p3 = scmp.lt.s32.totalorder %s1870_s27, 1  ;;  %v1989_v1 = vmov 0.0   ;;  %v1990_v2 = vmov 0   ;;  %v1991_v3 = vmov 1   ;;  %v337_v24 = vld [vmem:[%s3199_s3] sm:$0xff]  ;;  %vm459_vm0 = vcmask 130048  }
  0x10   : > { %536 = vmatprep.mubr.f32.mxu0 %v1989_v1  ;;  %657 = vmatprep.mubr.f32.mxu1 %v1989_v1  ;;  %v341_v25 = vld [vmem:[%s3199_s3 + $0x20] sm:$0xff]  ;;  %v338_v30 = vld [vmem:[%s3199_s3 + $0x8] sm:$0xff]  ;;  %v339_v32 = vld [vmem:[%s3199_s3 + $0x10] sm:$0xff]  ;;  %v1992_v50 = vmov 2   ;;  %v1993_v54 = vmov 3   ;;  %v1994_v57 = vmov 4  }
  0x11   : > { %s3340_s27 = smov (!%p301_p3, %s1870_s27), 1  ;;  %1943 = vset.pattern.permute.xlu1 %v1990_v2  ;;  %1945 = vset.pattern.permute.xlu0 %v1991_v3  ;;  %v342_v31 = vld [vmem:[%s3199_s3 + $0x28] sm:$0xff]  ;;  %v343_v33 = vld [vmem:[%s3199_s3 + $0x30] sm:$0xff]  ;;  %v340_v34 = vld [vmem:[%s3199_s3 + $0x18] sm:$0xff]  ;;  %v1995_v59 = vmov 5   ;;  %v1996_v63 = vmov 6  }
  0x12   : > { %s1901_s6 = sshll.u32 %s3340_s27, 6  ;;  %s1902_s28 = sshll.u32 %s3340_s27, 5  ;;  %v344_v35 = vld [vmem:[%s3199_s3 + $0x38] sm:$0xff]  ;;  %v345_v36 = vld [vmem:[%s3199_s3 + $0x40] sm:$0xff]  ;;  %v354_v38 = vld [vmem:[%s3200_s4 + $0x8] sm:$0xff]  ;;  %v1997_v0 = vmov 8  }
  0x13   : > { %s2067_s8 = scalar_lea.vmem %s3196_s0, %s1901_s6  ;;  %s310_s11 = scalar_lea.vmem %s3197_s1, %s1902_s28  ;;  %v349_v37 = vld [vmem:[%s3199_s3 + $0x60] sm:$0xff]  ;;  %v346_v39 = vld [vmem:[%s3199_s3 + $0x48] sm:$0xff]  ;;  %v355_v41 = vld [vmem:[%s3200_s4 + $0x10] sm:$0xff]  ;;  %vm1043_vm1 = vcmask 916480   ;;  %vm1084_vm2 = vcmask 7168   ;;  %vm1217_vm5 = vcmask 1039360  }
  0x14   : > { %s315_s14 = scalar_lea.vmem %s3198_s2, %s1902_s28  ;;  %v330_v4 = vld [vmem:[%s310_s11 + $0x8] sm:$0xff]  ;;  %v332_v5 = vld [vmem:[%s310_s11 + $0x18] sm:$0xff]  ;;  %v2076_v6 = vld [vmem:[%s2067_s8 + $0x20] sm:$0xff]  ;;  %s1999_s24 = smov 16  }
  0x15   : > { %v1905_v7 = vpack.c.bf16 %v332_v5, %v330_v4  ;;  %v2079_v8 = vld [vmem:[%s2067_s8 + $0x28] sm:$0xff]  ;;  %v2082_v9 = vld [vmem:[%s2067_s8] sm:$0xff]  ;;  %v331_v14 = vld [vmem:[%s310_s11 + $0x10] sm:$0xff]  ;;  %s2000_s25 = smov 112   ;;  %s2001_s28 = smov 1  }
  0x16   : > { %v2085_v10 = vld [vmem:[%s2067_s8 + $0x8] sm:$0xff]  ;;  %v380_v11 = vadd.f32 %v2079_v8, %v2076_v6  ;;  %v329_v13 = vld [vmem:[%s310_s11] sm:$0xff]  ;;  %v2092_v15 = vld [vmem:[%s2067_s8 + $0x30] sm:$0xff]  ;;  %s2002_s29 = smov 127   ;;  %s320_s9 = scalar_lea.vmem %s3203_s7, %s1901_s6 }
  0x17   : > { %v374_v12 = vadd.f32 %v2085_v10, %v2082_v9  ;;  %1906 = vmatprep.subr.bf16.mxu0 %v1905_v7  ;;  %1910 = vmatprep.subr.bf16.mxu1 %v1905_v7  ;;  %v1907_v16 = vpack.c.bf16 %v331_v14, %v329_v13  ;;  %v2095_v17 = vld [vmem:[%s2067_s8 + $0x38] sm:$0xff]  ;;  %v334_v18 = vld [vmem:[%s315_s14 + $0x8] sm:$0xff]  ;;  %v333_v21 = vld [vmem:[%s315_s14] sm:$0xff] }
  0x18   : > { %v336_v19 = vld [vmem:[%s315_s14 + $0x18] sm:$0xff]  ;;  %381 = vadd.xlane.f32.xlu1 %v380_v11  ;;  %v335_v22 = vld [vmem:[%s315_s14 + $0x10] sm:$0xff]  ;;  %v383_v26 = vadd.f32 %v2095_v17, %v2092_v15  ;;  %v350_v40 = vld [vmem:[%s3199_s3 + $0x68] sm:$0xff] }
  0x19   : > { %375 = vadd.xlane.f32.xlu0 %v374_v12  ;;  %v1913_v20 = vpack.c.bf16 %v336_v19, %v334_v18  ;;  %v2098_v23 = vld [vmem:[%s2067_s8 + $0x10] sm:$0xff]  ;;  %1908 = vmatpush1.bf16.msra.mxu0 %v1907_v16  ;;  %v2109_v27 = vld [vmem:[%s2067_s8 + $0x18] sm:$0xff]  ;;  %v1915_v28 = vpack.c.bf16 %v335_v22, %v333_v21  ;;  %v2182_v44 = vld [vmem:[%s3201_s5 + $0x8] sm:$0xff] }
  0x1a   : > { %1912 = vmatpush1.bf16.msra.mxu1 %v1907_v16  ;;  %v377_v29 = vadd.f32 %v2109_v27, %v2098_v23  ;;  %v347_v42 = vld [vmem:[%s3199_s3 + $0x50] sm:$0xff]  ;;  %v356_v45 = vld [vmem:[%s3200_s4 + $0x18] sm:$0xff]  ;;  %v357_v48 = vld [vmem:[%s3200_s4 + $0x20] sm:$0xff] }
  0x1b   : > { %1914 = vmatprep.subr.bf16.mxu0 %v1913_v20  ;;  %1918 = vmatprep.subr.bf16.mxu1 %v1913_v20  ;;  %v351_v43 = vld [vmem:[%s3199_s3 + $0x70] sm:$0xff]  ;;  %v348_v46 = vld [vmem:[%s3199_s3 + $0x58] sm:$0xff]  ;;  %v2204_v49 = vld [vmem:[%s3201_s5] sm:$0xff] }
  0x1c   : > { %1883 = vmatmul.mubr.msk.f32.vlgmr.msra.gmra.mrb[0].mxu0 %vm459_vm0, %v337_v24  ;;  %384 = vadd.xlane.f32.xlu1 %v383_v26  ;;  %v352_v47 = vld [vmem:[%s3199_s3 + $0x78] sm:$0xff]  ;;  %v358_v51 = vld [vmem:[%s3200_s4 + $0x28] sm:$0xff]  ;;  %v359_v53 = vld [vmem:[%s3200_s4 + $0x30] sm:$0xff] }
  0x1d   : > { %1887 = vmatmul.mubr.msk.f32.vlgmr.msra.gmra.mrb[0].mxu1 %vm459_vm0, %v341_v25  ;;  %542 = vmatprep.mubr.f32.mxu0 %v1989_v1  ;;  %v2215_v52 = vld [vmem:[%s3201_s5 + $0x18] sm:$0xff]  ;;  %v361_v56 = vld [vmem:[%s3200_s4 + $0x40] sm:$0xff]  ;;  %v363_v58 = vld [vmem:[%s3200_s4 + $0x50] sm:$0xff] }
  0x1e   : > { %663 = vmatprep.mubr.f32.mxu1 %v1989_v1  ;;  %1916 = vmatpush1.bf16.msra.mxu0 %v1915_v28  ;;  %v360_v55 = vld [vmem:[%s3200_s4 + $0x38] sm:$0xff]  ;;  %v365_v60 = vld [vmem:[%s3200_s4 + $0x60] sm:$0xff]  ;;  %v2239_v61 = vld [vmem:[%s3201_s5 + $0x10] sm:$0xff] }
  0x1f   : > { %1920 = vmatpush1.bf16.msra.mxu1 %v1915_v28  ;;  %378 = vadd.xlane.f32.xlu0 %v377_v29  ;;  %v367_v62 = vld [vmem:[%s3200_s4 + $0x70] sm:$0xff]  ;;  %v353_v4 = vld [vmem:[%s3200_s4] sm:$0xff]  ;;  %v364_v5 = vld [vmem:[%s3200_s4 + $0x58] sm:$0xff] }
  0x20   : > { %1884 = vmatmul.mubr.msk.f32.gmra.mrb[2].mxu0 %vm459_vm0, %v338_v30 }
  0x21   : > { %1888 = vmatmul.mubr.msk.f32.gmra.mrb[2].mxu1 %vm459_vm0, %v342_v31  ;;  %548 = vmatprep.mubr.f32.mxu0 %v1989_v1 }
  0x22   : > { %669 = vmatprep.mubr.f32.mxu1 %v1989_v1 }
  0x24   : > { %1885 = vmatmul.mubr.msk.f32.gmra.mrb[4].mxu0 %vm459_vm0, %v339_v32 }
  0x25   : > { %1889 = vmatmul.mubr.msk.f32.gmra.mrb[4].mxu1 %vm459_vm0, %v343_v33  ;;  %554 = vmatprep.mubr.f32.mxu0 %v1989_v1 }
  0x26   : > { %675 = vmatprep.mubr.f32.mxu1 %v1989_v1 }
  0x28   : > { %1886 = vmatmul.mubr.msk.f32.gmra.mrb[6].mxu0 %vm459_vm0, %v340_v34 }
  0x29   : > { %1890 = vmatmul.mubr.msk.f32.gmra.mrb[6].mxu1 %vm459_vm0, %v344_v35  ;;  %778 = vmatprep.mubr.f32.mxu0 %v1989_v1  ;;  %v366_v35 = vld [vmem:[%s3200_s4 + $0x68] sm:$0xff] }
  0x2a   : > { %899 = vmatprep.mubr.f32.mxu1 %v1989_v1 }
  0x2c   : > { %1891 = vmatmul.mubr.msk.f32.vlgmr.msra.gmra.mrb[8].mxu0 %vm459_vm0, %v345_v36 }
  0x2d   : > { %1895 = vmatmul.mubr.msk.f32.vlgmr.msra.gmra.mrb[8].mxu1 %vm459_vm0, %v349_v37  ;;  %784 = vmatprep.mubr.f32.mxu0 %v1989_v1 }
  0x2e   : > { %905 = vmatprep.mubr.f32.mxu1 %v1989_v1  ;;  %446 = vperm.xlu1 %1943, %v354_v38   ;;  %v368_v38 = vld [vmem:[%s3200_s4 + $0x78] sm:$0xff] }
  0x30   : > { %1892 = vmatmul.mubr.msk.f32.gmra.mrb[10].mxu0 %vm459_vm0, %v346_v39 }
  0x31   : > { %1896 = vmatmul.mubr.msk.f32.gmra.mrb[10].mxu1 %vm459_vm0, %v350_v40  ;;  %790 = vmatprep.mubr.f32.mxu0 %v1989_v1 }
  0x32   : > { %911 = vmatprep.mubr.f32.mxu1 %v1989_v1  ;;  %451 = vperm.xlu1 %1943, %v355_v41  }
  0x34   : > { %1893 = vmatmul.mubr.msk.f32.gmra.mrb[12].mxu0 %vm459_vm0, %v347_v42 }
  0x35   : > { %1897 = vmatmul.mubr.msk.f32.gmra.mrb[12].mxu1 %vm459_vm0, %v351_v43  ;;  %1162 = vperm.xlu0 %1945, %v2182_v44  }
  0x36   : > { %796 = vmatprep.mubr.f32.mxu0 %v1989_v1  ;;  %456 = vperm.xlu1 %1943, %v356_v45  }
  0x37   : > { %917 = vmatprep.mubr.f32.mxu1 %v1989_v1  ;;  %v1998_v1 = vmov 7  }
  0x38   : > { %1894 = vmatmul.mubr.msk.f32.gmra.mrb[14].mxu0 %vm459_vm0, %v348_v46 }
  0x39   : > { %1898 = vmatmul.mubr.msk.f32.gmra.mrb[14].mxu1 %vm459_vm0, %v352_v47  ;;  %1946 = vset.pattern.permute.xlu0 %v1992_v50 }
  0x3a   : > { %563 = vperm.xlu1 %1943, %v357_v48   ;;  %1247 = vperm.xlu0 %1946, %v2204_v49  }
  0x3e   : > { %568 = vperm.xlu1 %1943, %v358_v51   ;;  %1259 = vperm.xlu0 %1946, %v2215_v52  }
  0x42   : > { %573 = vperm.xlu1 %1943, %v359_v53   ;;  %1949 = vset.pattern.permute.xlu0 %v1993_v54 }
  0x43   : > { %1339 = vperm.xlu0 %1949, %v2182_v44  }
  0x46   : > { %578 = vperm.xlu1 %1943, %v360_v55  }
  0x47   : > { %1950 = vset.pattern.permute.xlu0 %v1994_v57 }
  0x48   : > { %1379 = vperm.xlu0 %1950, %v2204_v49  }
  0x4a   : > { %684 = vperm.xlu1 %1943, %v361_v56  }
  0x4c   : > { %1952 = vset.pattern.permute.xlu0 %v1995_v59 }
  0x4d   : > { %1467 = vperm.xlu0 %1952, %v2204_v49  }
  0x4e   : > { %694 = vperm.xlu1 %1943, %v363_v58  }
  0x51   : > { %1475 = vperm.xlu0 %1952, %v2239_v61  }
  0x52   : > { %805 = vperm.xlu1 %1943, %v365_v60  }
  0x55   : > { %1956 = vset.pattern.permute.xlu0 %v1996_v63 }
  0x56   : > { %815 = vperm.xlu1 %1943, %v367_v62   ;;  %1563 = vperm.xlu0 %1956, %v2182_v44  }
  0x5a   : > { %1111 = vperm.xlu1 %1943, %v2204_v49   ;;  %1962 = vset.pattern.permute.xlu0 %v1997_v0 }
  0x5b   : > { %1695 = vperm.xlu0 %1962, %v2182_v44  }
  0x5e   : > { %1121 = vperm.xlu1 %1943, %v2239_v61  }
  0x5f   : > { %1963 = vset.pattern.permute.xlu0 %v1998_v1 }
  0x60   : > { %1603 = vperm.xlu0 %1963, %v2204_v49  }
  0x62   : > { %1944 = vset.pattern.permute.xlu1 %v1991_v3  ;;  %v362_v3 = vld [vmem:[%s3200_s4 + $0x48] sm:$0xff] }
  0x63   : > { %1158 = vperm.xlu1 %1944, %v2204_v49  }
  0x64   : > { %1611 = vperm.xlu0 %1963, %v2239_v61  }
  0x67   : > { %1166 = vperm.xlu1 %1944, %v2239_v61  }
  0x68   : > { %1615 = vperm.xlu0 %1963, %v2215_v52  }
  0x6b   : > { %1170 = vperm.xlu1 %1944, %v2215_v52  }
  0x6c   : > { %1964 = vset.pattern.permute.xlu0 %v1990_v2 }
  0x6d   : > { %441 = vperm.xlu0 %1964, %v353_v4  }
  0x6f   : > { %1947 = vset.pattern.permute.xlu1 %v1992_v50 }
  0x70   : > { %1251 = vperm.xlu1 %1947, %v2182_v44  }
  0x71   : > { %689 = vperm.xlu0 %1964, %v362_v3  }
  0x74   : > { %1255 = vperm.xlu1 %1947, %v2239_v61  }
  0x75   : > { %699 = vperm.xlu0 %1964, %v364_v5  }
  0x78   : > { %1948 = vset.pattern.permute.xlu1 %v1993_v54 }
  0x79   : > { %1335 = vperm.xlu1 %1948, %v2204_v49  }
  0x7d   : > { %1343 = vperm.xlu1 %1948, %v2239_v61  }
  0x81   : > { %1347 = vperm.xlu1 %1948, %v2215_v52  }
  0x85   : > { %1951 = vset.pattern.permute.xlu1 %v1994_v57 }
  0x86   : > { %1383 = vperm.xlu1 %1951, %v2182_v44  }
  0x8a   : > { %1387 = vperm.xlu1 %1951, %v2239_v61  }
  0x8e   : > { %1953 = vset.pattern.permute.xlu1 %v1995_v59 }
  0x8f   : > { %1471 = vperm.xlu1 %1953, %v2182_v44  }
  0x93   : > { %1954 = vset.pattern.permute.xlu1 %v1994_v57 }
  0x94   : > { %1391 = vperm.xlu1 %1954, %v2215_v52  }
  0x98   : > { %1955 = vset.pattern.permute.xlu1 %v1996_v63 }
  0x99   : > { %1559 = vperm.xlu1 %1955, %v2204_v49  }
  0x9d   : > { %1957 = vset.pattern.permute.xlu1 %v1995_v59 }
  0x9e   : > { %1479 = vperm.xlu1 %1957, %v2215_v52  }
  0xa2   : > { %1958 = vset.pattern.permute.xlu1 %v1996_v63 }
  0xa3   : > { %1567 = vperm.xlu1 %1958, %v2239_v61  }
  0xa5   : > { %v382_v2 = vpop.xlane.xlu1 %381 }
  0xa6   : > { %v376_v7 = vpop.xlane.xlu0 %375  ;;  %v389_v11 = vmul.f32 0.00390625, %v382_v2 }
  0xa7   : > { %v387_v12 = vmul.f32 0.00390625, %v376_v7  ;;  %1959 = vset.pattern.permute.xlu1 %v1998_v1 }
  0xa8   : > { %v2279_v13 = vsub.f32 %v2076_v6, %v389_v11  ;;  %v2282_v14 = vsub.f32 %v2079_v8, %v389_v11  ;;  %1607 = vperm.xlu1 %1959, %v2182_v44  }
  0xa9   : > { %v2285_v16 = vsub.f32 %v2082_v9, %v387_v12  ;;  %v2288_v18 = vsub.f32 %v2085_v10, %v387_v12  ;;  %v2291_v19 = vpop.xlane.xlu1 %384 }
  0xaa   : > { %v403_v8 = vmul.f32 %v2279_v13, %v2279_v13  ;;  %v404_v9 = vmul.f32 %v2282_v14, %v2282_v14 }
  0xab   : > { %v399_v20 = vmul.f32 %v2285_v16, %v2285_v16  ;;  %v400_v6 = vmul.f32 %v2288_v18, %v2288_v18 }
  0xac   : > { %1960 = vset.pattern.permute.xlu1 %v1996_v63  ;;  %v413_v22 = vadd.f32 %v404_v9, %v403_v8  ;;  %v379_v24 = vpop.xlane.xlu0 %378 }
  0xad   : > { %v407_v21 = vadd.f32 %v400_v6, %v399_v20  ;;  %1571 = vperm.xlu1 %1960, %v2215_v52   ;;  %v2302_v10 = vpop.permute.xlu1 %446  ;;  %v388_v36 = vmul.f32 0.00390625, %v379_v24 }
  0xaf   : > { %408 = vadd.xlane.f32.xlu0 %v407_v21  ;;  %v2334_v40 = vsub.f32 %v2098_v23, %v388_v36  ;;  %v2337_v41 = vsub.f32 %v2109_v27, %v388_v36 }
  0xb1   : > { %1961 = vset.pattern.permute.xlu1 %v1997_v0  ;;  %v2305_v25 = vpop.permute.xlu1 %451  ;;  %v401_v43 = vmul.f32 %v2334_v40, %v2334_v40  ;;  %v402_v45 = vmul.f32 %v2337_v41, %v2337_v41 }
  0xb2   : > { %1691 = vperm.xlu1 %1961, %v2204_v49  }
  0xb3   : > { %414 = vadd.xlane.f32.xlu0 %v413_v22  ;;  %v410_v23 = vadd.f32 %v402_v45, %v401_v43 }
  0xb4   : > { %v2307_v26 = vpop.permute.xlu0 %1162 }
  0xb5   : > { %3236 = vst [vmem:[#allocation3_spill] sm:$0xff] %v2307_v26  ;;  %v2309_v28 = vpop.permute.xlu1 %456 }
  0xb9   : > { %v2311_v29 = vpop.permute.xlu0 %1247  ;;  %v2313_v30 = vpop.permute.xlu1 %563 }
  0xba   : > { %3237 = vst [vmem:[#allocation4_spill] sm:$0xff] %v2311_v29 }
  0xbd   : > { %v2315_v31 = vpop.permute.xlu0 %1259  ;;  %v2317_v32 = vpop.permute.xlu1 %568 }
  0xbe   : > { %3238 = vst [vmem:[#allocation5_spill] sm:$0xff] %v2315_v31 }
  0xc1   : > { %v2321_v34 = vpop.permute.xlu1 %573 }
  0xc2   : > { %v2319_v33 = vpop.permute.xlu0 %1339 }
  0xc3   : > { %3239 = vst [vmem:[#allocation6_spill] sm:$0xff] %v2319_v33 }
  0xc5   : > { %v2331_v39 = vpop.permute.xlu1 %578 }
  0xc7   : > { %v2326_v37 = vpop.permute.xlu0 %1379 }
  0xc8   : > { %3240 = vst [vmem:[#allocation7_spill] sm:$0xff] %v2326_v37 }
  0xc9   : > { %810 = vperm.xlu0 %1964, %v366_v35   ;;  %v2345_v46 = vpop.permute.xlu1 %684  ;;  %v390_v35 = vmul.f32 0.00390625, %v2291_v19 }
  0xcc   : > { %v2339_v42 = vpop.permute.xlu0 %1467 }
  0xcd   : > { %820 = vperm.xlu0 %1964, %v368_v38   ;;  %3241 = vst [vmem:[#allocation8_spill] sm:$0xff] %v2339_v42  ;;  %v2353_v48 = vpop.permute.xlu1 %694 }
  0xd0   : > { %v2348_v47 = vpop.permute.xlu0 %1475 }
  0xd1   : > { %1116 = vperm.xlu0 %1964, %v2182_v44   ;;  %3242 = vst [vmem:[#allocation9_spill] sm:$0xff] %v2348_v47  ;;  %v2357_v50 = vpop.permute.xlu1 %805 }
  0xd5   : > { %1126 = vperm.xlu0 %1964, %v2215_v52   ;;  %v2351_v27 = vpop.permute.xlu0 %1563  ;;  %v2361_v53 = vpop.permute.xlu1 %815 }
  0xd6   : > { %3243 = vst [vmem:[#allocation10_spill] sm:$0xff] %v2351_v27  ;;  %411 = vadd.xlane.f32.xlu1 %v410_v23  ;;  %v2418_v27 = vsub.f32 %v2095_v17, %v390_v35 }
  0xd9   : > { %v2366_v44 = vpop.permute.xlu1 %1111 }
  0xda   : > { %v2355_v49 = vpop.permute.xlu0 %1695  ;;  %3247 = vst [vmem:[#allocation14_spill] sm:$0xff] %v2366_v44 }
  0xdb   : > { %3244 = vst [vmem:[#allocation11_spill] sm:$0xff] %v2355_v49  ;;  %v2415_v49 = vsub.f32 %v2092_v15, %v390_v35  ;;  %v406_v15 = vmul.f32 %v2418_v27, %v2418_v27 }
  0xdd   : > { %v2371_v56 = vpop.permute.xlu1 %1121 }
  0xde   : > { %3249 = vst [vmem:[#allocation16_spill] sm:$0xff] %v2371_v56 }
  0xdf   : > { %v2359_v51 = vpop.permute.xlu0 %1603 }
  0xe0   : > { %3245 = vst [vmem:[#allocation12_spill] sm:$0xff] %v2359_v51 }
  0xe2   : > { %v2389_v3 = vpop.permute.xlu1 %1158 }
  0xe3   : > { %v2363_v54 = vpop.permute.xlu0 %1611  ;;  %3250 = vst [vmem:[#allocation17_spill] sm:$0xff] %v2389_v3 }
  0xe4   : > { %3246 = vst [vmem:[#allocation13_spill] sm:$0xff] %v2363_v54 }
  0xe6   : > { %v2403_v6 = vpop.permute.xlu1 %1166 }
  0xe7   : > { %1699 = vperm.xlu1 %1961, %v2239_v61   ;;  %v2368_v55 = vpop.permute.xlu0 %1615  ;;  %3251 = vst [vmem:[#allocation18_spill] sm:$0xff] %v2403_v6 }
  0xe8   : > { %3248 = vst [vmem:[#allocation15_spill] sm:$0xff] %v2368_v55 }
  0xea   : > { %v2410_v38 = vpop.permute.xlu1 %1170 }
  0xeb   : > { %1703 = vperm.xlu1 %1961, %v2215_v52   ;;  %3252 = vst [vmem:[#allocation19_spill] sm:$0xff] %v2410_v38 }
  0xec   : > { %v442_v58 = vpop.permute.xlu0 %441 }
  0xef   : > { %v538_v60 = vpop.f32.mrb[0].mxu0  ;;  %v2434_v56 = vpop.permute.xlu1 %1251 }
  0xf0   : > { %v2373_v57 = vpop.f32.mrb[0].mxu1  ;;  %v540_v62 = vpop.f32.mrb[1].mxu0  ;;  %v2377_v63 = vadd.f32 %v538_v60, %v442_v58  ;;  %3253 = vst [vmem:[#allocation20_spill] sm:$0xff] %v2434_v56 }
  0xf1   : > { %v2375_v59 = vpop.f32.mrb[1].mxu1  ;;  %v2379_v0 = vadd.f32 %v540_v62, %v442_v58  ;;  %v690_v43 = vpop.permute.xlu0 %689 }
  0xf3   : > { %v2381_v61 = vpop.f32.mrb[2].mxu0  ;;  %v2440_v3 = vpop.permute.xlu1 %1255 }
  0xf4   : > { %v2383_v1 = vpop.f32.mrb[2].mxu1  ;;  %v2385_v4 = vpop.f32.mrb[3].mxu0  ;;  %3254 = vst [vmem:[#allocation21_spill] sm:$0xff] %v2440_v3 }
  0xf5   : > { %v2387_v52 = vpop.f32.mrb[3].mxu1  ;;  %v700_v17 = vpop.permute.xlu0 %699 }
  0xf7   : > { %v2391_v5 = vpop.f32.mrb[4].mxu0 }
  0xf8   : > { %v2393_v2 = vpop.f32.mrb[4].mxu1  ;;  %v2395_v7 = vpop.f32.mrb[5].mxu0 }
  0xf9   : > { %v2397_v11 = vpop.f32.mrb[5].mxu1  ;;  %v2442_v26 = vpop.permute.xlu1 %1335 }
  0xfa   : > { %3255 = vst [vmem:[#allocation22_spill] sm:$0xff] %v2442_v26 }
  0xfb   : > { %v2399_v12 = vpop.f32.mrb[6].mxu0 }
  0xfc   : > { %v2401_v20 = vpop.f32.mrb[6].mxu1  ;;  %v2405_v21 = vpop.f32.mrb[7].mxu0 }
  0xfd   : > { %v2407_v8 = vpop.f32.mrb[7].mxu1  ;;  %v2444_v37 = vpop.permute.xlu1 %1343 }
  0xfe   : > { %3256 = vst [vmem:[#allocation23_spill] sm:$0xff] %v2444_v37 }
  0xff   : > { %v780_v9 = vpop.f32.mrb[8].mxu0 }
 0x100   : > { %v901_v22 = vpop.f32.mrb[8].mxu1  ;;  %v782_v24 = vpop.f32.mrb[9].mxu0 }
 0x101   : > { %v903_v36 = vpop.f32.mrb[9].mxu1  ;;  %v2446_v47 = vpop.permute.xlu1 %1347 }
 0x102   : > { %3257 = vst [vmem:[#allocation24_spill] sm:$0xff] %v2446_v47 }
 0x103   : > { %v786_v45 = vpop.f32.mrb[10].mxu0 }
 0x104   : > { %v907_v23 = vpop.f32.mrb[10].mxu1  ;;  %v788_v58 = vpop.f32.mrb[11].mxu0  ;;  %v2412_v62 = vadd.f32 %v786_v45, %v690_v43  ;;  %v405_v45 = vmul.f32 %v2415_v49, %v2415_v49 }
 0x105   : > { %v909_v60 = vpop.f32.mrb[11].mxu1  ;;  %v2420_v31 = vadd.f32 %v788_v58, %v690_v43  ;;  %v2448_v56 = vpop.permute.xlu1 %1383 }
 0x106   : > { %v416_v38 = vadd.f32 %v406_v15, %v405_v45  ;;  %3258 = vst [vmem:[#allocation25_spill] sm:$0xff] %v2448_v56 }
 0x107   : > { %v2422_v29 = vpop.f32.mrb[12].mxu0 }
 0x108   : > { %v2424_v19 = vpop.f32.mrb[12].mxu1  ;;  %v2426_v55 = vpop.f32.mrb[13].mxu0 }
 0x109   : > { %v2428_v54 = vpop.f32.mrb[13].mxu1  ;;  %v2450_v42 = vpop.permute.xlu1 %1387 }
 0x10a   : > { %3259 = vst [vmem:[#allocation26_spill] sm:$0xff] %v2450_v42 }
 0x10b   : > { %v798_v35 = vpop.f32.mrb[14].mxu0 }
 0x10c   : > { %v919_v43 = vpop.f32.mrb[14].mxu1  ;;  %v2436_v58 = vadd.f32 %v798_v35, %v700_v17  ;;  %v800_v44 = vpop.f32.mrb[15].mxu0 }
 0x10d   : > { %v921_v51 = vpop.f32.mrb[15].mxu1  ;;  %v2438_v6 = vadd.f32 %v800_v44, %v700_v17 }
 0x10e   : > { %v2452_v35 = vpop.permute.xlu1 %1471 }
 0x10f   : > { %417 = vadd.xlane.f32.xlu1 %v416_v38  ;;  %3260 = vst [vmem:[#allocation27_spill] sm:$0xff] %v2452_v35 }
 0x113   : > { %v2454_v33 = vpop.permute.xlu1 %1391 }
 0x114   : > { %3261 = vst [vmem:[#allocation28_spill] sm:$0xff] %v2454_v33  ;;  %v660_v33 = vadd.f32 %v2373_v57, %v2313_v30 }
 0x118   : > { %v2456_v3 = vpop.permute.xlu1 %1559 }
 0x11d   : > { %v2458_v37 = vpop.permute.xlu1 %1479 }
 0x13c   : > { %v409_v45 = vpop.xlane.xlu0 %408 }
 0x13d   : > { %v419_v44 = vmul.f32 0.00390625, %v409_v45  ;;  %v662_v45 = vadd.f32 %v2375_v59, %v2313_v30  ;;  %v2482_v30 = vpop.permute.xlu1 %1567 }
 0x13e   : > { %3262 = vst [vmem:[#allocation29_spill] sm:$0xff] %v2482_v30 }
 0x13f   : > { %v423_v15 = vadd.f32 1e-05, %v419_v44  ;;  %v781_v44 = vadd.f32 %v780_v9, %v2345_v46  ;;  %v553_v9 = vadd.f32 %v2395_v7, %v2305_v25  ;;  %v674_v7 = vadd.f32 %v2397_v11, %v2321_v34 }
 0x140   : > { %v415_v38 = vpop.xlane.xlu0 %414 }
 0x141   : > { %1965 = vrsqrt.f32 %v423_v15  ;;  %v421_v17 = vmul.f32 0.00390625, %v415_v38  ;;  %v783_v15 = vadd.f32 %v782_v24, %v2345_v46 }
 0x143   : > { %v425_v26 = vadd.f32 1e-05, %v421_v17 }
 0x145   : > { %1967 = vrsqrt.f32 %v425_v26 }
 0x148   : > { %v811_v47 = vpop.permute.xlu0 %810 }
 0x149   : > { %v2460_v56 = vadd.f32 %v907_v23, %v811_v47  ;;  %v2462_v42 = vadd.f32 %v909_v60, %v811_v47  ;;  %v902_v47 = vadd.f32 %v901_v22, %v2357_v50  ;;  %v904_v60 = vadd.f32 %v903_v36, %v2357_v50 }
 0x14a   : > { %v793_v36 = vadd.f32 %v2422_v29, %v2353_v48  ;;  %v916_v29 = vadd.f32 %v2428_v54, %v2361_v53 }
 0x14b   : > { %v1966_v35 = vpop.eup %1965 }
 0x14c   : > { %v2471_v26 = vmul.f32 %v1966_v35, %v2285_v16  ;;  %v2474_v38 = vmul.f32 %v1966_v35, %v2288_v18  ;;  %v821_v23 = vpop.permute.xlu0 %820  ;;  %v914_v35 = vadd.f32 %v2424_v19, %v2361_v53 }
 0x14d   : > { %v2478_v17 = vadd.f32 %v919_v43, %v821_v23  ;;  %v2480_v57 = vadd.f32 %v921_v51, %v821_v23  ;;  %v551_v51 = vadd.f32 %v2391_v5, %v2305_v25  ;;  %v795_v5 = vadd.f32 %v2426_v55, %v2353_v48 }
 0x14e   : > { %v924_v46 = vmul.f32 %v2377_v63, %v2471_v26  ;;  %v925_v16 = vmul.f32 %v2379_v0, %v2474_v38  ;;  %v940_v18 = vmul.f32 %v781_v44, %v2471_v26  ;;  %v941_v59 = vmul.f32 %v783_v15, %v2474_v38  ;;  %997 = vrot.lane.b32.xlu0 %v2474_v38, %s1999_s24 }
 0x14f   : > { %v1968_v50 = vpop.eup %1967  ;;  %995 = vrot.lane.b32.xlu1 %v2471_v26, %s1999_s24 }
 0x150   : > { %v2498_v63 = vadd.f32 %v924_v46, %v660_v33  ;;  %v2500_v0 = vadd.f32 %v925_v16, %v662_v45  ;;  %v2502_v22 = vadd.f32 %v940_v18, %v902_v47  ;;  %v2504_v24 = vadd.f32 %v941_v59, %v904_v60  ;;  %v2528_v45 = vpop.permute.xlu1 %1607 }
 0x151   : > { %v2511_v43 = vmul.f32 %v1968_v50, %v2279_v13  ;;  %v2514_v25 = vmul.f32 %v1968_v50, %v2282_v14  ;;  %v672_v33 = vadd.f32 %v2393_v2, %v2321_v34  ;;  %v545_v60 = vadd.f32 %v2381_v61, %v2302_v10 }
 0x152   : > { %3263 = vst [vmem:[#allocation30_spill] sm:$0xff] %v2498_v63  ;;  %3264 = vst [vmem:[#allocation31_spill] sm:$0xff] %v2500_v0  ;;  %v547_v46 = vadd.f32 %v2385_v4, %v2302_v10  ;;  %v666_v59 = vadd.f32 %v2383_v1, %v2317_v32  ;;  %v668_v50 = vadd.f32 %v2387_v52, %v2317_v32 }
 0x153   : > { %3265 = vst [vmem:[#allocation32_spill] sm:$0xff] %v2502_v22  ;;  %3266 = vst [vmem:[#allocation33_spill] sm:$0xff] %v2504_v24  ;;  %v928_v48 = vmul.f32 %v551_v51, %v2511_v43  ;;  %v929_v13 = vmul.f32 %v553_v9, %v2514_v25  ;;  %v944_v55 = vmul.f32 %v793_v36, %v2511_v43 }
 0x154   : > { %v945_v14 = vmul.f32 %v795_v5, %v2514_v25  ;;  %v2538_v19 = vpop.permute.xlu1 %1571 }
 0x155   : > { %v2530_v2 = vadd.f32 %v928_v48, %v672_v33  ;;  %v2532_v44 = vadd.f32 %v929_v13, %v674_v7  ;;  %v2534_v34 = vadd.f32 %v944_v55, %v914_v35  ;;  %3271 = vst [vmem:[#allocation38_spill] sm:$0xff] %v2538_v19  ;;  %v678_v35 = vadd.f32 %v2401_v20, %v2331_v39 }
 0x156   : > { %v2536_v11 = vadd.f32 %v945_v14, %v916_v29  ;;  %v680_v29 = vadd.f32 %v2407_v8, %v2331_v39 }
 0x157   : > { %3267 = vst [vmem:[#allocation34_spill] sm:$0xff] %v2530_v2  ;;  %3268 = vst [vmem:[#allocation35_spill] sm:$0xff] %v2532_v44 }
 0x158   : > { %3269 = vst [vmem:[#allocation36_spill] sm:$0xff] %v2534_v34  ;;  %3270 = vst [vmem:[#allocation37_spill] sm:$0xff] %v2536_v11  ;;  %v2540_v53 = vpop.permute.xlu1 %1691 }
 0x159   : > { %3272 = vst [vmem:[#allocation39_spill] sm:$0xff] %v2540_v53 }
 0x163   : > { %v412_v54 = vpop.xlane.xlu1 %411 }
 0x164   : > { %v420_v15 = vmul.f32 0.00390625, %v412_v54 }
 0x166   : > { %v424_v23 = vadd.f32 1e-05, %v420_v15 }
 0x168   : > { %1969 = vrsqrt.f32 %v424_v23 }
 0x172   : > { %v1970_v47 = vpop.eup %1969 }
 0x173   : > { %v2547_v16 = vmul.f32 %v1970_v47, %v2334_v40  ;;  %v2550_v18 = vmul.f32 %v1970_v47, %v2337_v41 }
 0x175   : > { %v926_v51 = vmul.f32 %v545_v60, %v2547_v16  ;;  %v927_v9 = vmul.f32 %v547_v46, %v2550_v18  ;;  %v942_v61 = vmul.f32 %v2412_v62, %v2547_v16  ;;  %v943_v10 = vmul.f32 %v2420_v31, %v2550_v18  ;;  %1001 = vrot.lane.b32.xlu0 %v2550_v18, %s1999_s24  ;;  %v2580_v31 = vpop.permute.xlu1 %1699 }
 0x176   : > { %999 = vrot.lane.b32.xlu1 %v2547_v16, %s1999_s24  ;;  %3277 = vst [vmem:[#allocation44_spill] sm:$0xff] %v2580_v31 }
 0x177   : > { %v2566_v40 = vadd.f32 %v926_v51, %v666_v59  ;;  %v2568_v41 = vadd.f32 %v927_v9, %v668_v50  ;;  %v2571_v32 = vadd.f32 %v942_v61, %v2460_v56  ;;  %v2574_v1 = vadd.f32 %v943_v10, %v2462_v42 }
 0x178   : > { %v557_v56 = vadd.f32 %v2399_v12, %v2309_v28  ;;  %v559_v42 = vadd.f32 %v2405_v21, %v2309_v28 }
 0x179   : > { %3273 = vst [vmem:[#allocation40_spill] sm:$0xff] %v2566_v40  ;;  %3274 = vst [vmem:[#allocation41_spill] sm:$0xff] %v2568_v41  ;;  %1005 = vrot.lane.b32.xlu0 %v2514_v25, %s1999_s24  ;;  %v2582_v4 = vpop.permute.xlu1 %1703 }
 0x17a   : > { %3275 = vst [vmem:[#allocation42_spill] sm:$0xff] %v2571_v32  ;;  %3276 = vst [vmem:[#allocation43_spill] sm:$0xff] %v2574_v1  ;;  %1003 = vrot.lane.b32.xlu1 %v2511_v43, %s1999_s24 }
 0x17b   : > { %3278 = vst [vmem:[#allocation45_spill] sm:$0xff] %v2582_v4 }
 0x19c   : > { %v418_v52 = vpop.xlane.xlu1 %417 }
 0x19d   : > { %v422_v62 = vmul.f32 0.00390625, %v418_v52 }
 0x19f   : > { %v426_v36 = vadd.f32 1e-05, %v422_v62 }
 0x1a1   : > { %1971 = vrsqrt.f32 %v426_v36 }
 0x1ab   : > { %v1972_v5 = vpop.eup %1971 }
 0x1ac   : > { %v2589_v33 = vmul.f32 %v1972_v5, %v2415_v49  ;;  %v2592_v7 = vmul.f32 %v1972_v5, %v2418_v27  ;;  %v3230_v5 = vlaneseq }
 0x1ae   : > { %v930_v48 = vmul.f32 %v557_v56, %v2589_v33  ;;  %v931_v13 = vmul.f32 %v559_v42, %v2592_v7  ;;  %v946_v12 = vmul.f32 %v2436_v58, %v2589_v33  ;;  %v947_v28 = vmul.f32 %v2438_v6, %v2592_v7  ;;  %1009 = vrot.lane.b32.xlu0 %v2592_v7, %s1999_s24  ;;  %v2650_v6 = vpop.permute.xlu0 %1116 }
 0x1af   : > { %1007 = vrot.lane.b32.xlu1 %v2589_v33, %s1999_s24 }
 0x1b0   : > { %v2608_v27 = vadd.f32 %v930_v48, %v678_v35  ;;  %v2610_v49 = vadd.f32 %v931_v13, %v680_v29  ;;  %v2613_v39 = vadd.f32 %v946_v12, %v2478_v17  ;;  %v2616_v20 = vadd.f32 %v947_v28, %v2480_v57 }
 0x1b1   : > { %v957_v29 = vand.u32 127, %v3230_v5 }
 0x1b2   : > { %3279 = vst [vmem:[#allocation46_spill] sm:$0xff] %v2608_v27  ;;  %3280 = vst [vmem:[#allocation47_spill] sm:$0xff] %v2610_v49  ;;  %1029 = vrot.lane.b32.xlu0 %v2474_v38, %s2000_s25  ;;  %v2656_v21 = vpop.permute.xlu0 %1126 }
 0x1b3   : > { %3281 = vst [vmem:[#allocation48_spill] sm:$0xff] %v2613_v39  ;;  %3282 = vst [vmem:[#allocation49_spill] sm:$0xff] %v2616_v20  ;;  %1027 = vrot.lane.b32.xlu1 %v2471_v26, %s2000_s25  ;;  %v958_v28 = vadd.s32 128, %v957_v29 }
 0x1b6   : > { %1033 = vrot.lane.b32.xlu0 %v2550_v18, %s2000_s25 }
 0x1b7   : > { %1031 = vrot.lane.b32.xlu1 %v2547_v16, %s2000_s25 }
 0x1ba   : > { %1037 = vrot.lane.b32.xlu0 %v2514_v25, %s2000_s25 }
 0x1bb   : > { %1035 = vrot.lane.b32.xlu1 %v2511_v43, %s2000_s25 }
 0x1be   : > { %1041 = vrot.lane.b32.xlu0 %v2592_v7, %s2000_s25 }
 0x1bf   : > { %1039 = vrot.lane.b32.xlu1 %v2589_v33, %s2000_s25 }
 0x1c0   : > { %v998_v58 = vpop.permute.xlu0 %997 }
 0x1c1   : > { %v996_v8 = vpop.permute.xlu1 %995 }
 0x1c2   : > { %1292 = vrot.lane.b32.xlu0 %v2550_v18, %s2001_s28  ;;  %v2663_v17 = vsel %vm459_vm0, %v996_v8, %v998_v58  ;;  %v2679_v47 = vsel %vm459_vm0, %v2471_v26, %v996_v8 }
 0x1c3   : > { %1290 = vrot.lane.b32.xlu1 %v2474_v38, %s2001_s28 }
 0x1c6   : > { %1296 = vrot.lane.b32.xlu0 %v2592_v7, %s2001_s28 }
 0x1c7   : > { %1294 = vrot.lane.b32.xlu1 %v2514_v25, %s2001_s28 }
 0x1ca   : > { %1304 = vrot.lane.b32.xlu0 %v2547_v16, %s2001_s28 }
 0x1cb   : > { %1302 = vrot.lane.b32.xlu1 %v2471_v26, %s2001_s28 }
 0x1ce   : > { %1308 = vrot.lane.b32.xlu0 %v2589_v33, %s2001_s28 }
 0x1cf   : > { %1306 = vrot.lane.b32.xlu1 %v2511_v43, %s2001_s28 }
 0x1d2   : > { %1424 = vrot.lane.b32.xlu0 %v2474_v38, %s2002_s29 }
 0x1d3   : > { %1422 = vrot.lane.b32.xlu1 %v2471_v26, %s2002_s29 }
 0x1d6   : > { %1428 = vrot.lane.b32.xlu0 %v2550_v18, %s2002_s29 }
 0x1d7   : > { %1426 = vrot.lane.b32.xlu1 %v2547_v16, %s2002_s29 }
 0x1da   : > { %1436 = vrot.lane.b32.xlu0 %v2592_v7, %s2002_s29 }
 0x1db   : > { %1430 = vrot.lane.b32.xlu1 %v2511_v43, %s2002_s29 }
 0x1df   : > { %1432 = vrot.lane.b32.xlu1 %v2514_v25, %s2002_s29 }
 0x1e3   : > { %1434 = vrot.lane.b32.xlu1 %v2589_v33, %s2002_s29 }
 0x1e7   : > { %1060 = vrot.lane.b32.xlu1 %v2663_v17, %s2001_s28  ;;  %v1002_v57 = vpop.permute.xlu0 %1001 }
 0x1e8   : > { %v1000_v55 = vpop.permute.xlu1 %999 }
 0x1e9   : > { %v2668_v14 = vsel %vm459_vm0, %v1000_v55, %v1002_v57  ;;  %v2704_v61 = vsel %vm459_vm0, %v2547_v16, %v1000_v55  ;;  %v963_v55 = vand.u32 15, %v957_v29 }
 0x1ea   : > { %1062 = vrot.lane.b32.xlu0 %v2668_v14, %s2001_s28 }
 0x1eb   : > { %v1006_v54 = vpop.permute.xlu0 %1005  ;;  %vm2756_vm3 = vcmp.eq.s32.totalorder %v963_v55, 0  ;;  %vm2813_vm6 = vcmp.eq.s32.totalorder %v963_v55, 15 }
 0x1ec   : > { %v1004_v15 = vpop.permute.xlu1 %1003 }
 0x1ed   : > { %v2673_v23 = vsel %vm459_vm0, %v1004_v15, %v1006_v54  ;;  %v2685_v60 = vsel %vm459_vm0, %v2511_v43, %v1004_v15  ;;  %v970_v54 = vand.u32 15, %v958_v28 }
 0x1ee   : > { %1064 = vrot.lane.b32.xlu1 %v2673_v23, %s2001_s28 }
 0x1ef   : > { %vm2760_vm4 = vcmp.eq.s32.totalorder %v970_v54, 0  ;;  %vm2817_vm7 = vcmp.eq.s32.totalorder %v970_v54, 15 }
 0x1f2   : > { %1076 = vrot.lane.b32.xlu1 %v2679_v47, %s2001_s28 }
 0x1f6   : > { %1080 = vrot.lane.b32.xlu1 %v2685_v60, %s2001_s28 }
 0x1fa   : > { %1203 = vrot.lane.b32.xlu1 %v2663_v17, %s2002_s29 }
 0x1fe   : > { %1207 = vrot.lane.b32.xlu1 %v2668_v14, %s2002_s29 }
 0x202   : > { %1211 = vrot.lane.b32.xlu1 %v2673_v23, %s2002_s29 }
 0x220   : > { %v1010_v46 = vpop.permute.xlu0 %1009 }
 0x221   : > { %v1008_v59 = vpop.permute.xlu1 %1007 }
 0x222   : > { %v2696_v50 = vsel %vm459_vm0, %v1008_v59, %v1010_v46  ;;  %v2714_v36 = vsel %vm459_vm0, %v2589_v33, %v1008_v59 }
 0x223   : > { %1215 = vrot.lane.b32.xlu1 %v2696_v50, %s2002_s29  ;;  %1066 = vrot.lane.b32.xlu0 %v2696_v50, %s2001_s28 }
 0x224   : > { %v1030_v51 = vpop.permute.xlu0 %1029 }
 0x225   : > { %v1028_v9 = vpop.permute.xlu1 %1027  ;;  %v2750_v46 = vsel %vm1043_vm1, %v1030_v51, %v2474_v38 }
 0x226   : > { %v2789_v22 = vsel %vm1043_vm1, %v1028_v9, %v1030_v51  ;;  %v3289_v9 = vld [vmem:[#allocation23_spill] sm:$0xff] }
 0x227   : > { %1078 = vrot.lane.b32.xlu0 %v2704_v61, %s2001_s28 }
 0x228   : > { %v1034_v10 = vpop.permute.xlu0 %1033 }
 0x229   : > { %v1032_v52 = vpop.permute.xlu1 %1031  ;;  %v2710_v62 = vsel %vm1043_vm1, %v1034_v10, %v2550_v18 }
 0x22a   : > { %1516 = vrot.lane.b32.xlu1 %v2710_v62, %s2001_s28  ;;  %v2723_v42 = vsel %vm1043_vm1, %v1032_v52, %v1034_v10 }
 0x22b   : > { %1082 = vrot.lane.b32.xlu0 %v2714_v36, %s2001_s28 }
 0x22c   : > { %v2720_v56 = vpop.permute.xlu0 %1037 }
 0x22d   : > { %v2725_v35 = vpop.permute.xlu1 %1035  ;;  %v2735_v13 = vsel %vm1043_vm1, %v2720_v56, %v2514_v25 }
 0x22e   : > { %1528 = vrot.lane.b32.xlu1 %v2723_v42, %s2001_s28 }
 0x22f   : > { %1201 = vrot.lane.b32.xlu0 %v2679_v47, %s2002_s29 }
 0x230   : > { %v1042_v48 = vpop.permute.xlu0 %1041 }
 0x231   : > { %v1040_v12 = vpop.permute.xlu1 %1039 }
 0x232   : > { %1518 = vrot.lane.b32.xlu1 %v2735_v13, %s2001_s28  ;;  %v2742_v58 = vsel %vm1043_vm1, %v1040_v12, %v1042_v48 }
 0x233   : > { %1205 = vrot.lane.b32.xlu0 %v2704_v61, %s2002_s29 }
 0x234   : > { %v1293_v8 = vpop.permute.xlu0 %1292 }
 0x235   : > { %v1291_v57 = vpop.permute.xlu1 %1290 }
 0x236   : > { %1532 = vrot.lane.b32.xlu1 %v2742_v58, %s2001_s28 }
 0x237   : > { %1209 = vrot.lane.b32.xlu0 %v2685_v60, %s2002_s29 }
 0x238   : > { %v1297_v15 = vpop.permute.xlu0 %1296 }
 0x239   : > { %v1295_v59 = vpop.permute.xlu1 %1294 }
 0x23a   : > { %1648 = vrot.lane.b32.xlu1 %v2750_v46, %s2002_s29 }
 0x23b   : > { %1213 = vrot.lane.b32.xlu0 %v2714_v36, %s2002_s29 }
 0x23c   : > { %v1305_v29 = vpop.permute.xlu0 %1304 }
 0x23d   : > { %v1303_v12 = vpop.permute.xlu1 %1302  ;;  %v1311_v28 = vsel %vm1084_vm2, %v1305_v29, %v1293_v8  ;;  %v1323_v5 = vsel %vm1084_vm2, %v1293_v8, %v1305_v29 }
 0x23e   : > { %v1310_v20 = vsel %vm1084_vm2, %v1303_v12, %v1291_v57  ;;  %v1322_v39 = vsel %vm1084_vm2, %v1291_v57, %v1303_v12  ;;  %v1328_v11 = vsel %vm2756_vm3, %v2547_v16, %v1323_v5  ;;  %v1329_v34 = vsel %vm2760_vm4, %v2550_v18, %v1311_v28  ;;  %1652 = vrot.lane.b32.xlu1 %v2710_v62, %s2002_s29  ;;  %v3287_v57 = vld [vmem:[#allocation6_spill] sm:$0xff] }
 0x23f   : > { %v1326_v1 = vsel %vm2756_vm3, %v2471_v26, %v1322_v39  ;;  %v1327_v8 = vsel %vm2760_vm4, %v2474_v38, %v1310_v20  ;;  %v1352_v29 = vmul.f32 %v3287_v57, %v1328_v11  ;;  %v1353_v12 = vmul.f32 %v3287_v57, %v1329_v34  ;;  %1514 = vrot.lane.b32.xlu0 %v2750_v46, %s2001_s28  ;;  %v3288_v5 = vld [vmem:[#allocation22_spill] sm:$0xff] }
 0x240   : > { %v1350_v28 = vmul.f32 %v3288_v5, %v1326_v1  ;;  %v1351_v32 = vmul.f32 %v3288_v5, %v1327_v8  ;;  %v1309_v24 = vpop.permute.xlu0 %1308  ;;  %v2828_v5 = vsel %vm1043_vm1, %v1042_v48, %v2592_v7 }
 0x241   : > { %v1307_v39 = vpop.permute.xlu1 %1306  ;;  %v1313_v49 = vsel %vm1084_vm2, %v1309_v24, %v1297_v15  ;;  %v1325_v20 = vsel %vm1084_vm2, %v1297_v15, %v1309_v24 }
 0x242   : > { %v1358_v11 = vadd.f32 %v1352_v29, %v1350_v28  ;;  %v1367_v44 = vadd.f32 %v1353_v12, %v1351_v32  ;;  %v1312_v34 = vsel %vm1084_vm2, %v1307_v39, %v1295_v59  ;;  %v1324_v57 = vsel %vm1084_vm2, %v1295_v59, %v1307_v39  ;;  %1656 = vrot.lane.b32.xlu1 %v2735_v13, %s2002_s29  ;;  %v3294_v28 = vld [vmem:[#allocation24_spill] sm:$0xff] }
 0x243   : > { %v1330_v1 = vsel %vm2756_vm3, %v2511_v43, %v1324_v57  ;;  %v1331_v51 = vsel %vm2760_vm4, %v2514_v25, %v1312_v34  ;;  %v1332_v24 = vsel %vm2756_vm3, %v2589_v33, %v1325_v20  ;;  %v1333_v32 = vsel %vm2760_vm4, %v2592_v7, %v1313_v49  ;;  %1526 = vrot.lane.b32.xlu0 %v2789_v22, %s2001_s28 }
 0x244   : > { %v1354_v15 = vmul.f32 %v3289_v9, %v1330_v1  ;;  %v1355_v59 = vmul.f32 %v3289_v9, %v1331_v51  ;;  %v1425_v12 = vpop.permute.xlu0 %1424  ;;  %v2824_v49 = vsel %vm1043_vm1, %v2725_v35, %v2720_v56  ;;  %v1356_v39 = vmul.f32 %v3294_v28, %v1332_v24 }
 0x245   : > { %v1357_v55 = vmul.f32 %v3294_v28, %v1333_v32  ;;  %v1423_v20 = vpop.permute.xlu1 %1422 }
 0x246   : > { %v1359_v34 = vadd.f32 %v1358_v11, %v1354_v15  ;;  %v1368_v54 = vadd.f32 %v1367_v44, %v1355_v59  ;;  %v1438_v57 = vsel %vm1217_vm5, %v1423_v20, %v1425_v12  ;;  %v1454_v1 = vsel %vm1217_vm5, %v1425_v12, %v1423_v20  ;;  %1660 = vrot.lane.b32.xlu1 %v2828_v5, %s2002_s29  ;;  %v3295_v59 = vld [vmem:[#allocation8_spill] sm:$0xff] }
 0x247   : > { %1530 = vrot.lane.b32.xlu0 %v2824_v49, %s2001_s28  ;;  %v1458_v11 = vsel %vm2813_vm6, %v2471_v26, %v1438_v57  ;;  %v1459_v44 = vsel %vm2817_vm7, %v2474_v38, %v1454_v1 }
 0x248   : > { %v2838_v56 = vadd.f32 %v1359_v34, %v1356_v39  ;;  %v2840_v35 = vadd.f32 %v1368_v54, %v1357_v55  ;;  %v1429_v48 = vpop.permute.xlu0 %1428  ;;  %v1482_v12 = vmul.f32 %v3295_v59, %v1458_v11  ;;  %v1483_v28 = vmul.f32 %v3295_v59, %v1459_v44  ;;  %v3296_v39 = vld [vmem:[#allocation27_spill] sm:$0xff] }
 0x249   : > { %v1427_v51 = vpop.permute.xlu1 %1426 }
 0x24a   : > { %v1439_v24 = vsel %vm1217_vm5, %v1427_v51, %v1429_v48  ;;  %v1455_v32 = vsel %vm1217_vm5, %v1429_v48, %v1427_v51 }
 0x24b   : > { %v1460_v9 = vsel %vm2813_vm6, %v2547_v16, %v1439_v24  ;;  %v1461_v15 = vsel %vm2817_vm7, %v2550_v18, %v1455_v32  ;;  %1520 = vrot.lane.b32.xlu0 %v2828_v5, %s2001_s28  ;;  %v3297_v24 = vld [vmem:[#allocation9_spill] sm:$0xff] }
 0x24c   : > { %v1484_v55 = vmul.f32 %v3296_v39, %v1460_v9  ;;  %v1485_v20 = vmul.f32 %v3296_v39, %v1461_v15 }
 0x24d   : > { %v1431_v34 = vpop.permute.xlu1 %1430 }
 0x24e   : > { %v1490_v54 = vadd.f32 %v1484_v55, %v1482_v12  ;;  %v1499_v57 = vadd.f32 %v1485_v20, %v1483_v28  ;;  %v373_v12 = vld [vmem:[#allocation2] sm:$0x1]  ;;  %v3298_v55 = vld [vmem:[#allocation25_spill] sm:$0xff] }
 0x24f   : > { %1646 = vrot.lane.b32.xlu0 %v2789_v22, %s2002_s29  ;;  %v1396_v20 = vmul.f32 %v3298_v55, %v2547_v16 }
 0x251   : > { %v1433_v1 = vpop.permute.xlu1 %1432 }
 0x252   : > { %v1440_v48 = vsel %vm1217_vm5, %v1431_v34, %v1433_v1  ;;  %v1456_v51 = vsel %vm1217_vm5, %v1433_v1, %v1431_v34 }
 0x253   : > { %v1462_v11 = vsel %vm2813_vm6, %v2511_v43, %v1440_v48  ;;  %v1463_v44 = vsel %vm2817_vm7, %v2514_v25, %v1456_v51  ;;  %1650 = vrot.lane.b32.xlu0 %v2723_v42, %s2002_s29 }
 0x254   : > { %v1486_v32 = vmul.f32 %v3297_v24, %v1462_v11  ;;  %v1487_v9 = vmul.f32 %v3297_v24, %v1463_v44  ;;  %v3300_v44 = vld [vmem:[#allocation26_spill] sm:$0xff] }
 0x255   : > { %v1435_v28 = vpop.permute.xlu1 %1434  ;;  %v1398_v24 = vmul.f32 %v3300_v44, %v2511_v43  ;;  %v1399_v16 = vmul.f32 %v3300_v44, %v2514_v25  ;;  %v3304_v43 = vld [vmem:[#allocation18_spill] sm:$0xff]  ;;  %v3305_v44 = vld [vmem:[#allocation19_spill] sm:$0xff] }
 0x256   : > { %v2876_v15 = vadd.f32 %v1490_v54, %v1486_v32  ;;  %v2878_v59 = vadd.f32 %v1499_v57, %v1487_v9  ;;  %v1397_v54 = vmul.f32 %v3298_v55, %v2550_v18  ;;  %v3299_v57 = vld [vmem:[#allocation7_spill] sm:$0xff]  ;;  %v3301_v32 = vld [vmem:[#allocation28_spill] sm:$0xff] }
 0x257   : > { %1654 = vrot.lane.b32.xlu0 %v2824_v49, %s2002_s29  ;;  %v1394_v1 = vmul.f32 %v3299_v57, %v2471_v26  ;;  %v1395_v48 = vmul.f32 %v3299_v57, %v2474_v38  ;;  %v1400_v9 = vmul.f32 %v3301_v32, %v2589_v33  ;;  %v1401_v18 = vmul.f32 %v3301_v32, %v2592_v7  ;;  %v3302_v26 = vld [vmem:[#allocation3_spill] sm:$0xff] }
 0x258   : > { %v1175_v55 = vmul.f32 %v3302_v26, %v2704_v61  ;;  %v1177_v57 = vmul.f32 %v3304_v43, %v2685_v60  ;;  %v1179_v32 = vmul.f32 %v3305_v44, %v2714_v36 }
 0x259   : > { %v1061_v39 = vpop.permute.xlu1 %1060  ;;  %v1402_v51 = vadd.f32 %v1396_v20, %v1394_v1  ;;  %v1411_v11 = vadd.f32 %v1397_v54, %v1395_v48  ;;  %v3303_v20 = vld [vmem:[#allocation17_spill] sm:$0xff]  ;;  %v1176_v48 = vmul.f32 %v3302_v26, %v2668_v14 }
 0x25a   : > { %v1173_v54 = vmul.f32 %v3303_v20, %v2679_v47  ;;  %v1174_v27 = vmul.f32 %v3303_v20, %v2663_v17 }
 0x25b   : > { %1658 = vrot.lane.b32.xlu0 %v2742_v58, %s2002_s29  ;;  %v1403_v41 = vadd.f32 %v1402_v51, %v1398_v24  ;;  %v1412_v38 = vadd.f32 %v1411_v11, %v1399_v16  ;;  %v1178_v51 = vmul.f32 %v3304_v43, %v2673_v23 }
 0x25c   : > { %v1181_v25 = vadd.f32 %v1175_v55, %v1173_v54  ;;  %v1190_v2 = vadd.f32 %v1176_v48, %v1174_v27  ;;  %v1437_v55 = vpop.permute.xlu0 %1436 }
 0x25d   : > { %v1404_v1 = vadd.f32 %v1403_v41, %v1400_v9  ;;  %v1413_v0 = vadd.f32 %v1412_v38, %v1401_v18  ;;  %v1180_v41 = vmul.f32 %v3305_v44, %v2696_v50 }
 0x25e   : > { %v1182_v24 = vadd.f32 %v1181_v25, %v1177_v57  ;;  %v1191_v18 = vadd.f32 %v1190_v2, %v1178_v51 }
 0x25f   : > { %1736 = vperm.xlu0 %1964, %v373_v12   ;;  %v1405_v16 = vrot.slane %v1404_v1, 4  ;;  %v1414_v9 = vrot.slane %v1413_v0, 4 }
 0x260   : > { %v1065_v34 = vpop.permute.xlu1 %1064  ;;  %v1183_v26 = vadd.f32 %v1182_v24, %v1179_v32  ;;  %v1192_v54 = vadd.f32 %v1191_v18, %v1180_v41  ;;  %v1063_v4 = vpop.permute.xlu0 %1062 }
 0x261   : > { %v1406_v38 = vadd.f32 %v1405_v16, %v1404_v1  ;;  %v1415_v63 = vadd.f32 %v1414_v9, %v1413_v0  ;;  %v3306_v16 = vld [vmem:[#allocation12_spill] sm:$0xff] }
 0x262   : > { %v1184_v20 = vrot.slane %v1183_v26, 4  ;;  %v1193_v43 = vrot.slane %v1192_v54, 4  ;;  %v1618_v41 = vmul.f32 %v3306_v16, %v2789_v22  ;;  %v1619_v9 = vmul.f32 %v3306_v16, %v2750_v46 }
 0x263   : > { %v1407_v31 = vrot.slane %v1406_v38, 2  ;;  %v1416_v53 = vrot.slane %v1415_v63, 2 }
 0x264   : > { %v1077_v12 = vpop.permute.xlu1 %1076  ;;  %v1185_v57 = vadd.f32 %v1184_v20, %v1183_v26  ;;  %v1194_v1 = vadd.f32 %v1193_v43, %v1192_v54  ;;  %v1621_v26 = vmul.f32 %v2528_v45, %v2710_v62 }
 0x265   : > { %v1085_v48 = vsel %vm1084_vm2, %v1077_v12, %v1061_v39  ;;  %v1097_v44 = vsel %vm1084_vm2, %v1061_v39, %v1077_v12  ;;  %v2922_v2 = vadd.f32 %v1407_v31, %v1406_v38  ;;  %v2926_v51 = vadd.f32 %v1416_v53, %v1415_v63 }
 0x266   : > { %v1186_v24 = vrot.slane %v1185_v57, 2  ;;  %v1441_v31 = vsel %vm1217_vm5, %v1435_v28, %v1437_v55  ;;  %v1457_v39 = vsel %vm1217_vm5, %v1437_v55, %v1435_v28  ;;  %v1102_v63 = vsel %vm2760_vm4, %v2663_v17, %v1085_v48  ;;  %v3307_v48 = vld [vmem:[#allocation14_spill] sm:$0xff] }
 0x267   : > { %v1195_v55 = vrot.slane %v1194_v1, 2  ;;  %v1620_v38 = vmul.f32 %v2528_v45, %v2723_v42  ;;  %v1464_v45 = vsel %vm2813_vm6, %v2589_v33, %v1441_v31  ;;  %v1465_v16 = vsel %vm2817_vm7, %v2592_v7, %v1457_v39 }
 0x268   : > { %v1081_v11 = vpop.permute.xlu1 %1080 }
 0x269   : > { %v1087_v32 = vsel %vm1084_vm2, %v1081_v11, %v1065_v34  ;;  %v1099_v0 = vsel %vm1084_vm2, %v1065_v34, %v1081_v11  ;;  %v1101_v34 = vsel %vm2756_vm3, %v2679_v47, %v1097_v44 }
 0x26a   : > { %v1105_v12 = vsel %vm2756_vm3, %v2685_v60, %v1099_v0  ;;  %v1106_v11 = vsel %vm2760_vm4, %v2673_v23, %v1087_v32  ;;  %v1129_v44 = vmul.f32 %v3307_v48, %v1101_v34  ;;  %v1130_v32 = vmul.f32 %v3307_v48, %v1102_v63 }
 0x26c   : > { %v2916_v40 = vpop.permute.xlu1 %1203 }
 0x270   : > { %v2918_v25 = vpop.permute.xlu1 %1207 }
 0x274   : > { %v2952_v54 = vpop.permute.xlu1 %1211 }
 0x295   : > { %v1067_v27 = vpop.permute.xlu0 %1066  ;;  %v2976_v48 = vpop.permute.xlu1 %1215 }
 0x299   : > { %v1079_v53 = vpop.permute.xlu0 %1078 }
 0x29a   : > { %v1086_v18 = vsel %vm1084_vm2, %v1079_v53, %v1063_v4  ;;  %v1098_v28 = vsel %vm1084_vm2, %v1063_v4, %v1079_v53  ;;  %v3308_v53 = vld [vmem:[#allocation16_spill] sm:$0xff] }
 0x29b   : > { %v1103_v20 = vsel %vm2756_vm3, %v2704_v61, %v1098_v28  ;;  %v1104_v43 = vsel %vm2760_vm4, %v2668_v14, %v1086_v18  ;;  %v1133_v28 = vmul.f32 %v3308_v53, %v1105_v12  ;;  %v1134_v18 = vmul.f32 %v3308_v53, %v1106_v11 }
 0x29c   : > { %v1131_v4 = vmul.f32 %v2650_v6, %v1103_v20  ;;  %v1132_v0 = vmul.f32 %v2650_v6, %v1104_v43  ;;  %v1187_v6 = vadd.f32 %v1186_v24, %v1185_v57  ;;  %v2974_v43 = vadd.f32 %v1195_v55, %v1194_v1 }
 0x29d   : > { %v1083_v19 = vpop.permute.xlu0 %1082  ;;  %v1370_v57 = vrot.slane %v2840_v35, 4  ;;  %v1489_v1 = vmul.f32 %v2458_v37, %v1465_v16  ;;  %v1635_v53 = vadd.f32 %v1621_v26, %v1619_v9 }
 0x29e   : > { %v1137_v34 = vadd.f32 %v1131_v4, %v1129_v44  ;;  %v1146_v30 = vadd.f32 %v1132_v0, %v1130_v32  ;;  %v1088_v63 = vsel %vm1084_vm2, %v1083_v19, %v1067_v27  ;;  %v1100_v20 = vsel %vm1084_vm2, %v1067_v27, %v1083_v19 }
 0x29f   : > { %v1107_v33 = vsel %vm2756_vm3, %v2714_v36, %v1100_v20  ;;  %v1108_v7 = vsel %vm2760_vm4, %v2696_v50, %v1088_v63  ;;  %v1361_v19 = vrot.slane %v2838_v56, 4  ;;  %v1488_v27 = vmul.f32 %v2458_v37, %v1464_v45 }
 0x2a0   : > { %v1138_v31 = vadd.f32 %v1137_v34, %v1133_v28  ;;  %v1147_v39 = vadd.f32 %v1146_v30, %v1134_v18  ;;  %v1135_v12 = vmul.f32 %v2656_v21, %v1107_v33  ;;  %v1136_v11 = vmul.f32 %v2656_v21, %v1108_v7  ;;  %v3309_v21 = vld [vmem:[#allocation13_spill] sm:$0xff]  ;;  %v2994_v18 = vpop.permute.xlu1 %1516 }
 0x2a1   : > { %v1202_v24 = vpop.permute.xlu0 %1201  ;;  %v1409_v32 = vrot.slane %v2922_v2, 1  ;;  %v1418_v4 = vrot.slane %v2926_v51, 1  ;;  %v1188_v30 = vrot.slane %v1187_v6, 1  ;;  %v1626_v0 = vadd.f32 %v1620_v38, %v1618_v41 }
 0x2a2   : > { %v1139_v55 = vadd.f32 %v1138_v31, %v1135_v12  ;;  %v1148_v44 = vadd.f32 %v1147_v39, %v1136_v11  ;;  %v1623_v28 = vmul.f32 %v3309_v21, %v2735_v13  ;;  %v1197_v34 = vrot.slane %v2974_v43, 1 }
 0x2a3   : > { %v1622_v37 = vmul.f32 %v3309_v21, %v2824_v49  ;;  %v3000_v63 = vadd.f32 %v1361_v19, %v2838_v56  ;;  %v3003_v20 = vadd.f32 %v1370_v57, %v2840_v35  ;;  %v1492_v41 = vadd.f32 %v2876_v15, %v1488_v27 }
 0x2a4   : > { %v1140_v45 = vrot.slane %v1139_v55, 4  ;;  %v1149_v16 = vrot.slane %v1148_v44, 4  ;;  %v1501_v9 = vadd.f32 %v2878_v59, %v1489_v1  ;;  %v1218_v38 = vsel %vm1217_vm5, %v1202_v24, %v2916_v40  ;;  %v1529_v27 = vpop.permute.xlu1 %1528 }
 0x2a5   : > { %v1206_v26 = vpop.permute.xlu0 %1205  ;;  %v1234_v33 = vsel %vm1217_vm5, %v2916_v40, %v1202_v24  ;;  %v3021_v39 = vadd.f32 %v1188_v30, %v1187_v6  ;;  %v1636_v12 = vadd.f32 %v1635_v53, %v1623_v28  ;;  %v3310_v40 = vld [vmem:[#allocation15_spill] sm:$0xff]  ;;  %v1363_v1 = vrot.slane %v3000_v63, 2 }
 0x2a6   : > { %v1219_v7 = vsel %vm1217_vm5, %v1206_v26, %v2918_v25  ;;  %v1235_v56 = vsel %vm1217_vm5, %v2918_v25, %v1206_v26  ;;  %v1141_v31 = vadd.f32 %v1140_v45, %v1139_v55  ;;  %v1150_v35 = vadd.f32 %v1149_v16, %v1148_v44  ;;  %v3311_v55 = vld [vmem:[#allocation20_spill] sm:$0xff] }
 0x2a7   : > { %v1240_v15 = vsel %vm2813_vm6, %v2704_v61, %v1219_v7  ;;  %v1241_v59 = vsel %vm2817_vm7, %v2668_v14, %v1235_v56  ;;  %v1624_v11 = vmul.f32 %v3310_v40, %v2742_v58  ;;  %v1625_v19 = vmul.f32 %v3310_v40, %v2828_v5  ;;  %v3312_v45 = vld [vmem:[#allocation4_spill] sm:$0xff]  ;;  %v3313_v56 = vld [vmem:[#allocation21_spill] sm:$0xff] }
 0x2a8   : > { %v1493_v25 = vrot.slane %v1492_v41, 4  ;;  %v1502_v57 = vrot.slane %v1501_v9, 4  ;;  %v1238_v61 = vsel %vm2813_vm6, %v2679_v47, %v1218_v38  ;;  %v1239_v14 = vsel %vm2817_vm7, %v2663_v17, %v1234_v33 }
 0x2a9   : > { %v1210_v6 = vpop.permute.xlu0 %1209  ;;  %v1372_v24 = vrot.slane %v3003_v20, 2  ;;  %v1264_v44 = vmul.f32 %v3311_v55, %v1240_v15  ;;  %v1265_v30 = vmul.f32 %v3311_v55, %v1241_v59  ;;  %v1142_v53 = vrot.slane %v1141_v31, 2 }
 0x2aa   : > { %v1151_v21 = vrot.slane %v1150_v35, 2  ;;  %v1220_v28 = vsel %vm1217_vm5, %v1210_v6, %v2952_v54  ;;  %v1236_v47 = vsel %vm1217_vm5, %v2952_v54, %v1210_v6  ;;  %v1262_v16 = vmul.f32 %v3312_v45, %v1238_v61 }
 0x2ab   : > { %v1263_v17 = vmul.f32 %v3312_v45, %v1239_v14  ;;  %v1242_v26 = vsel %vm2813_vm6, %v2685_v60, %v1220_v28  ;;  %v1243_v38 = vsel %vm2817_vm7, %v2673_v23, %v1236_v47  ;;  %v1494_v33 = vadd.f32 %v1493_v25, %v1492_v41  ;;  %v1519_v28 = vpop.permute.xlu1 %1518 }
 0x2ac   : > { %v1503_v7 = vadd.f32 %v1502_v57, %v1501_v9  ;;  %v1266_v15 = vmul.f32 %v3313_v56, %v1242_v26  ;;  %v1267_v59 = vmul.f32 %v3313_v56, %v1243_v38  ;;  %v1270_v54 = vadd.f32 %v1264_v44, %v1262_v16  ;;  %v3314_v57 = vld [vmem:[#allocation5_spill] sm:$0xff] }
 0x2ad   : > { %v1214_v40 = vpop.permute.xlu0 %1213  ;;  %v1279_v6 = vadd.f32 %v1265_v30, %v1263_v17  ;;  %v1143_v60 = vadd.f32 %v1142_v53, %v1141_v31  ;;  %v1152_v55 = vadd.f32 %v1151_v21, %v1150_v35  ;;  %v1198_v47 = vadd.f32 %v1197_v34, %v2974_v43 }
 0x2ae   : > { %v1221_v61 = vsel %vm1217_vm5, %v1214_v40, %v2976_v48  ;;  %v1237_v14 = vsel %vm1217_vm5, %v2976_v48, %v1214_v40  ;;  %v1271_v9 = vadd.f32 %v1270_v54, %v1266_v15  ;;  %v1627_v48 = vadd.f32 %v1626_v0, %v1622_v37 }
 0x2af   : > { %v1244_v23 = vsel %vm2813_vm6, %v2714_v36, %v1221_v61  ;;  %v1245_v41 = vsel %vm2817_vm7, %v2696_v50, %v1237_v14  ;;  %v1280_v25 = vadd.f32 %v1279_v6, %v1267_v59  ;;  %v1495_v31 = vrot.slane %v1494_v33, 2 }
 0x2b0   : > { %v1268_v44 = vmul.f32 %v3314_v57, %v1244_v23  ;;  %v1269_v30 = vmul.f32 %v3314_v57, %v1245_v41  ;;  %v1504_v35 = vrot.slane %v1503_v7, 2  ;;  %v1535_v21 = vsel %vm1084_vm2, %v1529_v27, %v2994_v18 }
 0x2b1   : > { %v1515_v53 = vpop.permute.xlu0 %1514  ;;  %v1547_v36 = vsel %vm1084_vm2, %v2994_v18, %v1529_v27  ;;  %v3068_v16 = vadd.f32 %v1627_v48, %v1624_v11  ;;  %v3070_v17 = vadd.f32 %v1636_v12, %v1625_v19  ;;  %v1144_v26 = vrot.slane %v1143_v60, 1  ;;  %v1533_v11 = vpop.permute.xlu1 %1532 }
 0x2b2   : > { %v1272_v45 = vadd.f32 %v1271_v9, %v1268_v44  ;;  %v1281_v50 = vadd.f32 %v1280_v25, %v1269_v30  ;;  %v1153_v38 = vrot.slane %v1152_v55, 1  ;;  %v1364_v43 = vadd.f32 %v1363_v1, %v3000_v63  ;;  %v3315_v9 = vld [vmem:[#allocation10_spill] sm:$0xff] }
 0x2b3   : > { %v1373_v0 = vadd.f32 %v1372_v24, %v3003_v20  ;;  %v3074_v56 = vadd.f32 %v1495_v31, %v1494_v33  ;;  %v3076_v15 = vadd.f32 %v1504_v35, %v1503_v7  ;;  %v1552_v18 = vsel %vm2756_vm3, %v2723_v42, %v1547_v36 }
 0x2b4   : > { %v1273_v34 = vrot.slane %v1272_v45, 4  ;;  %v1282_v37 = vrot.slane %v1281_v50, 4  ;;  %v1553_v12 = vsel %vm2760_vm4, %v2710_v62, %v1535_v21  ;;  %v1145_v24 = vadd.f32 %v1144_v26, %v1143_v60 }
 0x2b5   : > { %v1527_v19 = vpop.permute.xlu0 %1526  ;;  %v1154_v33 = vadd.f32 %v1153_v38, %v1152_v55  ;;  %v1365_v40 = vrot.slane %v1364_v43, 1  ;;  %v1374_v54 = vrot.slane %v1373_v0, 1  ;;  %v1497_v14 = vrot.slane %v3074_v56, 1  ;;  %v1649_v35 = vpop.permute.xlu1 %1648 }
 0x2b6   : > { %v1274_v27 = vadd.f32 %v1273_v34, %v1272_v45  ;;  %v1283_v63 = vadd.f32 %v1282_v37, %v1281_v50  ;;  %v1534_v20 = vsel %vm1084_vm2, %v1527_v19, %v1515_v53  ;;  %v1546_v1 = vsel %vm1084_vm2, %v1515_v53, %v1527_v19  ;;  %v3316_v34 = vld [vmem:[#allocation29_spill] sm:$0xff] }
 0x2b7   : > { %v1550_v7 = vsel %vm2756_vm3, %v2789_v22, %v1546_v1  ;;  %v1551_v59 = vsel %vm2760_vm4, %v2750_v46, %v1534_v20  ;;  %v1506_v23 = vrot.slane %v3076_v15, 1  ;;  %v1576_v25 = vmul.f32 %v3315_v9, %v1552_v18 }
 0x2b8   : > { %v1275_v6 = vrot.slane %v1274_v27, 2  ;;  %v1284_v61 = vrot.slane %v1283_v63, 2  ;;  %v1574_v41 = vmul.f32 %v2456_v3, %v1550_v7  ;;  %v1575_v60 = vmul.f32 %v2456_v3, %v1551_v59  ;;  %v3317_v7 = vld [vmem:[#allocation38_spill] sm:$0xff] }
 0x2b9   : > { %v1531_v55 = vpop.permute.xlu0 %1530  ;;  %v1577_v57 = vmul.f32 %v3315_v9, %v1553_v12  ;;  %v1199_v48 = vadd.f32 %v3021_v39, %v1145_v24  ;;  %v1200_v31 = vadd.f32 %v1198_v47, %v1154_v33  ;;  %v1410_v10 = vadd.f32 %v1409_v32, %v2922_v2 }
 0x2ba   : > { %v1276_v44 = vadd.f32 %v1275_v6, %v1274_v27  ;;  %v1285_v30 = vadd.f32 %v1284_v61, %v1283_v63  ;;  %v1536_v53 = vsel %vm1084_vm2, %v1531_v55, %v1519_v28  ;;  %v1548_v21 = vsel %vm1084_vm2, %v1519_v28, %v1531_v55 }
 0x2bb   : > { %v1554_v3 = vsel %vm2756_vm3, %v2824_v49, %v1548_v21  ;;  %v1555_v50 = vsel %vm2760_vm4, %v2735_v13, %v1536_v53  ;;  %v1582_v26 = vadd.f32 %v1576_v25, %v1574_v41  ;;  %v1591_v38 = vadd.f32 %v1577_v57, %v1575_v60  ;;  %v1653_v60 = vpop.permute.xlu1 %1652 }
 0x2bc   : > { %v1277_v36 = vrot.slane %v1276_v44, 1  ;;  %v1286_v45 = vrot.slane %v1285_v30, 1  ;;  %v1578_v39 = vmul.f32 %v3316_v34, %v1554_v3  ;;  %v1579_v47 = vmul.f32 %v3316_v34, %v1555_v50  ;;  %v3318_v34 = vld [vmem:[#allocation11_spill] sm:$0xff] }
 0x2bd   : > { %v1521_v37 = vpop.permute.xlu0 %1520  ;;  %v1366_v61 = vadd.f32 %v1365_v40, %v1364_v43  ;;  %v1375_v41 = vadd.f32 %v1374_v54, %v1373_v0  ;;  %v1419_v52 = vadd.f32 %v1418_v4, %v2926_v51  ;;  %v1629_v25 = vrot.slane %v3068_v16, 4 }
 0x2be   : > { %v1278_v18 = vadd.f32 %v1277_v36, %v1276_v44  ;;  %v1287_v12 = vadd.f32 %v1286_v45, %v1285_v30  ;;  %v1537_v28 = vsel %vm1084_vm2, %v1533_v11, %v1521_v37  ;;  %v1549_v19 = vsel %vm1084_vm2, %v1521_v37, %v1533_v11 }
 0x2bf   : > { %v1583_v27 = vadd.f32 %v1582_v26, %v1578_v39  ;;  %v1592_v63 = vadd.f32 %v1591_v38, %v1579_v47  ;;  %v1556_v20 = vsel %vm2756_vm3, %v2742_v58, %v1549_v19  ;;  %v1557_v1 = vsel %vm2760_vm4, %v2828_v5, %v1537_v28  ;;  %v1657_v45 = vpop.permute.xlu1 %1656 }
 0x2c0   : > { %v1288_v24 = vadd.f32 %v1278_v18, %v1199_v48  ;;  %v1289_v33 = vadd.f32 %v1287_v12, %v1200_v31  ;;  %v1580_v59 = vmul.f32 %v3317_v7, %v1556_v20  ;;  %v1581_v6 = vmul.f32 %v3317_v7, %v1557_v1  ;;  %v3319_v12 = vld [vmem:[#allocation39_spill] sm:$0xff] }
 0x2c1   : > { %v1647_v11 = vpop.permute.xlu0 %1646  ;;  %v1638_v57 = vrot.slane %v3070_v17, 4  ;;  %v1498_v40 = vadd.f32 %v1497_v14, %v3074_v56  ;;  %v1507_v54 = vadd.f32 %v1506_v23, %v3076_v15  ;;  %v1630_v47 = vadd.f32 %v1629_v25, %v3068_v16 }
 0x2c2   : > { %v1584_v55 = vadd.f32 %v1583_v27, %v1580_v59  ;;  %v1593_v9 = vadd.f32 %v1592_v63, %v1581_v6  ;;  %v1376_v44 = vadd.f32 %v1366_v61, %v1288_v24  ;;  %v1377_v30 = vadd.f32 %v1375_v41, %v1289_v33 }
 0x2c3   : > { %v1662_v48 = vsel %vm1217_vm5, %v1647_v11, %v1649_v35  ;;  %v1678_v2 = vsel %vm1217_vm5, %v1649_v35, %v1647_v11  ;;  %v1661_v27 = vpop.permute.xlu1 %1660  ;;  %v1631_v61 = vrot.slane %v1630_v47, 2 }
 0x2c4   : > { %v1585_v43 = vrot.slane %v1584_v55, 4  ;;  %v1594_v0 = vrot.slane %v1593_v9, 4  ;;  %v1420_v31 = vadd.f32 %v1410_v10, %v1376_v44  ;;  %v1421_v53 = vadd.f32 %v1419_v52, %v1377_v30 }
 0x2c5   : > { %v1651_v32 = vpop.permute.xlu0 %1650  ;;  %v1682_v50 = vsel %vm2813_vm6, %v2789_v22, %v1662_v48  ;;  %v1683_v26 = vsel %vm2817_vm7, %v2750_v46, %v1678_v2  ;;  %v1632_v8 = vadd.f32 %v1631_v61, %v1630_v47  ;;  %v3328_v61 = vld [vmem:[#allocation41_spill] sm:$0xff] }
 0x2c6   : > { %v1586_v51 = vadd.f32 %v1585_v43, %v1584_v55  ;;  %v1595_v4 = vadd.f32 %v1594_v0, %v1593_v9  ;;  %v1663_v21 = vsel %vm1217_vm5, %v1651_v32, %v1653_v60  ;;  %v1679_v36 = vsel %vm1217_vm5, %v1653_v60, %v1651_v32  ;;  %v3321_v55 = vld [vmem:[#allocation45_spill] sm:$0xff] }
 0x2c7   : > { %v1684_v56 = vsel %vm2813_vm6, %v2723_v42, %v1663_v21  ;;  %v1685_v15 = vsel %vm2817_vm7, %v2710_v62, %v1679_v36  ;;  %v1508_v14 = vadd.f32 %v1498_v40, %v1420_v31  ;;  %v1509_v23 = vadd.f32 %v1507_v54, %v1421_v53 }
 0x2c8   : > { %v1587_v35 = vrot.slane %v1586_v51, 2  ;;  %v1596_v3 = vrot.slane %v1595_v4, 2  ;;  %v1708_v39 = vmul.f32 %v3318_v34, %v1684_v56  ;;  %v1709_v42 = vmul.f32 %v3318_v34, %v1685_v15 }
 0x2c9   : > { %v1655_v38 = vpop.permute.xlu0 %1654  ;;  %v1639_v62 = vadd.f32 %v1638_v57, %v3070_v17  ;;  %v1706_v28 = vmul.f32 %v3319_v12, %v1682_v50  ;;  %v1707_v22 = vmul.f32 %v3319_v12, %v1683_v26  ;;  %v3320_v17 = vld [vmem:[#allocation44_spill] sm:$0xff]  ;;  %v3322_v54 = vlaneseq }
 0x2ca   : > { %v1664_v37 = vsel %vm1217_vm5, %v1655_v38, %v1657_v45  ;;  %v1680_v18 = vsel %vm1217_vm5, %v1657_v45, %v1655_v38  ;;  %v1588_v16 = vadd.f32 %v1587_v35, %v1586_v51  ;;  %v1597_v63 = vadd.f32 %v1596_v3, %v1595_v4 }
 0x2cb   : > { %v1686_v46 = vsel %vm2813_vm6, %v2824_v49, %v1664_v37  ;;  %v1687_v19 = vsel %vm2817_vm7, %v2735_v13, %v1680_v18  ;;  %v1714_v33 = vadd.f32 %v1708_v39, %v1706_v28  ;;  %v1723_v7 = vadd.f32 %v1709_v42, %v1707_v22 }
 0x2cc   : > { %v1710_v20 = vmul.f32 %v3320_v17, %v1686_v46  ;;  %v1711_v1 = vmul.f32 %v3320_v17, %v1687_v19  ;;  %v1640_v41 = vrot.slane %v1639_v62, 2  ;;  %v1589_v57 = vrot.slane %v1588_v16, 1  ;;  %v3323_v17 = vld [vmem:[#allocation30_spill] sm:$0xff] }
 0x2cd   : > { %v1659_v24 = vpop.permute.xlu0 %1658  ;;  %v1598_v44 = vrot.slane %v1597_v63, 1  ;;  %v1740_v48 = vshrl.u32 %v3322_v54, 7  ;;  %v1633_v2 = vrot.slane %v1632_v8, 1 }
 0x2ce   : > { %v1665_v59 = vsel %vm1217_vm5, %v1659_v24, %v1661_v27  ;;  %v1681_v6 = vsel %vm1217_vm5, %v1661_v27, %v1659_v24  ;;  %v1715_v60 = vadd.f32 %v1714_v33, %v1710_v20  ;;  %v1724_v11 = vadd.f32 %v1723_v7, %v1711_v1  ;;  %v3324_v1 = vld [vmem:[#allocation40_spill] sm:$0xff]  ;;  %v3325_v33 = vld [vmem:[#allocation34_spill] sm:$0xff] }
 0x2cf   : > { %v1688_v49 = vsel %vm2813_vm6, %v2742_v58, %v1665_v59  ;;  %v1689_v13 = vsel %vm2817_vm7, %v2828_v5, %v1681_v6  ;;  %v1641_v58 = vadd.f32 %v1640_v41, %v1639_v62  ;;  %v1590_v29 = vadd.f32 %v1589_v57, %v1588_v16  ;;  %v3326_v59 = vld [vmem:[#allocation46_spill] sm:$0xff] }
 0x2d0   : > { %v1712_v9 = vmul.f32 %v3321_v55, %v1688_v49  ;;  %v1713_v10 = vmul.f32 %v3321_v55, %v1689_v13  ;;  %v1599_v5 = vadd.f32 %v1598_v44, %v1597_v63  ;;  %v1741_v45 = vsub.s32 0, %v1740_v48  ;;  %v3327_v49 = vld [vmem:[#allocation31_spill] sm:$0xff]  ;;  %v3332_v44 = vld [vmem:[#allocation33_spill] sm:$0xff]  ;;  %v3337_v48 = vld [vmem:[#allocation48_spill] sm:$0xff] }
 0x2d1   : > { %v1642_v32 = vrot.slane %v1641_v58, 1  ;;  %v1600_v51 = vadd.f32 %v1590_v29, %v1508_v14  ;;  %v1634_v56 = vadd.f32 %v1633_v2, %v1632_v8  ;;  %v3330_v55 = vld [vmem:[#allocation47_spill] sm:$0xff] }
 0x2d2   : > { %v1716_v52 = vadd.f32 %v1715_v60, %v1712_v9  ;;  %v1725_v25 = vadd.f32 %v1724_v11, %v1713_v10  ;;  %v1601_v4 = vadd.f32 %v1599_v5, %v1509_v23  ;;  %v3329_v60 = vld [vmem:[#allocation35_spill] sm:$0xff]  ;;  %v3336_v5 = vld [vmem:[#allocation37_spill] sm:$0xff] }
 0x2d3   : > { %v1643_v15 = vadd.f32 %v1642_v32, %v1641_v58  ;;  %v1644_v50 = vadd.f32 %v1634_v56, %v1600_v51  ;;  %v3334_v58 = vld [vmem:[#allocation43_spill] sm:$0xff]  ;;  %v3338_v32 = vld [vmem:[#allocation49_spill] sm:$0xff] }
 0x2d4   : > { %v1717_v30 = vrot.slane %v1716_v52, 4  ;;  %v1726_v43 = vrot.slane %v1725_v25, 4 }
 0x2d5   : > { %v1645_v26 = vadd.f32 %v1643_v15, %v1601_v4 }
 0x2d6   : > { %v1718_v0 = vadd.f32 %v1717_v30, %v1716_v52  ;;  %v1727_v40 = vadd.f32 %v1726_v43, %v1725_v25  ;;  %v3331_v25 = vld [vmem:[#allocation32_spill] sm:$0xff]  ;;  %v3333_v43 = vld [vmem:[#allocation42_spill] sm:$0xff] }
 0x2d8   : > { %v1719_v31 = vrot.slane %v1718_v0, 2  ;;  %v1728_v53 = vrot.slane %v1727_v40, 2 }
 0x2da   : > { %v1720_v21 = vadd.f32 %v1719_v31, %v1718_v0  ;;  %v1729_v36 = vadd.f32 %v1728_v53, %v1727_v40  ;;  %v3335_v40 = vld [vmem:[#allocation36_spill] sm:$0xff] }
 0x2dc   : > { %v1721_v35 = vrot.slane %v1720_v21, 1  ;;  %v1730_v3 = vrot.slane %v1729_v36, 1 }
 0x2de   : > { %v1722_v38 = vadd.f32 %v1721_v35, %v1720_v21  ;;  %v1731_v34 = vadd.f32 %v1730_v3, %v1729_v36  ;;  %v1737_v39 = vpop.permute.xlu0 %1736 }
 0x2df   : > { %v1742_v42 = vrot.slane %v1737_v39, %v1741_v45 }
 0x2e0   : > { %v1732_v47 = vadd.f32 %v1722_v38, %v1644_v50  ;;  %v1733_v62 = vadd.f32 %v1731_v34, %v1645_v26 }
 0x2e2   : > { %v1743_v37 = vadd.f32 %v1742_v42, %v1732_v47  ;;  %v1744_v18 = vadd.f32 %v1742_v42, %v1733_v62 }
 0x2e4   : > { %v1745_v12 = vsub.f32 0.0, %v1743_v37  ;;  %v1746_v14 = vsub.f32 0.0, %v1744_v18 }
 0x2e6   : > { %v1747_v23 = vmul.f32 1.442695, %v1745_v12  ;;  %v1749_v28 = vmul.f32 1.442695, %v1746_v14 }
 0x2e8   : > { %1973 = vpow2.f32 %v1747_v23 }
 0x2e9   : > { %1975 = vpow2.f32 %v1749_v28 }
 0x2f2   : > { %v1974_v22 = vpop.eup %1973 }
 0x2f3   : > { %v1976_v46 = vpop.eup %1975  ;;  %v1751_v19 = vadd.f32 1.0, %v1974_v22 }
 0x2f4   : > { %v1752_v27 = vadd.f32 1.0, %v1976_v46 }
 0x2f5   : > { %1977 = vrcp.f32 %v1751_v19 }
 0x2f6   : > { %1979 = vrcp.f32 %v1752_v27 }
 0x2ff   : > { %v1978_v16 = vpop.eup %1977 }
 0x300   : > { %v1980_v63 = vpop.eup %1979  ;;  %v1757_v20 = vmul.f32 %v1978_v16, %v3323_v17  ;;  %v1759_v24 = vmul.f32 %v1978_v16, %v3324_v1  ;;  %v1761_v7 = vmul.f32 %v1978_v16, %v3325_v33  ;;  %v1763_v6 = vmul.f32 %v1978_v16, %v3326_v59 }
 0x301   : > { %v1758_v13 = vmul.f32 %v1980_v63, %v3327_v49  ;;  %v1760_v41 = vmul.f32 %v1980_v63, %v3328_v61  ;;  %v1762_v11 = vmul.f32 %v1980_v63, %v3329_v60  ;;  %v1764_v9 = vmul.f32 %v1980_v63, %v3330_v55 }
 0x302   : > { %v1765_v10 = vsub.f32 1.0, %v1978_v16  ;;  %v1766_v52 = vsub.f32 1.0, %v1980_v63 }
 0x304   : > { %v1767_v57 = vmul.f32 %v1765_v10, %v3331_v25  ;;  %v1768_v30 = vmul.f32 %v1766_v52, %v3332_v44  ;;  %v1769_v8 = vmul.f32 %v1765_v10, %v3333_v43  ;;  %v1770_v0 = vmul.f32 %v1766_v52, %v3334_v58 }
 0x305   : > { %v1771_v29 = vmul.f32 %v1765_v10, %v3335_v40  ;;  %v1772_v54 = vmul.f32 %v1766_v52, %v3336_v5  ;;  %v1773_v2 = vmul.f32 %v1765_v10, %v3337_v48  ;;  %v1774_v31 = vmul.f32 %v1766_v52, %v3338_v32 }
 0x306   : > { %v1775_v53 = vadd.f32 %v1767_v57, %v1757_v20  ;;  %v1776_v51 = vadd.f32 %v1768_v30, %v1758_v13  ;;  %v1777_v4 = vadd.f32 %v1769_v8, %v1759_v24  ;;  %v1778_v21 = vadd.f32 %v1770_v0, %v1760_v41 }
 0x307   : > { %v1779_v36 = vadd.f32 %v1771_v29, %v1761_v7  ;;  %v1780_v45 = vadd.f32 %v1772_v54, %v1762_v11  ;;  %v1781_v56 = vadd.f32 %v1773_v2, %v1763_v6  ;;  %v1782_v15 = vadd.f32 %v1774_v31, %v1764_v9 }
 0x308   : > { %1783 = vst [vmem:[%s320_s9] sm:$0xff] %v1775_v53  ;;  %1784 = vst [vmem:[%s320_s9 + $0x8] sm:$0xff] %v1776_v51 }
 0x309   : > { %1785 = vst [vmem:[%s320_s9 + $0x10] sm:$0xff] %v1777_v4  ;;  %1786 = vst [vmem:[%s320_s9 + $0x18] sm:$0xff] %v1778_v21 }
 0x30a   : > { %1787 = vst [vmem:[%s320_s9 + $0x20] sm:$0xff] %v1779_v36  ;;  %1788 = vst [vmem:[%s320_s9 + $0x28] sm:$0xff] %v1780_v45 }
 0x30b   : > { %1789 = vst [vmem:[%s320_s9 + $0x30] sm:$0xff] %v1781_v56  ;;  %1790 = vst [vmem:[%s320_s9 + $0x38] sm:$0xff] %v1782_v15 }
 0x30c PF: > { %s19_s26 = sadd.s32 1, %s1987_s26  }
 0x30d   : > { %p16_p4 = scmp.ge.s32.totalorder %s19_s26, 4  }
 0x30f   :  { %18 = sbr.rel (!%p16_p4) target bundleno = 3 (0x3), region = 84 }

// kernel: fuse_block_forward.7
= control target key start
LH: loop header
LB: loop body
LE: loop exit
PB: predicated region body
PF: predicated region fallthrough
CT: control target
= control target key end

     0   :  { %s2093_s12 = smov 0   ;;  %s2725_s0 = inlined_call_operand.vmem [shape: f32[2,32,256], index: 0, kind: input, shape index: {}]   ;;  %s2726_s1 = inlined_call_operand.vmem [shape: f32[2,32,256], index: 1, kind: input, shape index: {}]   ;;  %s2727_s2 = inlined_call_operand.vmem [shape: f32[9,32,32], index: 2, kind: input, shape index: {}]   ;;  %s2728_s3 = inlined_call_operand.vmem [shape: f32[2,32,256], index: 3, kind: output, shape index: {}]  }
   0x1 LB: > { %s1695_s13 = sadd.s32 4294967295, %s2066_s12   ;;  %p1699_p0 = scmp.ge.s32.totalorder %s2066_s12, 1  ;;  %s2066_s12 = sphi %s2093_s12, %s13_s12  }
   0x2   : > { %p147_p1 = scmp.lt.s32.totalorder %s2066_s12, 3 }
   0x4   : > { %p148_p2 = pnand %p1699_p0, %p147_p1 }
   0x5   : > { %p176_p3 = scmp.lt.s32.totalorder (!%p148_p2), %s1695_s13, 1  ;;  %s2068_s18 = smov (!%p148_p2), 16   ;;  %v2071_v31 = vmov (!%p148_p2), 0.0   ;;  %vm413_vm8 = vcmask (!%p148_p2), 261120   ;;  %v239_v33 = vld [vmem:[%s2727_s2 + $0x80] sm:$0xff] (!%p148_p2)  ;;  %v259_v34 = vlaneseq (!%p148_p2)  ;;  %v240_v36 = vld [vmem:[%s2727_s2 + $0x88] sm:$0xff] (!%p148_p2) }
   0x6   : > { %151 = sbr.rel (%p148_p2) target bundleno = 549 (0x225), region = 32  ;;  %s2069_s19 = smov (!%p148_p2), 112   ;;  %490 = vmatprep.mubr.f32.mxu1 (!%p148_p2), %v2071_v31  ;;  %999 = vmatprep.mubr.f32.mxu0 (!%p148_p2), %v2071_v31  ;;  %vm314_vm9 = vcmask (!%p148_p2), 130048   ;;  %vm347_vm10 = vcmask (!%p148_p2), 916480   ;;  %vm632_vm11 = vcmask (!%p148_p2), 1039360   ;;  %vm388_vm14 = vcmask (!%p148_p2), 7168  }
   0x7   : > { %s2070_s20 = smov (!%p148_p2), 127   ;;  %v2166_v38 = vand.u32 (!%p148_p2), 127, %v259_v34  ;;  %s2072_s25 = smov (!%p148_p2), 1  }
   0x9   : > { %v2170_v49 = vadd.s32 (!%p148_p2), 128, %v2166_v38  ;;  %v266_v50 = vand.u32 (!%p148_p2), 15, %v2166_v38 }
   0xb   : > { %vm2234_vm12 = vcmp.eq.s32.totalorder (!%p148_p2), %v266_v50, 15 }
   0xd   : > { %s2738_s13 = smov (!%p176_p3, %s1695_s13), 1 }
   0xe   : > { %s2101_s14 = sshll.u32 %s2738_s13, 6 }
   0xf   : > { %s180_s17 = scalar_lea.vmem %s2725_s0, %s2101_s14  ;;  %s2698_s21 = scalar_lea.vmem %s2726_s1, %s2101_s14 }
  0x10   : > { %v195_v0 = vld [vmem:[%s180_s17 + $0x20] sm:$0xff]  ;;  %v196_v1 = vld [vmem:[%s180_s17 + $0x28] sm:$0xff]  ;;  %v197_v7 = vld [vmem:[%s180_s17 + $0x30] sm:$0xff]  ;;  %s2706_s24 = scalar_lea.vmem %s2728_s3, %s2101_s14 }
  0x11   : > { %v191_v2 = vld [vmem:[%s180_s17] sm:$0xff]  ;;  %vm203_vm0 = vcmp.gt.f32.partialorder %v195_v0, 0.0  ;;  %vm204_vm1 = vcmp.gt.f32.partialorder %v196_v1, 0.0  ;;  %v211_v3 = vmul.f32 0.2, %v195_v0  ;;  %v192_v5 = vld [vmem:[%s180_s17 + $0x8] sm:$0xff] }
  0x12   : > { %v212_v4 = vmul.f32 0.2, %v196_v1  ;;  %vm199_vm2 = vcmp.gt.f32.partialorder %v191_v2, 0.0  ;;  %v207_v6 = vmul.f32 0.2, %v191_v2  ;;  %v198_v8 = vld [vmem:[%s180_s17 + $0x38] sm:$0xff] }
  0x13   : > { %v2107_v9 = vsel %vm203_vm0, %v195_v0, %v211_v3  ;;  %vm200_vm3 = vcmp.gt.f32.partialorder %v192_v5, 0.0  ;;  %v208_v11 = vmul.f32 0.2, %v192_v5  ;;  %v193_v12 = vld [vmem:[%s180_s17 + $0x10] sm:$0xff]  ;;  %v194_v13 = vld [vmem:[%s180_s17 + $0x18] sm:$0xff]  ;;  %vm205_vm4 = vcmp.gt.f32.partialorder %v197_v7, 0.0 }
  0x14   : > { %v2109_v10 = vsel %vm204_vm1, %v196_v1, %v212_v4  ;;  %v2113_v15 = vsel %vm199_vm2, %v191_v2, %v207_v6  ;;  %vm206_vm5 = vcmp.gt.f32.partialorder %v198_v8, 0.0  ;;  %v213_v17 = vmul.f32 0.2, %v197_v7 }
  0x15   : > { %v1910_v14 = vpack.i.bf16 %v2109_v10, %v2107_v9  ;;  %v2115_v16 = vsel %vm200_vm3, %v192_v5, %v208_v11  ;;  %v214_v18 = vmul.f32 0.2, %v198_v8  ;;  %vm201_vm6 = vcmp.gt.f32.partialorder %v193_v12, 0.0 }
  0x16   : > { %v1900_v19 = vpack.i.bf16 %v2115_v16, %v2113_v15  ;;  %vm202_vm7 = vcmp.gt.f32.partialorder %v194_v13, 0.0  ;;  %v209_v20 = vmul.f32 0.2, %v193_v12  ;;  %v210_v21 = vmul.f32 0.2, %v194_v13 }
  0x17   : > { %1911 = vrot.lane.b32.xlu1 %v1910_v14, %s2068_s18  ;;  %v2119_v22 = vsel %vm205_vm4, %v197_v7, %v213_v17  ;;  %v2121_v23 = vsel %vm206_vm5, %v198_v8, %v214_v18  ;;  %v273_v11 = vand.u32 15, %v2170_v49  ;;  %vm2390_vm0 = vcmp.eq.s32.totalorder %v266_v50, 0 }
  0x18   : > { %1901 = vrot.lane.b32.xlu0 %v1900_v19, %s2068_s18  ;;  %v1915_v24 = vpack.i.bf16 %v2121_v23, %v2119_v22  ;;  %v2125_v25 = vsel %vm201_vm6, %v193_v12, %v209_v20  ;;  %v2127_v26 = vsel %vm202_vm7, %v194_v13, %v210_v21  ;;  %v2145_v30 = vpack.c.bf16 %v2121_v23, %v2109_v10  ;;  %v234_v21 = vld [vmem:[%s2727_s2 + $0x58] sm:$0xff] }
  0x19   : > { %v1905_v27 = vpack.i.bf16 %v2127_v26, %v2125_v25  ;;  %v2137_v28 = vpack.c.bf16 %v2127_v26, %v2115_v16  ;;  %v2141_v29 = vpack.c.bf16 %v2125_v25, %v2113_v15  ;;  %v2152_v32 = vpack.c.bf16 %v2119_v22, %v2107_v9 }
  0x1a   : > { %vm2255_vm13 = vcmp.eq.s32.totalorder %v273_v11, 15  ;;  %vm2384_vm15 = vcmp.eq.s32.totalorder %v273_v11, 0 }
  0x1b   : > { %1916 = vrot.lane.b32.xlu1 %v1915_v24, %s2068_s18  ;;  %1780 = vmatprep.subr.bf16.mxu0 %v2137_v28 }
  0x1c   : > { %1906 = vrot.lane.b32.xlu0 %v1905_v27, %s2068_s18  ;;  %1782 = vmatpush1.bf16.msra.mxu0 %v2141_v29 }
  0x1d   : > { %1784 = vmatprep.subr.bf16.mxu0 %v2145_v30 }
  0x1f   : > { %1926 = vrot.lane.b32.xlu1 %v1905_v27, %s2069_s19 }
  0x20   : > { %1921 = vrot.lane.b32.xlu0 %v1900_v19, %s2069_s19  ;;  %1786 = vmatpush1.bf16.msra.mxu0 %v2152_v32 }
  0x23   : > { %1936 = vrot.lane.b32.xlu1 %v1915_v24, %s2069_s19  ;;  %1722 = vmatmul.mubr.msk.f32.vlgmr.msra.gmra.mrb[0].mxu0 %vm413_vm8, %v239_v33 }
  0x24   : > { %1931 = vrot.lane.b32.xlu0 %v1910_v14, %s2069_s19  ;;  %1005 = vmatprep.mubr.f32.mxu0 %v2071_v31 }
  0x27   : > { %1946 = vrot.lane.b32.xlu1 %v1905_v27, %s2070_s20  ;;  %1723 = vmatmul.mubr.msk.f32.gmra.mrb[2].mxu0 %vm413_vm8, %v240_v36 }
  0x28   : > { %1941 = vrot.lane.b32.xlu0 %v1900_v19, %s2070_s20  ;;  %1152 = vmatprep.mubr.f32.mxu0 %v2071_v31 }
  0x2b   : > { %1956 = vrot.lane.b32.xlu1 %v1915_v24, %s2070_s20 }
  0x2c   : > { %1951 = vrot.lane.b32.xlu0 %v1910_v14, %s2070_s20 }
  0x89   : > { %v1912_v35 = vpop.permute.xlu1 %1911 }
  0x8a   : > { %v1902_v37 = vpop.permute.xlu0 %1901  ;;  %v1914_v39 = vunpack.i.h.bf16 %v1912_v35  ;;  %v1913_v40 = vunpack.i.l.bf16 %v1912_v35 }
  0x8b   : > { %v1904_v41 = vunpack.i.h.bf16 %v1902_v37  ;;  %v1903_v42 = vunpack.i.l.bf16 %v1902_v37 }
  0x8c   : > { %v2174_v51 = vsel %vm314_vm9, %v1913_v40, %v1914_v39  ;;  %v2203_v1 = vsel %vm314_vm9, %v2107_v9, %v1913_v40  ;;  %v253_v40 = vld [vmem:[%s2727_s2 + $0xf0] sm:$0xff] }
  0x8d   : > { %v1917_v43 = vpop.permute.xlu1 %1916  ;;  %v2177_v52 = vsel %vm314_vm9, %v1903_v42, %v1904_v41  ;;  %v2181_v53 = vsel %vm314_vm9, %v2113_v15, %v1903_v42 }
  0x8e   : > { %v1919_v44 = vunpack.i.h.bf16 %v1917_v43  ;;  %v1918_v45 = vunpack.i.l.bf16 %v1917_v43  ;;  %v1907_v46 = vpop.permute.xlu0 %1906 }
  0x8f   : > { %v1909_v47 = vunpack.i.h.bf16 %v1907_v46  ;;  %v1908_v48 = vunpack.i.l.bf16 %v1907_v46 }
  0x90   : > { %v2184_v54 = vsel %vm314_vm9, %v1918_v45, %v1919_v44  ;;  %v2207_v2 = vsel %vm314_vm9, %v2119_v22, %v1918_v45 }
  0x91   : > { %v1927_v55 = vpop.permute.xlu1 %1926  ;;  %v2187_v56 = vsel %vm314_vm9, %v1908_v48, %v1909_v47  ;;  %v2191_v57 = vsel %vm314_vm9, %v2125_v25, %v1908_v48  ;;  %v1751_v7 = vpack.c.bf16 %v2184_v54, %v2174_v51  ;;  %v1975_v18 = vpack.i.bf16 %v2207_v2, %v2203_v1  ;;  %v227_v47 = vld [vmem:[%s2727_s2 + $0x20] sm:$0xff] }
  0x92   : > { %v1929_v58 = vunpack.i.h.bf16 %v1927_v55  ;;  %v1928_v59 = vunpack.i.l.bf16 %v1927_v55  ;;  %v1965_v60 = vpack.i.bf16 %v2191_v57, %v2181_v53  ;;  %v1960_v61 = vpack.i.bf16 %v2187_v56, %v2177_v52  ;;  %v1922_v0 = vpop.permute.xlu0 %1921 }
  0x93   : > { %v1747_v62 = vpack.c.bf16 %v2187_v56, %v2177_v52  ;;  %v1749_v63 = vpack.c.bf16 %v2191_v57, %v2181_v53  ;;  %v1924_v3 = vunpack.i.h.bf16 %v1922_v0  ;;  %v1923_v4 = vunpack.i.l.bf16 %v1922_v0 }
  0x94   : > { %1966 = vrot.lane.b32.xlu1 %v1965_v60, %s2072_s25  ;;  %1961 = vrot.lane.b32.xlu0 %v1960_v61, %s2072_s25  ;;  %v2213_v5 = vsel %vm347_vm10, %v1929_v58, %v2127_v26  ;;  %v2216_v6 = vsel %vm347_vm10, %v1928_v59, %v1929_v58  ;;  %v1970_v19 = vpack.i.bf16 %v2184_v54, %v2174_v51 }
  0x95   : > { %v1937_v8 = vpop.permute.xlu1 %1936  ;;  %1748 = vmatprep.subr.bf16.mxu1 %v1747_v62  ;;  %v2223_v12 = vsel %vm347_vm10, %v1924_v3, %v2115_v16  ;;  %v2226_v13 = vsel %vm347_vm10, %v1923_v4, %v1924_v3  ;;  %v1753_v24 = vpack.c.bf16 %v2207_v2, %v2203_v1 }
  0x96   : > { %v1939_v14 = vunpack.i.h.bf16 %v1937_v8  ;;  %v1938_v17 = vunpack.i.l.bf16 %v1937_v8  ;;  %1750 = vmatpush1.bf16.msra.mxu1 %v1749_v63  ;;  %v1932_v20 = vpop.permute.xlu0 %1931  ;;  %v1985_v36 = vpack.i.bf16 %v2216_v6, %v2226_v13  ;;  %v1980_v37 = vpack.i.bf16 %v2213_v5, %v2223_v12 }
  0x97   : > { %1752 = vmatprep.subr.bf16.mxu1 %v1751_v7  ;;  %v1934_v33 = vunpack.i.h.bf16 %v1932_v20  ;;  %v1933_v34 = vunpack.i.l.bf16 %v1932_v20 }
  0x98   : > { %v2241_v27 = vsel %vm347_vm10, %v1938_v17, %v1939_v14  ;;  %1976 = vrot.lane.b32.xlu1 %v1975_v18, %s2072_s25  ;;  %1971 = vrot.lane.b32.xlu0 %v1970_v19, %s2072_s25  ;;  %v2247_v35 = vsel %vm347_vm10, %v1939_v14, %v2121_v23  ;;  %v228_v18 = vld [vmem:[%s2727_s2 + $0x28] sm:$0xff] }
  0x99   : > { %v1947_v39 = vpop.permute.xlu1 %1946  ;;  %v2261_v41 = vsel %vm347_vm10, %v1934_v33, %v2109_v10  ;;  %v2264_v42 = vsel %vm347_vm10, %v1933_v34, %v1934_v33 }
  0x9a   : > { %v1949_v43 = vunpack.i.h.bf16 %v1947_v39  ;;  %v1948_v44 = vunpack.i.l.bf16 %v1947_v39  ;;  %1754 = vmatpush1.bf16.msra.mxu1 %v1753_v24  ;;  %v1995_v45 = vpack.i.bf16 %v2241_v27, %v2264_v42  ;;  %v1942_v46 = vpop.permute.xlu0 %1941  ;;  %v1990_v60 = vpack.i.bf16 %v2247_v35, %v2261_v41 }
  0x9b   : > { %v1944_v58 = vunpack.i.h.bf16 %v1942_v46  ;;  %v1943_v59 = vunpack.i.l.bf16 %v1942_v46  ;;  %v2000_v39 = vpack.i.bf16 %v2177_v52, %v2181_v53  ;;  %v2005_v46 = vpack.i.bf16 %v2187_v56, %v2191_v57 }
  0x9c   : > { %v1049_v48 = vsel %vm632_vm11, %v1948_v44, %v1949_v43  ;;  %v1065_v55 = vsel %vm632_vm11, %v1949_v43, %v1948_v44  ;;  %1986 = vrot.lane.b32.xlu1 %v1985_v36, %s2072_s25  ;;  %1981 = vrot.lane.b32.xlu0 %v1980_v37, %s2072_s25 }
  0x9d   : > { %v1957_v61 = vpop.permute.xlu1 %1956  ;;  %v1071_v62 = vsel %vm2255_vm13, %v2127_v26, %v1065_v55  ;;  %v1070_v63 = vsel %vm2234_vm12, %v2125_v25, %v1049_v48  ;;  %v1048_v0 = vsel %vm632_vm11, %v1943_v59, %v1944_v58  ;;  %v1064_v3 = vsel %vm632_vm11, %v1944_v58, %v1943_v59  ;;  %1706 = vmatmul.mubr.msk.f32.vlgmr.msra.gmra.mrb[0].mxu1 %vm413_vm8, %v227_v47  ;;  %v229_v55 = vld [vmem:[%s2727_s2 + $0x30] sm:$0xff] }
  0x9e   : > { %v1959_v4 = vunpack.i.h.bf16 %v1957_v61  ;;  %v1958_v7 = vunpack.i.l.bf16 %v1957_v61  ;;  %v1952_v8 = vpop.permute.xlu0 %1951  ;;  %v1069_v14 = vsel %vm2255_vm13, %v2115_v16, %v1064_v3  ;;  %v1068_v17 = vsel %vm2234_vm12, %v2113_v15, %v1048_v0  ;;  %496 = vmatprep.mubr.f32.mxu1 %v2071_v31 }
  0x9f   : > { %v1954_v24 = vunpack.i.h.bf16 %v1952_v8  ;;  %v1953_v33 = vunpack.i.l.bf16 %v1952_v8  ;;  %v1787_v34 = vpack.c.bf16 %v1071_v62, %v1069_v14  ;;  %v1789_v36 = vpack.c.bf16 %v1070_v63, %v1068_v17  ;;  %v230_v62 = vld [vmem:[%s2727_s2 + $0x38] sm:$0xff]  ;;  %v243_v63 = vld [vmem:[%s2727_s2 + $0xa0] sm:$0xff]  ;;  %v245_v14 = vld [vmem:[%s2727_s2 + $0xb0] sm:$0xff] }
  0xa0   : > { %v1051_v19 = vsel %vm632_vm11, %v1958_v7, %v1959_v4  ;;  %v1067_v20 = vsel %vm632_vm11, %v1959_v4, %v1958_v7  ;;  %1996 = vrot.lane.b32.xlu1 %v1995_v45, %s2072_s25  ;;  %1991 = vrot.lane.b32.xlu0 %v1990_v60, %s2072_s25  ;;  %v2015_v60 = vpack.i.bf16 %v2184_v54, %v2207_v2  ;;  %v244_v4 = vld [vmem:[%s2727_s2 + $0xa8] sm:$0xff] }
  0xa1   : > { %v1075_v37 = vsel %vm2255_vm13, %v2121_v23, %v1067_v20  ;;  %v1050_v43 = vsel %vm632_vm11, %v1953_v33, %v1954_v24  ;;  %v1066_v44 = vsel %vm632_vm11, %v1954_v24, %v1953_v33  ;;  %1707 = vmatmul.mubr.msk.f32.gmra.mrb[2].mxu1 %vm413_vm8, %v228_v18  ;;  %v1074_v45 = vsel %vm2234_vm12, %v2119_v22, %v1051_v19  ;;  %v246_v19 = vld [vmem:[%s2727_s2 + $0xb8] sm:$0xff] }
  0xa2   : > { %1788 = vmatprep.subr.bf16.mxu0 %v1787_v34  ;;  %v1073_v47 = vsel %vm2255_vm13, %v2109_v10, %v1066_v44  ;;  %v1072_v48 = vsel %vm2234_vm12, %v2107_v9, %v1050_v43  ;;  %502 = vmatprep.mubr.f32.mxu1 %v2071_v31  ;;  %v2010_v61 = vpack.i.bf16 %v2174_v51, %v2203_v1 }
  0xa3   : > { %1790 = vmatpush1.bf16.msra.mxu0 %v1789_v36  ;;  %v1791_v58 = vpack.c.bf16 %v1075_v37, %v1073_v47  ;;  %v1793_v59 = vpack.c.bf16 %v1074_v45, %v1072_v48  ;;  %v2025_v0 = vpack.i.bf16 %v2125_v25, %v2113_v15  ;;  %v2020_v3 = vpack.i.bf16 %v2127_v26, %v2115_v16 }
  0xa4   : > { %2006 = vrot.lane.b32.xlu1 %v2005_v46, %s2070_s20  ;;  %2001 = vrot.lane.b32.xlu0 %v2000_v39, %s2070_s20  ;;  %v2035_v7 = vpack.i.bf16 %v2119_v22, %v2107_v9  ;;  %v2030_v8 = vpack.i.bf16 %v2121_v23, %v2109_v10  ;;  %v2045_v17 = vpack.i.bf16 %v2213_v5, %v2216_v6 }
  0xa5   : > { %1792 = vmatprep.subr.bf16.mxu0 %v1791_v58  ;;  %1708 = vmatmul.mubr.msk.f32.gmra.mrb[4].mxu1 %vm413_vm8, %v229_v55  ;;  %v2040_v18 = vpack.i.bf16 %v2223_v12, %v2226_v13  ;;  %v2055_v20 = vpack.i.bf16 %v2247_v35, %v2241_v27  ;;  %v2050_v24 = vpack.i.bf16 %v2261_v41, %v2264_v42 }
  0xa6   : > { %508 = vmatprep.mubr.f32.mxu1 %v2071_v31 }
  0xa7   : > { %1794 = vmatpush1.bf16.msra.mxu0 %v1793_v59 }
  0xa8   : > { %2016 = vrot.lane.b32.xlu1 %v2015_v60, %s2070_s20  ;;  %2011 = vrot.lane.b32.xlu0 %v2010_v61, %s2070_s20 }
  0xa9   : > { %1709 = vmatmul.mubr.msk.f32.gmra.mrb[6].mxu1 %vm413_vm8, %v230_v62 }
  0xaa   : > { %1726 = vmatmul.mubr.msk.f32.vlgmr.msra.gmra.mrb[0].mxu0 %vm413_vm8, %v243_v63  ;;  %591 = vmatprep.mubr.f32.mxu1 %v2071_v31 }
  0xab   : > { %1158 = vmatprep.mubr.f32.mxu0 %v2071_v31 }
  0xac   : > { %2026 = vrot.lane.b32.xlu1 %v2025_v0, %s2072_s25  ;;  %2021 = vrot.lane.b32.xlu0 %v2020_v3, %s2072_s25 }
  0xae   : > { %1727 = vmatmul.mubr.msk.f32.gmra.mrb[2].mxu0 %vm413_vm8, %v244_v4 }
  0xaf   : > { %1164 = vmatprep.mubr.f32.mxu0 %v2071_v31 }
  0xb0   : > { %2036 = vrot.lane.b32.xlu1 %v2035_v7, %s2072_s25  ;;  %2031 = vrot.lane.b32.xlu0 %v2030_v8, %s2072_s25 }
  0xb2   : > { %1728 = vmatmul.mubr.msk.f32.gmra.mrb[4].mxu0 %vm413_vm8, %v245_v14 }
  0xb3   : > { %1170 = vmatprep.mubr.f32.mxu0 %v2071_v31 }
  0xb4   : > { %2046 = vrot.lane.b32.xlu1 %v2045_v17, %s2070_s20  ;;  %2041 = vrot.lane.b32.xlu0 %v2040_v18, %s2070_s20 }
  0xb6   : > { %1729 = vmatmul.mubr.msk.f32.gmra.mrb[6].mxu0 %vm413_vm8, %v246_v19 }
  0xb7   : > { %1309 = vmatprep.mubr.f32.mxu0 %v2071_v31 }
  0xb8   : > { %2056 = vrot.lane.b32.xlu1 %v2055_v20, %s2070_s20  ;;  %2051 = vrot.lane.b32.xlu0 %v2050_v24, %s2070_s20 }
 0x106   : > { %v1967_v33 = vpop.permute.xlu1 %1966  ;;  %v1962_v34 = vpop.permute.xlu0 %1961 }
 0x107   : > { %v1969_v39 = vunpack.i.h.bf16 %v1967_v33  ;;  %v1968_v43 = vunpack.i.l.bf16 %v1967_v33  ;;  %v1964_v44 = vunpack.i.h.bf16 %v1962_v34  ;;  %v1963_v45 = vunpack.i.l.bf16 %v1962_v34 }
 0x109   : > { %v390_v46 = vsel %vm388_vm14, %v1969_v39, %v1964_v44  ;;  %v402_v47 = vsel %vm388_vm14, %v1964_v44, %v1969_v39  ;;  %v389_v49 = vsel %vm388_vm14, %v1968_v43, %v1963_v45  ;;  %v401_v11 = vsel %vm388_vm14, %v1963_v45, %v1968_v43 }
 0x10a   : > { %v1977_v48 = vpop.permute.xlu1 %1976  ;;  %v1972_v55 = vpop.permute.xlu0 %1971  ;;  %v406_v38 = vsel %vm2384_vm15, %v2177_v52, %v389_v49  ;;  %v408_v50 = vsel %vm2384_vm15, %v2187_v56, %v390_v46  ;;  %v405_v58 = vsel %vm2390_vm0, %v2181_v53, %v401_v11  ;;  %v407_v59 = vsel %vm2390_vm0, %v2191_v57, %v402_v47 }
 0x10b   : > { %v1979_v60 = vunpack.i.h.bf16 %v1977_v48  ;;  %v1978_v61 = vunpack.i.l.bf16 %v1977_v48  ;;  %v1974_v62 = vunpack.i.h.bf16 %v1972_v55  ;;  %v1973_v63 = vunpack.i.l.bf16 %v1972_v55 }
 0x10c   : > { %v1755_v0 = vpack.c.bf16 %v408_v50, %v406_v38  ;;  %v1757_v3 = vpack.c.bf16 %v407_v59, %v405_v58 }
 0x10d   : > { %v392_v4 = vsel %vm388_vm14, %v1979_v60, %v1974_v62  ;;  %v404_v7 = vsel %vm388_vm14, %v1974_v62, %v1979_v60  ;;  %v391_v8 = vsel %vm388_vm14, %v1978_v61, %v1973_v63  ;;  %v403_v14 = vsel %vm388_vm14, %v1973_v63, %v1978_v61 }
 0x10e   : > { %1756 = vmatprep.subr.bf16.mxu1 %v1755_v0  ;;  %v1987_v17 = vpop.permute.xlu1 %1986  ;;  %v1982_v18 = vpop.permute.xlu0 %1981  ;;  %v410_v19 = vsel %vm2384_vm15, %v2174_v51, %v391_v8  ;;  %v412_v20 = vsel %vm2384_vm15, %v2184_v54, %v392_v4  ;;  %v409_v24 = vsel %vm2390_vm0, %v2203_v1, %v403_v14  ;;  %v411_v33 = vsel %vm2390_vm0, %v2207_v2, %v404_v7 }
 0x10f   : > { %v1989_v34 = vunpack.i.h.bf16 %v1987_v17  ;;  %v1988_v39 = vunpack.i.l.bf16 %v1987_v17  ;;  %v1984_v43 = vunpack.i.h.bf16 %v1982_v18  ;;  %v1983_v44 = vunpack.i.l.bf16 %v1982_v18  ;;  %1758 = vmatpush1.bf16.msra.mxu1 %v1757_v3  ;;  %v223_v3 = vld [vmem:[%s2727_s2] sm:$0xff] }
 0x110   : > { %v1759_v45 = vpack.c.bf16 %v412_v20, %v410_v19  ;;  %v1761_v46 = vpack.c.bf16 %v411_v33, %v409_v24  ;;  %v1803_v8 = vpack.c.bf16 %v2213_v5, %v2223_v12 }
 0x111   : > { %v1210_v47 = vsel %vm388_vm14, %v1989_v34, %v1984_v43  ;;  %v1222_v49 = vsel %vm388_vm14, %v1984_v43, %v1989_v34  ;;  %v1209_v11 = vsel %vm388_vm14, %v1988_v39, %v1983_v44  ;;  %v1221_v48 = vsel %vm388_vm14, %v1983_v44, %v1988_v39 }
 0x112   : > { %1760 = vmatprep.subr.bf16.mxu1 %v1759_v45  ;;  %v1997_v55 = vpop.permute.xlu1 %1996  ;;  %v1992_v38 = vpop.permute.xlu0 %1991  ;;  %v1226_v50 = vsel %vm2384_vm15, %v2223_v12, %v1209_v11  ;;  %v1228_v58 = vsel %vm2384_vm15, %v2213_v5, %v1210_v47  ;;  %v1225_v59 = vsel %vm2390_vm0, %v2226_v13, %v1221_v48  ;;  %v1227_v60 = vsel %vm2390_vm0, %v2216_v6, %v1222_v49  ;;  %v224_v47 = vld [vmem:[%s2727_s2 + $0x8] sm:$0xff] }
 0x113   : > { %v1999_v61 = vunpack.i.h.bf16 %v1997_v55  ;;  %v1998_v62 = vunpack.i.l.bf16 %v1997_v55  ;;  %v1994_v63 = vunpack.i.h.bf16 %v1992_v38  ;;  %v1993_v0 = vunpack.i.l.bf16 %v1992_v38  ;;  %1762 = vmatpush1.bf16.msra.mxu1 %v1761_v46 }
 0x114   : > { %v1795_v4 = vpack.c.bf16 %v1228_v58, %v1226_v50  ;;  %v1797_v7 = vpack.c.bf16 %v1227_v60, %v1225_v59  ;;  %v1805_v48 = vpack.c.bf16 %v2216_v6, %v2226_v13  ;;  %v1807_v55 = vpack.c.bf16 %v2247_v35, %v2261_v41 }
 0x115   : > { %v1212_v14 = vsel %vm388_vm14, %v1999_v61, %v1994_v63  ;;  %v1224_v17 = vsel %vm388_vm14, %v1994_v63, %v1999_v61  ;;  %v1211_v18 = vsel %vm388_vm14, %v1998_v62, %v1993_v0  ;;  %v1223_v19 = vsel %vm388_vm14, %v1993_v0, %v1998_v62 }
 0x116   : > { %1710 = vmatmul.mubr.msk.f32.vlgmr.msra.gmra.mrb[0].mxu1 %vm413_vm8, %v223_v3  ;;  %1796 = vmatprep.subr.bf16.mxu0 %v1795_v4  ;;  %v2007_v20 = vpop.permute.xlu1 %2006  ;;  %v2002_v24 = vpop.permute.xlu0 %2001  ;;  %v1230_v33 = vsel %vm2384_vm15, %v2261_v41, %v1211_v18  ;;  %v1232_v34 = vsel %vm2384_vm15, %v2247_v35, %v1212_v14  ;;  %v1229_v39 = vsel %vm2390_vm0, %v2264_v42, %v1223_v19 }
 0x117   : > { %v2009_v43 = vunpack.i.h.bf16 %v2007_v20  ;;  %v2008_v44 = vunpack.i.l.bf16 %v2007_v20  ;;  %v2004_v45 = vunpack.i.h.bf16 %v2002_v24  ;;  %v2003_v46 = vunpack.i.l.bf16 %v2002_v24  ;;  %1798 = vmatpush1.bf16.msra.mxu0 %v1797_v7  ;;  %597 = vmatprep.mubr.f32.mxu1 %v2071_v31 }
 0x118   : > { %v1799_v49 = vpack.c.bf16 %v1232_v34, %v1230_v33  ;;  %v1231_v11 = vsel %vm2390_vm0, %v2241_v27, %v1224_v17  ;;  %v225_v17 = vld [vmem:[%s2727_s2 + $0x10] sm:$0xff]  ;;  %v1809_v20 = vpack.c.bf16 %v2241_v27, %v2264_v42 }
 0x119   : > { %v634_v38 = vsel %vm632_vm11, %v2008_v44, %v2009_v43  ;;  %v650_v50 = vsel %vm632_vm11, %v2009_v43, %v2008_v44  ;;  %v633_v58 = vsel %vm632_vm11, %v2003_v46, %v2004_v45  ;;  %v649_v59 = vsel %vm632_vm11, %v2004_v45, %v2003_v46 }
 0x11a   : > { %1711 = vmatmul.mubr.msk.f32.gmra.mrb[2].mxu1 %vm413_vm8, %v224_v47  ;;  %1800 = vmatprep.subr.bf16.mxu0 %v1799_v49  ;;  %v2017_v60 = vpop.permute.xlu1 %2016  ;;  %v2012_v61 = vpop.permute.xlu0 %2011  ;;  %v1801_v62 = vpack.c.bf16 %v1231_v11, %v1229_v39  ;;  %v654_v63 = vsel %vm2255_vm13, %v2177_v52, %v649_v59  ;;  %v656_v0 = vsel %vm2255_vm13, %v2187_v56, %v650_v50  ;;  %v247_v52 = vld [vmem:[%s2727_s2 + $0xc0] sm:$0xff]  ;;  %v226_v11 = vld [vmem:[%s2727_s2 + $0x18] sm:$0xff] }
 0x11b   : > { %v2019_v3 = vunpack.i.h.bf16 %v2017_v60  ;;  %v2018_v4 = vunpack.i.l.bf16 %v2017_v60  ;;  %v2014_v7 = vunpack.i.h.bf16 %v2012_v61  ;;  %v2013_v14 = vunpack.i.l.bf16 %v2012_v61  ;;  %603 = vmatprep.mubr.f32.mxu1 %v2071_v31 }
 0x11c   : > { %1802 = vmatpush1.bf16.msra.mxu0 %v1801_v62  ;;  %v1763_v18 = vpack.c.bf16 %v656_v0, %v654_v63  ;;  %v653_v56 = vsel %vm2234_vm12, %v2181_v53, %v633_v58  ;;  %v655_v19 = vsel %vm2234_vm12, %v2191_v57, %v634_v38 }
 0x11d   : > { %v636_v24 = vsel %vm632_vm11, %v2018_v4, %v2019_v3  ;;  %v652_v33 = vsel %vm632_vm11, %v2019_v3, %v2018_v4  ;;  %v635_v34 = vsel %vm632_vm11, %v2013_v14, %v2014_v7  ;;  %v651_v39 = vsel %vm632_vm11, %v2014_v7, %v2013_v14  ;;  %1804 = vmatprep.subr.bf16.mxu0 %v1803_v8  ;;  %v231_v7 = vld [vmem:[%s2727_s2 + $0x40] sm:$0xff] }
 0x11e   : > { %1712 = vmatmul.mubr.msk.f32.gmra.mrb[4].mxu1 %vm413_vm8, %v225_v17  ;;  %1764 = vmatprep.subr.bf16.mxu1 %v1763_v18  ;;  %v2027_v53 = vpop.permute.xlu1 %2026  ;;  %v2022_v43 = vpop.permute.xlu0 %2021  ;;  %v1765_v44 = vpack.c.bf16 %v655_v19, %v653_v56  ;;  %v658_v57 = vsel %vm2255_vm13, %v2174_v51, %v651_v39  ;;  %v660_v45 = vsel %vm2255_vm13, %v2184_v54, %v652_v33  ;;  %v248_v51 = vld [vmem:[%s2727_s2 + $0xc8] sm:$0xff] }
 0x11f   : > { %1730 = vmatmul.mubr.msk.f32.vlgmr.msra.gmra.mrb[0].mxu0 %vm413_vm8, %v247_v52  ;;  %v2029_v46 = vunpack.i.h.bf16 %v2027_v53  ;;  %v2028_v47 = vunpack.i.l.bf16 %v2027_v53  ;;  %v2024_v49 = vunpack.i.h.bf16 %v2022_v43  ;;  %v2023_v8 = vunpack.i.l.bf16 %v2022_v43  ;;  %609 = vmatprep.mubr.f32.mxu1 %v2071_v31 }
 0x120   : > { %1766 = vmatpush1.bf16.msra.mxu1 %v1765_v44  ;;  %1806 = vmatpush1.bf16.msra.mxu0 %v1805_v48  ;;  %v1767_v38 = vpack.c.bf16 %v660_v45, %v658_v57  ;;  %v657_v54 = vsel %vm2234_vm12, %v2203_v1, %v635_v34  ;;  %v659_v50 = vsel %vm2234_vm12, %v2207_v2, %v636_v24 }
 0x121   : > { %v791_v58 = vsel %vm388_vm14, %v2029_v46, %v2024_v49  ;;  %v803_v59 = vsel %vm388_vm14, %v2024_v49, %v2029_v46  ;;  %v790_v60 = vsel %vm388_vm14, %v2028_v47, %v2023_v8  ;;  %v802_v48 = vsel %vm388_vm14, %v2023_v8, %v2028_v47  ;;  %1808 = vmatprep.subr.bf16.mxu0 %v1807_v55 }
 0x122   : > { %1315 = vmatprep.mubr.f32.mxu0 %v2071_v31  ;;  %1713 = vmatmul.mubr.msk.f32.gmra.mrb[6].mxu1 %vm413_vm8, %v226_v11  ;;  %v2037_v61 = vpop.permute.xlu1 %2036  ;;  %v2032_v62 = vpop.permute.xlu0 %2031  ;;  %v1769_v1 = vpack.c.bf16 %v659_v50, %v657_v54  ;;  %v807_v2 = vsel %vm2384_vm15, %v2115_v16, %v790_v60  ;;  %v809_v63 = vsel %vm2384_vm15, %v2127_v26, %v791_v58  ;;  %v249_v16 = vld [vmem:[%s2727_s2 + $0xd0] sm:$0xff] }
 0x123   : > { %1768 = vmatprep.subr.bf16.mxu1 %v1767_v38  ;;  %1731 = vmatmul.mubr.msk.f32.gmra.mrb[2].mxu0 %vm413_vm8, %v248_v51  ;;  %v2039_v0 = vunpack.i.h.bf16 %v2037_v61  ;;  %v2038_v55 = vunpack.i.l.bf16 %v2037_v61  ;;  %v2034_v3 = vunpack.i.h.bf16 %v2032_v62  ;;  %v2033_v4 = vunpack.i.l.bf16 %v2032_v62 }
 0x124   : > { %1770 = vmatpush1.bf16.msra.mxu1 %v1769_v1  ;;  %1810 = vmatpush1.bf16.msra.mxu0 %v1809_v20  ;;  %v1771_v14 = vpack.c.bf16 %v809_v63, %v807_v2  ;;  %v806_v26 = vsel %vm2390_vm0, %v2113_v15, %v802_v48  ;;  %v808_v17 = vsel %vm2390_vm0, %v2125_v25, %v803_v59 }
 0x125   : > { %v793_v18 = vsel %vm388_vm14, %v2039_v0, %v2034_v3  ;;  %v805_v52 = vsel %vm388_vm14, %v2034_v3, %v2039_v0  ;;  %v792_v56 = vsel %vm388_vm14, %v2038_v55, %v2033_v4  ;;  %v804_v19 = vsel %vm388_vm14, %v2033_v4, %v2038_v55  ;;  %737 = vmatprep.mubr.f32.mxu1 %v2071_v31  ;;  %v254_v55 = vld [vmem:[%s2727_s2 + $0xf8] sm:$0xff]  ;;  %v237_v3 = vld [vmem:[%s2727_s2 + $0x70] sm:$0xff]  ;;  %v255_v4 = vld [vmem:[%s2727_s2 + $0x100] sm:$0xff] }
 0x126   : > { %1321 = vmatprep.mubr.f32.mxu0 %v2071_v31  ;;  %v2047_v20 = vpop.permute.xlu1 %2046  ;;  %v2042_v24 = vpop.permute.xlu0 %2041  ;;  %1772 = vmatprep.subr.bf16.mxu1 %v1771_v14  ;;  %v1773_v15 = vpack.c.bf16 %v808_v17, %v806_v26  ;;  %v811_v25 = vsel %vm2384_vm15, %v2109_v10, %v792_v56  ;;  %v813_v33 = vsel %vm2384_vm15, %v2121_v23, %v793_v18  ;;  %v232_v10 = vld [vmem:[%s2727_s2 + $0x48] sm:$0xff]  ;;  %v250_v23 = vld [vmem:[%s2727_s2 + $0xd8] sm:$0xff]  ;;  %v1604_v56 = vld [vmem:[%s2698_s21] sm:$0xff] }
 0x127   : > { %1714 = vmatmul.mubr.msk.f32.vlgmr.msra.gmra.mrb[0].mxu1 %vm413_vm8, %v231_v7  ;;  %1732 = vmatmul.mubr.msk.f32.gmra.mrb[4].mxu0 %vm413_vm8, %v249_v16  ;;  %v2049_v34 = vunpack.i.h.bf16 %v2047_v20  ;;  %v2048_v39 = vunpack.i.l.bf16 %v2047_v20  ;;  %v2044_v53 = vunpack.i.h.bf16 %v2042_v24  ;;  %v2043_v43 = vunpack.i.l.bf16 %v2042_v24  ;;  %v257_v7 = vld [vmem:[%s2727_s2 + $0x110] sm:$0xff]  ;;  %v242_v16 = vld [vmem:[%s2727_s2 + $0x98] sm:$0xff]  ;;  %v1605_v24 = vld [vmem:[%s2698_s21 + $0x8] sm:$0xff] }
 0x128   : > { %743 = vmatprep.mubr.f32.mxu1 %v2071_v31  ;;  %1327 = vmatprep.mubr.f32.mxu0 %v2071_v31  ;;  %v1775_v36 = vpack.c.bf16 %v813_v33, %v811_v25  ;;  %v810_v44 = vsel %vm2390_vm0, %v2107_v9, %v804_v19  ;;  %v812_v57 = vsel %vm2390_vm0, %v2119_v22, %v805_v52  ;;  %v258_v14 = vld [vmem:[%s2727_s2 + $0x118] sm:$0xff] }
 0x129   : > { %v1468_v45 = vsel %vm632_vm11, %v2048_v39, %v2049_v34  ;;  %v1484_v46 = vsel %vm632_vm11, %v2049_v34, %v2048_v39  ;;  %v1467_v47 = vsel %vm632_vm11, %v2043_v43, %v2044_v53  ;;  %v1483_v49 = vsel %vm632_vm11, %v2044_v53, %v2043_v43  ;;  %1774 = vmatpush1.bf16.msra.mxu1 %v1773_v15  ;;  %v1606_v39 = vld [vmem:[%s2698_s21 + $0x10] sm:$0xff] }
 0x12a   : > { %v2057_v8 = vpop.permute.xlu1 %2056  ;;  %v2052_v11 = vpop.permute.xlu0 %2051  ;;  %v1488_v38 = vsel %vm2255_vm13, %v2223_v12, %v1483_v49  ;;  %v1490_v9 = vsel %vm2255_vm13, %v2213_v5, %v1484_v46  ;;  %v1487_v22 = vsel %vm2234_vm12, %v2226_v13, %v1467_v47  ;;  %v1489_v37 = vsel %vm2234_vm12, %v2216_v6, %v1468_v45  ;;  %1776 = vmatprep.subr.bf16.mxu1 %v1775_v36  ;;  %v233_v5 = vld [vmem:[%s2727_s2 + $0x50] sm:$0xff]  ;;  %v251_v6 = vld [vmem:[%s2727_s2 + $0xe0] sm:$0xff] }
 0x12b   : > { %1715 = vmatmul.mubr.msk.f32.gmra.mrb[2].mxu1 %vm413_vm8, %v232_v10  ;;  %1733 = vmatmul.mubr.msk.f32.gmra.mrb[6].mxu0 %vm413_vm8, %v250_v23  ;;  %v2059_v51 = vunpack.i.h.bf16 %v2057_v8  ;;  %v2058_v54 = vunpack.i.l.bf16 %v2057_v8  ;;  %v2054_v12 = vunpack.i.h.bf16 %v2052_v11  ;;  %v2053_v50 = vunpack.i.l.bf16 %v2052_v11  ;;  %v1607_v10 = vld [vmem:[%s2698_s21 + $0x18] sm:$0xff]  ;;  %v1608_v46 = vld [vmem:[%s2698_s21 + $0x20] sm:$0xff]  ;;  %v1609_v11 = vld [vmem:[%s2698_s21 + $0x28] sm:$0xff] }
 0x12c   : > { %749 = vmatprep.mubr.f32.mxu1 %v2071_v31  ;;  %1418 = vmatprep.mubr.f32.mxu0 %v2071_v31  ;;  %v1811_v13 = vpack.c.bf16 %v1490_v9, %v1488_v38  ;;  %v1813_v58 = vpack.c.bf16 %v1489_v37, %v1487_v22  ;;  %v1777_v59 = vpack.c.bf16 %v812_v57, %v810_v44 }
 0x12d   : > { %v1470_v60 = vsel %vm632_vm11, %v2058_v54, %v2059_v51  ;;  %v1486_v48 = vsel %vm632_vm11, %v2059_v51, %v2058_v54  ;;  %v1469_v61 = vsel %vm632_vm11, %v2053_v50, %v2054_v12  ;;  %v1485_v62 = vsel %vm632_vm11, %v2054_v12, %v2053_v50  ;;  %v1610_v54 = vld [vmem:[%s2698_s21 + $0x30] sm:$0xff] }
 0x12e   : > { %v1493_v1 = vsel %vm2234_vm12, %v2241_v27, %v1470_v60  ;;  %v1491_v2 = vsel %vm2234_vm12, %v2264_v42, %v1469_v61  ;;  %1812 = vmatprep.subr.bf16.mxu0 %v1811_v13  ;;  %1778 = vmatpush1.bf16.msra.mxu1 %v1777_v59  ;;  %v1492_v63 = vsel %vm2255_vm13, %v2261_v41, %v1485_v62  ;;  %v252_v27 = vld [vmem:[%s2727_s2 + $0xe8] sm:$0xff] }
 0x12f   : > { %1716 = vmatmul.mubr.msk.f32.gmra.mrb[4].mxu1 %vm413_vm8, %v233_v5  ;;  %1734 = vmatmul.mubr.msk.f32.vlgmr.msra.gmra.mrb[0].mxu0 %vm413_vm8, %v251_v6  ;;  %v1494_v0 = vsel %vm2255_vm13, %v2247_v35, %v1486_v48  ;;  %v1817_v42 = vpack.c.bf16 %v1493_v1, %v1491_v2  ;;  %v235_v35 = vld [vmem:[%s2727_s2 + $0x60] sm:$0xff]  ;;  %v1611_v6 = vld [vmem:[%s2698_s21 + $0x38] sm:$0xff] }
 0x130   : > { %1814 = vmatpush1.bf16.msra.mxu0 %v1813_v58  ;;  %755 = vmatprep.mubr.f32.mxu1 %v2071_v31  ;;  %v1815_v41 = vpack.c.bf16 %v1494_v0, %v1492_v63 }
 0x131   : > { %1424 = vmatprep.mubr.f32.mxu0 %v2071_v31  ;;  %1819 = vmatprep.subr.bf16.mxu1 %v2137_v28  ;;  %v236_v28 = vld [vmem:[%s2727_s2 + $0x68] sm:$0xff] }
 0x132   : > { %1816 = vmatprep.subr.bf16.mxu0 %v1815_v41 }
 0x133   : > { %1717 = vmatmul.mubr.msk.f32.gmra.mrb[6].mxu1 %vm413_vm8, %v234_v21  ;;  %1735 = vmatmul.mubr.msk.f32.gmra.mrb[2].mxu0 %vm413_vm8, %v252_v27 }
 0x134   : > { %1818 = vmatpush1.bf16.msra.mxu0 %v1817_v42  ;;  %890 = vmatprep.mubr.f32.mxu1 %v2071_v31 }
 0x135   : > { %1430 = vmatprep.mubr.f32.mxu0 %v2071_v31 }
 0x137   : > { %1718 = vmatmul.mubr.msk.f32.vlgmr.msra.gmra.mrb[0].mxu1 %vm413_vm8, %v235_v35  ;;  %1736 = vmatmul.mubr.msk.f32.gmra.mrb[4].mxu0 %vm413_vm8, %v253_v40 }
 0x138   : > { %896 = vmatprep.mubr.f32.mxu1 %v2071_v31  ;;  %1436 = vmatprep.mubr.f32.mxu0 %v2071_v31 }
 0x139   : > { %1821 = vmatpush1.bf16.msra.mxu1 %v2141_v29  ;;  %v238_v29 = vld [vmem:[%s2727_s2 + $0x78] sm:$0xff] }
 0x13a   : > { %1820 = vmatprep.subr.bf16.mxu1 %v2145_v30  ;;  %v256_v30 = vld [vmem:[%s2727_s2 + $0x108] sm:$0xff] }
 0x13b   : > { %1719 = vmatmul.mubr.msk.f32.gmra.mrb[2].mxu1 %vm413_vm8, %v236_v28  ;;  %1737 = vmatmul.mubr.msk.f32.gmra.mrb[6].mxu0 %vm413_vm8, %v254_v55 }
 0x13c   : > { %902 = vmatprep.mubr.f32.mxu1 %v2071_v31  ;;  %1571 = vmatprep.mubr.f32.mxu0 %v2071_v31 }
 0x13d   : > { %1822 = vmatpush1.bf16.msra.mxu1 %v2152_v32  ;;  %v241_v32 = vld [vmem:[%s2727_s2 + $0x90] sm:$0xff] }
 0x13f   : > { %1720 = vmatmul.mubr.msk.f32.gmra.mrb[4].mxu1 %vm413_vm8, %v237_v3  ;;  %1738 = vmatmul.mubr.msk.f32.vlgmr.msra.gmra.mrb[0].mxu0 %vm413_vm8, %v255_v4 }
 0x140   : > { %908 = vmatprep.mubr.f32.mxu1 %v2071_v31  ;;  %1577 = vmatprep.mubr.f32.mxu0 %v2071_v31 }
 0x143   : > { %1721 = vmatmul.mubr.msk.f32.gmra.mrb[6].mxu1 %vm413_vm8, %v238_v29  ;;  %1739 = vmatmul.mubr.msk.f32.gmra.mrb[2].mxu0 %vm413_vm8, %v256_v30 }
 0x144   : > { %1011 = vmatprep.mubr.f32.mxu1 %v2071_v31  ;;  %1583 = vmatprep.mubr.f32.mxu0 %v2071_v31 }
 0x147   : > { %1724 = vmatmul.mubr.msk.f32.vlgmr.msra.gmra.mrb[4].mxu1 %vm413_vm8, %v241_v32  ;;  %1740 = vmatmul.mubr.msk.f32.gmra.mrb[4].mxu0 %vm413_vm8, %v257_v7 }
 0x148   : > { %1017 = vmatprep.mubr.f32.mxu1 %v2071_v31  ;;  %1589 = vmatprep.mubr.f32.mxu0 %v2071_v31 }
 0x14b   : > { %1725 = vmatmul.mubr.msk.f32.gmra.mrb[6].mxu1 %vm413_vm8, %v242_v16  ;;  %1741 = vmatmul.mubr.msk.f32.gmra.mrb[6].mxu0 %vm413_vm8, %v258_v14 }
 0x20a   : > { %v892_v26 = vpop.f32.mrb[0].mxu1 }
 0x20b   : > { %v894_v17 = vpop.f32.mrb[1].mxu1 }
 0x20e   : > { %v898_v18 = vpop.f32.mrb[2].mxu1 }
 0x20f   : > { %v900_v52 = vpop.f32.mrb[3].mxu1 }
 0x212   : > { %v1573_v31 = vpop.f32.mrb[0].mxu0 }
 0x213   : > { %v1823_v19 = vadd.f32 %v1573_v31, %v892_v26  ;;  %v1575_v20 = vpop.f32.mrb[1].mxu0 }
 0x214   : > { %v1824_v15 = vadd.f32 %v1575_v20, %v894_v17 }
 0x215   : > { %v1612_v25 = vadd.f32 %v1823_v19, %v1604_v56 }
 0x216   : > { %v1613_v33 = vadd.f32 %v1824_v15, %v1605_v24  ;;  %v1579_v34 = vpop.f32.mrb[2].mxu0 }
 0x217   : > { %1620 = vst [vmem:[%s2706_s24] sm:$0xff] %v1612_v25  ;;  %v1825_v53 = vadd.f32 %v1579_v34, %v898_v18  ;;  %v1581_v43 = vpop.f32.mrb[3].mxu0 }
 0x218   : > { %1621 = vst [vmem:[%s2706_s24 + $0x8] sm:$0xff] %v1613_v33  ;;  %v1826_v23 = vadd.f32 %v1581_v43, %v900_v52 }
 0x219   : > { %v1614_v36 = vadd.f32 %v1825_v53, %v1606_v39 }
 0x21a   : > { %v1615_v44 = vadd.f32 %v1826_v23, %v1607_v10  ;;  %v1013_v57 = vpop.f32.mrb[4].mxu1  ;;  %v1585_v45 = vpop.f32.mrb[4].mxu0 }
 0x21b   : > { %1622 = vst [vmem:[%s2706_s24 + $0x10] sm:$0xff] %v1614_v36  ;;  %v1827_v47 = vadd.f32 %v1585_v45, %v1013_v57  ;;  %v1015_v49 = vpop.f32.mrb[5].mxu1  ;;  %v1587_v8 = vpop.f32.mrb[5].mxu0 }
 0x21c   : > { %1623 = vst [vmem:[%s2706_s24 + $0x18] sm:$0xff] %v1615_v44  ;;  %v1828_v38 = vadd.f32 %v1587_v8, %v1015_v49 }
 0x21d   : > { %v1616_v9 = vadd.f32 %v1827_v47, %v1608_v46 }
 0x21e   : > { %v1617_v22 = vadd.f32 %v1828_v38, %v1609_v11  ;;  %v1019_v37 = vpop.f32.mrb[6].mxu1  ;;  %v1591_v51 = vpop.f32.mrb[6].mxu0 }
 0x21f   : > { %1624 = vst [vmem:[%s2706_s24 + $0x20] sm:$0xff] %v1616_v9  ;;  %v1829_v12 = vadd.f32 %v1591_v51, %v1019_v37  ;;  %v1021_v50 = vpop.f32.mrb[7].mxu1  ;;  %v1593_v5 = vpop.f32.mrb[7].mxu0 }
 0x220   : > { %1625 = vst [vmem:[%s2706_s24 + $0x28] sm:$0xff] %v1617_v22  ;;  %v1830_v13 = vadd.f32 %v1593_v5, %v1021_v50 }
 0x221   : > { %v1618_v58 = vadd.f32 %v1829_v12, %v1610_v54 }
 0x222   : > { %v1619_v59 = vadd.f32 %v1830_v13, %v1611_v6 }
 0x223   : > { %1626 = vst [vmem:[%s2706_s24 + $0x30] sm:$0xff] %v1618_v58 }
 0x224   : > { %1627 = vst [vmem:[%s2706_s24 + $0x38] sm:$0xff] %v1619_v59 }
 0x225 PF: > { %s13_s12 = sadd.s32 1, %s2066_s12  }
 0x226   : > { %p10_p4 = scmp.ge.s32.totalorder %s13_s12, 4  }
 0x228   :  { %12 = sbr.rel (!%p10_p4) target bundleno = 1 (0x1), region = 65 }

// kernel: fuse_block_forward.5
= control target key start
LH: loop header
LB: loop body
LE: loop exit
PB: predicated region body
PF: predicated region fallthrough
CT: control target
= control target key end

     0   :  { %s2010_s9 = smov 0   ;;  %s2621_s0 = inlined_call_operand.vmem [shape: f32[2,32,256], index: 0, kind: input, shape index: {}]   ;;  %s2622_s1 = inlined_call_operand.vmem [shape: f32[9,32,32], index: 1, kind: input, shape index: {}]   ;;  %s2623_s2 = inlined_call_operand.vmem [shape: f32[2,32,256], index: 2, kind: output, shape index: {}]  }
   0x1 LB: > { %s1620_s10 = sadd.s32 4294967295, %s1988_s9   ;;  %p1624_p0 = scmp.ge.s32.totalorder %s1988_s9, 1  ;;  %s1988_s9 = sphi %s2010_s9, %s12_s9  }
   0x2   : > { %p112_p1 = scmp.lt.s32.totalorder %s1988_s9, 3 }
   0x4   : > { %p113_p2 = pnand %p1624_p0, %p112_p1 }
   0x5   : > { %p134_p3 = scmp.lt.s32.totalorder (!%p113_p2), %s1620_s10, 1  ;;  %s1990_s15 = smov (!%p113_p2), 16   ;;  %v1993_v31 = vmov (!%p113_p2), 0.0   ;;  %vm366_vm8 = vcmask (!%p113_p2), 261120   ;;  %v192_v33 = vld [vmem:[%s2622_s1 + $0x80] sm:$0xff] (!%p113_p2)  ;;  %v212_v34 = vlaneseq (!%p113_p2)  ;;  %v193_v36 = vld [vmem:[%s2622_s1 + $0x88] sm:$0xff] (!%p113_p2) }
   0x6   : > { %116 = sbr.rel (%p113_p2) target bundleno = 547 (0x223), region = 28  ;;  %s1991_s16 = smov (!%p113_p2), 112   ;;  %443 = vmatprep.mubr.f32.mxu1 (!%p113_p2), %v1993_v31  ;;  %952 = vmatprep.mubr.f32.mxu0 (!%p113_p2), %v1993_v31  ;;  %vm267_vm9 = vcmask (!%p113_p2), 130048   ;;  %vm300_vm10 = vcmask (!%p113_p2), 916480   ;;  %vm585_vm11 = vcmask (!%p113_p2), 1039360   ;;  %vm341_vm14 = vcmask (!%p113_p2), 7168  }
   0x7   : > { %s1992_s17 = smov (!%p113_p2), 127   ;;  %v2085_v38 = vand.u32 (!%p113_p2), 127, %v212_v34  ;;  %s1994_s22 = smov (!%p113_p2), 1  }
   0x9   : > { %v2089_v49 = vadd.s32 (!%p113_p2), 128, %v2085_v38  ;;  %v219_v50 = vand.u32 (!%p113_p2), 15, %v2085_v38 }
   0xb   : > { %vm2153_vm12 = vcmp.eq.s32.totalorder (!%p113_p2), %v219_v50, 15 }
   0xd   : > { %s2633_s10 = smov (!%p134_p3, %s1620_s10), 1 }
   0xe   : > { %s1667_s11 = sshll.u32 %s2633_s10, 6 }
   0xf   : > { %s138_s14 = scalar_lea.vmem %s2621_s0, %s1667_s11  ;;  %s143_s18 = scalar_lea.vmem %s2623_s2, %s1667_s11 }
  0x10   : > { %v148_v0 = vld [vmem:[%s138_s14 + $0x20] sm:$0xff]  ;;  %v149_v1 = vld [vmem:[%s138_s14 + $0x28] sm:$0xff]  ;;  %v150_v7 = vld [vmem:[%s138_s14 + $0x30] sm:$0xff] }
  0x11   : > { %v144_v2 = vld [vmem:[%s138_s14] sm:$0xff]  ;;  %vm156_vm0 = vcmp.gt.f32.partialorder %v148_v0, 0.0  ;;  %vm157_vm1 = vcmp.gt.f32.partialorder %v149_v1, 0.0  ;;  %v164_v3 = vmul.f32 0.2, %v148_v0  ;;  %v145_v5 = vld [vmem:[%s138_s14 + $0x8] sm:$0xff] }
  0x12   : > { %v165_v4 = vmul.f32 0.2, %v149_v1  ;;  %vm152_vm2 = vcmp.gt.f32.partialorder %v144_v2, 0.0  ;;  %v160_v6 = vmul.f32 0.2, %v144_v2  ;;  %v151_v8 = vld [vmem:[%s138_s14 + $0x38] sm:$0xff] }
  0x13   : > { %v2026_v9 = vsel %vm156_vm0, %v148_v0, %v164_v3  ;;  %vm153_vm3 = vcmp.gt.f32.partialorder %v145_v5, 0.0  ;;  %v161_v11 = vmul.f32 0.2, %v145_v5  ;;  %v146_v12 = vld [vmem:[%s138_s14 + $0x10] sm:$0xff]  ;;  %v147_v13 = vld [vmem:[%s138_s14 + $0x18] sm:$0xff]  ;;  %vm158_vm4 = vcmp.gt.f32.partialorder %v150_v7, 0.0 }
  0x14   : > { %v2028_v10 = vsel %vm157_vm1, %v149_v1, %v165_v4  ;;  %v2032_v15 = vsel %vm152_vm2, %v144_v2, %v160_v6  ;;  %vm159_vm5 = vcmp.gt.f32.partialorder %v151_v8, 0.0  ;;  %v166_v17 = vmul.f32 0.2, %v150_v7 }
  0x15   : > { %v1832_v14 = vpack.i.bf16 %v2028_v10, %v2026_v9  ;;  %v2034_v16 = vsel %vm153_vm3, %v145_v5, %v161_v11  ;;  %v167_v18 = vmul.f32 0.2, %v151_v8  ;;  %vm154_vm6 = vcmp.gt.f32.partialorder %v146_v12, 0.0 }
  0x16   : > { %v1822_v19 = vpack.i.bf16 %v2034_v16, %v2032_v15  ;;  %vm155_vm7 = vcmp.gt.f32.partialorder %v147_v13, 0.0  ;;  %v162_v20 = vmul.f32 0.2, %v146_v12  ;;  %v163_v21 = vmul.f32 0.2, %v147_v13 }
  0x17   : > { %1833 = vrot.lane.b32.xlu1 %v1832_v14, %s1990_s15  ;;  %v2038_v22 = vsel %vm158_vm4, %v150_v7, %v166_v17  ;;  %v2040_v23 = vsel %vm159_vm5, %v151_v8, %v167_v18  ;;  %v226_v11 = vand.u32 15, %v2089_v49  ;;  %vm2309_vm0 = vcmp.eq.s32.totalorder %v219_v50, 0 }
  0x18   : > { %1823 = vrot.lane.b32.xlu0 %v1822_v19, %s1990_s15  ;;  %v1837_v24 = vpack.i.bf16 %v2040_v23, %v2038_v22  ;;  %v2044_v25 = vsel %vm154_vm6, %v146_v12, %v162_v20  ;;  %v2046_v26 = vsel %vm155_vm7, %v147_v13, %v163_v21  ;;  %v2064_v30 = vpack.c.bf16 %v2040_v23, %v2028_v10  ;;  %v187_v21 = vld [vmem:[%s2622_s1 + $0x58] sm:$0xff] }
  0x19   : > { %v1827_v27 = vpack.i.bf16 %v2046_v26, %v2044_v25  ;;  %v2056_v28 = vpack.c.bf16 %v2046_v26, %v2034_v16  ;;  %v2060_v29 = vpack.c.bf16 %v2044_v25, %v2032_v15  ;;  %v2071_v32 = vpack.c.bf16 %v2038_v22, %v2026_v9 }
  0x1a   : > { %vm2174_vm13 = vcmp.eq.s32.totalorder %v226_v11, 15  ;;  %vm2303_vm15 = vcmp.eq.s32.totalorder %v226_v11, 0 }
  0x1b   : > { %1838 = vrot.lane.b32.xlu1 %v1837_v24, %s1990_s15  ;;  %1702 = vmatprep.subr.bf16.mxu0 %v2056_v28 }
  0x1c   : > { %1828 = vrot.lane.b32.xlu0 %v1827_v27, %s1990_s15  ;;  %1704 = vmatpush1.bf16.msra.mxu0 %v2060_v29 }
  0x1d   : > { %1706 = vmatprep.subr.bf16.mxu0 %v2064_v30 }
  0x1f   : > { %1848 = vrot.lane.b32.xlu1 %v1827_v27, %s1991_s16 }
  0x20   : > { %1843 = vrot.lane.b32.xlu0 %v1822_v19, %s1991_s16  ;;  %1708 = vmatpush1.bf16.msra.mxu0 %v2071_v32 }
  0x23   : > { %1858 = vrot.lane.b32.xlu1 %v1837_v24, %s1991_s16  ;;  %1645 = vmatmul.mubr.msk.f32.vlgmr.msra.gmra.mrb[0].mxu0 %vm366_vm8, %v192_v33 }
  0x24   : > { %1853 = vrot.lane.b32.xlu0 %v1832_v14, %s1991_s16  ;;  %958 = vmatprep.mubr.f32.mxu0 %v1993_v31 }
  0x27   : > { %1868 = vrot.lane.b32.xlu1 %v1827_v27, %s1992_s17  ;;  %1646 = vmatmul.mubr.msk.f32.gmra.mrb[2].mxu0 %vm366_vm8, %v193_v36 }
  0x28   : > { %1863 = vrot.lane.b32.xlu0 %v1822_v19, %s1992_s17  ;;  %1105 = vmatprep.mubr.f32.mxu0 %v1993_v31 }
  0x2b   : > { %1878 = vrot.lane.b32.xlu1 %v1837_v24, %s1992_s17 }
  0x2c   : > { %1873 = vrot.lane.b32.xlu0 %v1832_v14, %s1992_s17 }
  0x89   : > { %v1834_v35 = vpop.permute.xlu1 %1833 }
  0x8a   : > { %v1824_v37 = vpop.permute.xlu0 %1823  ;;  %v1836_v39 = vunpack.i.h.bf16 %v1834_v35  ;;  %v1835_v40 = vunpack.i.l.bf16 %v1834_v35 }
  0x8b   : > { %v1826_v41 = vunpack.i.h.bf16 %v1824_v37  ;;  %v1825_v42 = vunpack.i.l.bf16 %v1824_v37 }
  0x8c   : > { %v2093_v51 = vsel %vm267_vm9, %v1835_v40, %v1836_v39  ;;  %v2122_v1 = vsel %vm267_vm9, %v2026_v9, %v1835_v40  ;;  %v206_v40 = vld [vmem:[%s2622_s1 + $0xf0] sm:$0xff] }
  0x8d   : > { %v1839_v43 = vpop.permute.xlu1 %1838  ;;  %v2096_v52 = vsel %vm267_vm9, %v1825_v42, %v1826_v41  ;;  %v2100_v53 = vsel %vm267_vm9, %v2032_v15, %v1825_v42 }
  0x8e   : > { %v1841_v44 = vunpack.i.h.bf16 %v1839_v43  ;;  %v1840_v45 = vunpack.i.l.bf16 %v1839_v43  ;;  %v1829_v46 = vpop.permute.xlu0 %1828 }
  0x8f   : > { %v1831_v47 = vunpack.i.h.bf16 %v1829_v46  ;;  %v1830_v48 = vunpack.i.l.bf16 %v1829_v46 }
  0x90   : > { %v2103_v54 = vsel %vm267_vm9, %v1840_v45, %v1841_v44  ;;  %v2126_v2 = vsel %vm267_vm9, %v2038_v22, %v1840_v45 }
  0x91   : > { %v1849_v55 = vpop.permute.xlu1 %1848  ;;  %v2106_v56 = vsel %vm267_vm9, %v1830_v48, %v1831_v47  ;;  %v2110_v57 = vsel %vm267_vm9, %v2044_v25, %v1830_v48  ;;  %v1673_v7 = vpack.c.bf16 %v2103_v54, %v2093_v51  ;;  %v1897_v18 = vpack.i.bf16 %v2126_v2, %v2122_v1  ;;  %v180_v47 = vld [vmem:[%s2622_s1 + $0x20] sm:$0xff] }
  0x92   : > { %v1851_v58 = vunpack.i.h.bf16 %v1849_v55  ;;  %v1850_v59 = vunpack.i.l.bf16 %v1849_v55  ;;  %v1887_v60 = vpack.i.bf16 %v2110_v57, %v2100_v53  ;;  %v1882_v61 = vpack.i.bf16 %v2106_v56, %v2096_v52  ;;  %v1844_v0 = vpop.permute.xlu0 %1843 }
  0x93   : > { %v1669_v62 = vpack.c.bf16 %v2106_v56, %v2096_v52  ;;  %v1671_v63 = vpack.c.bf16 %v2110_v57, %v2100_v53  ;;  %v1846_v3 = vunpack.i.h.bf16 %v1844_v0  ;;  %v1845_v4 = vunpack.i.l.bf16 %v1844_v0 }
  0x94   : > { %1888 = vrot.lane.b32.xlu1 %v1887_v60, %s1994_s22  ;;  %1883 = vrot.lane.b32.xlu0 %v1882_v61, %s1994_s22  ;;  %v2132_v5 = vsel %vm300_vm10, %v1851_v58, %v2046_v26  ;;  %v2135_v6 = vsel %vm300_vm10, %v1850_v59, %v1851_v58  ;;  %v1892_v19 = vpack.i.bf16 %v2103_v54, %v2093_v51 }
  0x95   : > { %v1859_v8 = vpop.permute.xlu1 %1858  ;;  %1670 = vmatprep.subr.bf16.mxu1 %v1669_v62  ;;  %v2142_v12 = vsel %vm300_vm10, %v1846_v3, %v2034_v16  ;;  %v2145_v13 = vsel %vm300_vm10, %v1845_v4, %v1846_v3  ;;  %v1675_v24 = vpack.c.bf16 %v2126_v2, %v2122_v1 }
  0x96   : > { %v1861_v14 = vunpack.i.h.bf16 %v1859_v8  ;;  %v1860_v17 = vunpack.i.l.bf16 %v1859_v8  ;;  %1672 = vmatpush1.bf16.msra.mxu1 %v1671_v63  ;;  %v1854_v20 = vpop.permute.xlu0 %1853  ;;  %v1907_v36 = vpack.i.bf16 %v2135_v6, %v2145_v13  ;;  %v1902_v37 = vpack.i.bf16 %v2132_v5, %v2142_v12 }
  0x97   : > { %1674 = vmatprep.subr.bf16.mxu1 %v1673_v7  ;;  %v1856_v33 = vunpack.i.h.bf16 %v1854_v20  ;;  %v1855_v34 = vunpack.i.l.bf16 %v1854_v20 }
  0x98   : > { %v2160_v27 = vsel %vm300_vm10, %v1860_v17, %v1861_v14  ;;  %1898 = vrot.lane.b32.xlu1 %v1897_v18, %s1994_s22  ;;  %1893 = vrot.lane.b32.xlu0 %v1892_v19, %s1994_s22  ;;  %v2166_v35 = vsel %vm300_vm10, %v1861_v14, %v2040_v23  ;;  %v181_v18 = vld [vmem:[%s2622_s1 + $0x28] sm:$0xff] }
  0x99   : > { %v1869_v39 = vpop.permute.xlu1 %1868  ;;  %v2180_v41 = vsel %vm300_vm10, %v1856_v33, %v2028_v10  ;;  %v2183_v42 = vsel %vm300_vm10, %v1855_v34, %v1856_v33 }
  0x9a   : > { %v1871_v43 = vunpack.i.h.bf16 %v1869_v39  ;;  %v1870_v44 = vunpack.i.l.bf16 %v1869_v39  ;;  %1676 = vmatpush1.bf16.msra.mxu1 %v1675_v24  ;;  %v1917_v45 = vpack.i.bf16 %v2160_v27, %v2183_v42  ;;  %v1864_v46 = vpop.permute.xlu0 %1863  ;;  %v1912_v60 = vpack.i.bf16 %v2166_v35, %v2180_v41 }
  0x9b   : > { %v1866_v58 = vunpack.i.h.bf16 %v1864_v46  ;;  %v1865_v59 = vunpack.i.l.bf16 %v1864_v46  ;;  %v1922_v39 = vpack.i.bf16 %v2096_v52, %v2100_v53  ;;  %v1927_v46 = vpack.i.bf16 %v2106_v56, %v2110_v57 }
  0x9c   : > { %v1002_v48 = vsel %vm585_vm11, %v1870_v44, %v1871_v43  ;;  %v1018_v55 = vsel %vm585_vm11, %v1871_v43, %v1870_v44  ;;  %1908 = vrot.lane.b32.xlu1 %v1907_v36, %s1994_s22  ;;  %1903 = vrot.lane.b32.xlu0 %v1902_v37, %s1994_s22 }
  0x9d   : > { %v1879_v61 = vpop.permute.xlu1 %1878  ;;  %v1024_v62 = vsel %vm2174_vm13, %v2046_v26, %v1018_v55  ;;  %v1023_v63 = vsel %vm2153_vm12, %v2044_v25, %v1002_v48  ;;  %v1001_v0 = vsel %vm585_vm11, %v1865_v59, %v1866_v58  ;;  %v1017_v3 = vsel %vm585_vm11, %v1866_v58, %v1865_v59  ;;  %1629 = vmatmul.mubr.msk.f32.vlgmr.msra.gmra.mrb[0].mxu1 %vm366_vm8, %v180_v47  ;;  %v182_v55 = vld [vmem:[%s2622_s1 + $0x30] sm:$0xff] }
  0x9e   : > { %v1881_v4 = vunpack.i.h.bf16 %v1879_v61  ;;  %v1880_v7 = vunpack.i.l.bf16 %v1879_v61  ;;  %v1874_v8 = vpop.permute.xlu0 %1873  ;;  %v1022_v14 = vsel %vm2174_vm13, %v2034_v16, %v1017_v3  ;;  %v1021_v17 = vsel %vm2153_vm12, %v2032_v15, %v1001_v0  ;;  %449 = vmatprep.mubr.f32.mxu1 %v1993_v31 }
  0x9f   : > { %v1876_v24 = vunpack.i.h.bf16 %v1874_v8  ;;  %v1875_v33 = vunpack.i.l.bf16 %v1874_v8  ;;  %v1709_v34 = vpack.c.bf16 %v1024_v62, %v1022_v14  ;;  %v1711_v36 = vpack.c.bf16 %v1023_v63, %v1021_v17  ;;  %v183_v62 = vld [vmem:[%s2622_s1 + $0x38] sm:$0xff]  ;;  %v196_v63 = vld [vmem:[%s2622_s1 + $0xa0] sm:$0xff]  ;;  %v198_v14 = vld [vmem:[%s2622_s1 + $0xb0] sm:$0xff] }
  0xa0   : > { %v1004_v19 = vsel %vm585_vm11, %v1880_v7, %v1881_v4  ;;  %v1020_v20 = vsel %vm585_vm11, %v1881_v4, %v1880_v7  ;;  %1918 = vrot.lane.b32.xlu1 %v1917_v45, %s1994_s22  ;;  %1913 = vrot.lane.b32.xlu0 %v1912_v60, %s1994_s22  ;;  %v1937_v60 = vpack.i.bf16 %v2103_v54, %v2126_v2  ;;  %v197_v4 = vld [vmem:[%s2622_s1 + $0xa8] sm:$0xff] }
  0xa1   : > { %v1028_v37 = vsel %vm2174_vm13, %v2040_v23, %v1020_v20  ;;  %v1003_v43 = vsel %vm585_vm11, %v1875_v33, %v1876_v24  ;;  %v1019_v44 = vsel %vm585_vm11, %v1876_v24, %v1875_v33  ;;  %1630 = vmatmul.mubr.msk.f32.gmra.mrb[2].mxu1 %vm366_vm8, %v181_v18  ;;  %v1027_v45 = vsel %vm2153_vm12, %v2038_v22, %v1004_v19  ;;  %v199_v19 = vld [vmem:[%s2622_s1 + $0xb8] sm:$0xff] }
  0xa2   : > { %1710 = vmatprep.subr.bf16.mxu0 %v1709_v34  ;;  %v1026_v47 = vsel %vm2174_vm13, %v2028_v10, %v1019_v44  ;;  %v1025_v48 = vsel %vm2153_vm12, %v2026_v9, %v1003_v43  ;;  %455 = vmatprep.mubr.f32.mxu1 %v1993_v31  ;;  %v1932_v61 = vpack.i.bf16 %v2093_v51, %v2122_v1 }
  0xa3   : > { %1712 = vmatpush1.bf16.msra.mxu0 %v1711_v36  ;;  %v1713_v58 = vpack.c.bf16 %v1028_v37, %v1026_v47  ;;  %v1715_v59 = vpack.c.bf16 %v1027_v45, %v1025_v48  ;;  %v1947_v0 = vpack.i.bf16 %v2044_v25, %v2032_v15  ;;  %v1942_v3 = vpack.i.bf16 %v2046_v26, %v2034_v16 }
  0xa4   : > { %1928 = vrot.lane.b32.xlu1 %v1927_v46, %s1992_s17  ;;  %1923 = vrot.lane.b32.xlu0 %v1922_v39, %s1992_s17  ;;  %v1957_v7 = vpack.i.bf16 %v2038_v22, %v2026_v9  ;;  %v1952_v8 = vpack.i.bf16 %v2040_v23, %v2028_v10  ;;  %v1967_v17 = vpack.i.bf16 %v2132_v5, %v2135_v6 }
  0xa5   : > { %1714 = vmatprep.subr.bf16.mxu0 %v1713_v58  ;;  %1631 = vmatmul.mubr.msk.f32.gmra.mrb[4].mxu1 %vm366_vm8, %v182_v55  ;;  %v1962_v18 = vpack.i.bf16 %v2142_v12, %v2145_v13  ;;  %v1977_v20 = vpack.i.bf16 %v2166_v35, %v2160_v27  ;;  %v1972_v24 = vpack.i.bf16 %v2180_v41, %v2183_v42 }
  0xa6   : > { %461 = vmatprep.mubr.f32.mxu1 %v1993_v31 }
  0xa7   : > { %1716 = vmatpush1.bf16.msra.mxu0 %v1715_v59 }
  0xa8   : > { %1938 = vrot.lane.b32.xlu1 %v1937_v60, %s1992_s17  ;;  %1933 = vrot.lane.b32.xlu0 %v1932_v61, %s1992_s17 }
  0xa9   : > { %1632 = vmatmul.mubr.msk.f32.gmra.mrb[6].mxu1 %vm366_vm8, %v183_v62 }
  0xaa   : > { %1649 = vmatmul.mubr.msk.f32.vlgmr.msra.gmra.mrb[0].mxu0 %vm366_vm8, %v196_v63  ;;  %544 = vmatprep.mubr.f32.mxu1 %v1993_v31 }
  0xab   : > { %1111 = vmatprep.mubr.f32.mxu0 %v1993_v31 }
  0xac   : > { %1948 = vrot.lane.b32.xlu1 %v1947_v0, %s1994_s22  ;;  %1943 = vrot.lane.b32.xlu0 %v1942_v3, %s1994_s22 }
  0xae   : > { %1650 = vmatmul.mubr.msk.f32.gmra.mrb[2].mxu0 %vm366_vm8, %v197_v4 }
  0xaf   : > { %1117 = vmatprep.mubr.f32.mxu0 %v1993_v31 }
  0xb0   : > { %1958 = vrot.lane.b32.xlu1 %v1957_v7, %s1994_s22  ;;  %1953 = vrot.lane.b32.xlu0 %v1952_v8, %s1994_s22 }
  0xb2   : > { %1651 = vmatmul.mubr.msk.f32.gmra.mrb[4].mxu0 %vm366_vm8, %v198_v14 }
  0xb3   : > { %1123 = vmatprep.mubr.f32.mxu0 %v1993_v31 }
  0xb4   : > { %1968 = vrot.lane.b32.xlu1 %v1967_v17, %s1992_s17  ;;  %1963 = vrot.lane.b32.xlu0 %v1962_v18, %s1992_s17 }
  0xb6   : > { %1652 = vmatmul.mubr.msk.f32.gmra.mrb[6].mxu0 %vm366_vm8, %v199_v19 }
  0xb7   : > { %1262 = vmatprep.mubr.f32.mxu0 %v1993_v31 }
  0xb8   : > { %1978 = vrot.lane.b32.xlu1 %v1977_v20, %s1992_s17  ;;  %1973 = vrot.lane.b32.xlu0 %v1972_v24, %s1992_s17 }
 0x106   : > { %v1889_v33 = vpop.permute.xlu1 %1888  ;;  %v1884_v34 = vpop.permute.xlu0 %1883 }
 0x107   : > { %v1891_v39 = vunpack.i.h.bf16 %v1889_v33  ;;  %v1890_v43 = vunpack.i.l.bf16 %v1889_v33  ;;  %v1886_v44 = vunpack.i.h.bf16 %v1884_v34  ;;  %v1885_v45 = vunpack.i.l.bf16 %v1884_v34 }
 0x109   : > { %v343_v46 = vsel %vm341_vm14, %v1891_v39, %v1886_v44  ;;  %v355_v47 = vsel %vm341_vm14, %v1886_v44, %v1891_v39  ;;  %v342_v49 = vsel %vm341_vm14, %v1890_v43, %v1885_v45  ;;  %v354_v11 = vsel %vm341_vm14, %v1885_v45, %v1890_v43 }
 0x10a   : > { %v1899_v48 = vpop.permute.xlu1 %1898  ;;  %v1894_v55 = vpop.permute.xlu0 %1893  ;;  %v359_v38 = vsel %vm2303_vm15, %v2096_v52, %v342_v49  ;;  %v361_v50 = vsel %vm2303_vm15, %v2106_v56, %v343_v46  ;;  %v358_v58 = vsel %vm2309_vm0, %v2100_v53, %v354_v11  ;;  %v360_v59 = vsel %vm2309_vm0, %v2110_v57, %v355_v47 }
 0x10b   : > { %v1901_v60 = vunpack.i.h.bf16 %v1899_v48  ;;  %v1900_v61 = vunpack.i.l.bf16 %v1899_v48  ;;  %v1896_v62 = vunpack.i.h.bf16 %v1894_v55  ;;  %v1895_v63 = vunpack.i.l.bf16 %v1894_v55 }
 0x10c   : > { %v1677_v0 = vpack.c.bf16 %v361_v50, %v359_v38  ;;  %v1679_v3 = vpack.c.bf16 %v360_v59, %v358_v58 }
 0x10d   : > { %v345_v4 = vsel %vm341_vm14, %v1901_v60, %v1896_v62  ;;  %v357_v7 = vsel %vm341_vm14, %v1896_v62, %v1901_v60  ;;  %v344_v8 = vsel %vm341_vm14, %v1900_v61, %v1895_v63  ;;  %v356_v14 = vsel %vm341_vm14, %v1895_v63, %v1900_v61 }
 0x10e   : > { %1678 = vmatprep.subr.bf16.mxu1 %v1677_v0  ;;  %v1909_v17 = vpop.permute.xlu1 %1908  ;;  %v1904_v18 = vpop.permute.xlu0 %1903  ;;  %v363_v19 = vsel %vm2303_vm15, %v2093_v51, %v344_v8  ;;  %v365_v20 = vsel %vm2303_vm15, %v2103_v54, %v345_v4  ;;  %v362_v24 = vsel %vm2309_vm0, %v2122_v1, %v356_v14  ;;  %v364_v33 = vsel %vm2309_vm0, %v2126_v2, %v357_v7 }
 0x10f   : > { %v1911_v34 = vunpack.i.h.bf16 %v1909_v17  ;;  %v1910_v39 = vunpack.i.l.bf16 %v1909_v17  ;;  %v1906_v43 = vunpack.i.h.bf16 %v1904_v18  ;;  %v1905_v44 = vunpack.i.l.bf16 %v1904_v18  ;;  %1680 = vmatpush1.bf16.msra.mxu1 %v1679_v3  ;;  %v176_v3 = vld [vmem:[%s2622_s1] sm:$0xff] }
 0x110   : > { %v1681_v45 = vpack.c.bf16 %v365_v20, %v363_v19  ;;  %v1683_v46 = vpack.c.bf16 %v364_v33, %v362_v24  ;;  %v1725_v8 = vpack.c.bf16 %v2132_v5, %v2142_v12 }
 0x111   : > { %v1163_v47 = vsel %vm341_vm14, %v1911_v34, %v1906_v43  ;;  %v1175_v49 = vsel %vm341_vm14, %v1906_v43, %v1911_v34  ;;  %v1162_v11 = vsel %vm341_vm14, %v1910_v39, %v1905_v44  ;;  %v1174_v48 = vsel %vm341_vm14, %v1905_v44, %v1910_v39 }
 0x112   : > { %1682 = vmatprep.subr.bf16.mxu1 %v1681_v45  ;;  %v1919_v55 = vpop.permute.xlu1 %1918  ;;  %v1914_v38 = vpop.permute.xlu0 %1913  ;;  %v1179_v50 = vsel %vm2303_vm15, %v2142_v12, %v1162_v11  ;;  %v1181_v58 = vsel %vm2303_vm15, %v2132_v5, %v1163_v47  ;;  %v1178_v59 = vsel %vm2309_vm0, %v2145_v13, %v1174_v48  ;;  %v1180_v60 = vsel %vm2309_vm0, %v2135_v6, %v1175_v49  ;;  %v177_v47 = vld [vmem:[%s2622_s1 + $0x8] sm:$0xff] }
 0x113   : > { %v1921_v61 = vunpack.i.h.bf16 %v1919_v55  ;;  %v1920_v62 = vunpack.i.l.bf16 %v1919_v55  ;;  %v1916_v63 = vunpack.i.h.bf16 %v1914_v38  ;;  %v1915_v0 = vunpack.i.l.bf16 %v1914_v38  ;;  %1684 = vmatpush1.bf16.msra.mxu1 %v1683_v46 }
 0x114   : > { %v1717_v4 = vpack.c.bf16 %v1181_v58, %v1179_v50  ;;  %v1719_v7 = vpack.c.bf16 %v1180_v60, %v1178_v59  ;;  %v1727_v48 = vpack.c.bf16 %v2135_v6, %v2145_v13  ;;  %v1729_v55 = vpack.c.bf16 %v2166_v35, %v2180_v41 }
 0x115   : > { %v1165_v14 = vsel %vm341_vm14, %v1921_v61, %v1916_v63  ;;  %v1177_v17 = vsel %vm341_vm14, %v1916_v63, %v1921_v61  ;;  %v1164_v18 = vsel %vm341_vm14, %v1920_v62, %v1915_v0  ;;  %v1176_v19 = vsel %vm341_vm14, %v1915_v0, %v1920_v62 }
 0x116   : > { %1633 = vmatmul.mubr.msk.f32.vlgmr.msra.gmra.mrb[0].mxu1 %vm366_vm8, %v176_v3  ;;  %1718 = vmatprep.subr.bf16.mxu0 %v1717_v4  ;;  %v1929_v20 = vpop.permute.xlu1 %1928  ;;  %v1924_v24 = vpop.permute.xlu0 %1923  ;;  %v1183_v33 = vsel %vm2303_vm15, %v2180_v41, %v1164_v18  ;;  %v1185_v34 = vsel %vm2303_vm15, %v2166_v35, %v1165_v14  ;;  %v1182_v39 = vsel %vm2309_vm0, %v2183_v42, %v1176_v19 }
 0x117   : > { %v1931_v43 = vunpack.i.h.bf16 %v1929_v20  ;;  %v1930_v44 = vunpack.i.l.bf16 %v1929_v20  ;;  %v1926_v45 = vunpack.i.h.bf16 %v1924_v24  ;;  %v1925_v46 = vunpack.i.l.bf16 %v1924_v24  ;;  %1720 = vmatpush1.bf16.msra.mxu0 %v1719_v7  ;;  %550 = vmatprep.mubr.f32.mxu1 %v1993_v31 }
 0x118   : > { %v1721_v49 = vpack.c.bf16 %v1185_v34, %v1183_v33  ;;  %v1184_v11 = vsel %vm2309_vm0, %v2160_v27, %v1177_v17  ;;  %v178_v17 = vld [vmem:[%s2622_s1 + $0x10] sm:$0xff]  ;;  %v1731_v20 = vpack.c.bf16 %v2160_v27, %v2183_v42 }
 0x119   : > { %v587_v38 = vsel %vm585_vm11, %v1930_v44, %v1931_v43  ;;  %v603_v50 = vsel %vm585_vm11, %v1931_v43, %v1930_v44  ;;  %v586_v58 = vsel %vm585_vm11, %v1925_v46, %v1926_v45  ;;  %v602_v59 = vsel %vm585_vm11, %v1926_v45, %v1925_v46 }
 0x11a   : > { %1634 = vmatmul.mubr.msk.f32.gmra.mrb[2].mxu1 %vm366_vm8, %v177_v47  ;;  %1722 = vmatprep.subr.bf16.mxu0 %v1721_v49  ;;  %v1939_v60 = vpop.permute.xlu1 %1938  ;;  %v1934_v61 = vpop.permute.xlu0 %1933  ;;  %v1723_v62 = vpack.c.bf16 %v1184_v11, %v1182_v39  ;;  %v607_v63 = vsel %vm2174_vm13, %v2096_v52, %v602_v59  ;;  %v609_v0 = vsel %vm2174_vm13, %v2106_v56, %v603_v50  ;;  %v200_v52 = vld [vmem:[%s2622_s1 + $0xc0] sm:$0xff]  ;;  %v179_v11 = vld [vmem:[%s2622_s1 + $0x18] sm:$0xff] }
 0x11b   : > { %v1941_v3 = vunpack.i.h.bf16 %v1939_v60  ;;  %v1940_v4 = vunpack.i.l.bf16 %v1939_v60  ;;  %v1936_v7 = vunpack.i.h.bf16 %v1934_v61  ;;  %v1935_v14 = vunpack.i.l.bf16 %v1934_v61  ;;  %556 = vmatprep.mubr.f32.mxu1 %v1993_v31 }
 0x11c   : > { %1724 = vmatpush1.bf16.msra.mxu0 %v1723_v62  ;;  %v1685_v18 = vpack.c.bf16 %v609_v0, %v607_v63  ;;  %v606_v56 = vsel %vm2153_vm12, %v2100_v53, %v586_v58  ;;  %v608_v19 = vsel %vm2153_vm12, %v2110_v57, %v587_v38 }
 0x11d   : > { %v589_v24 = vsel %vm585_vm11, %v1940_v4, %v1941_v3  ;;  %v605_v33 = vsel %vm585_vm11, %v1941_v3, %v1940_v4  ;;  %v588_v34 = vsel %vm585_vm11, %v1935_v14, %v1936_v7  ;;  %v604_v39 = vsel %vm585_vm11, %v1936_v7, %v1935_v14  ;;  %1726 = vmatprep.subr.bf16.mxu0 %v1725_v8  ;;  %v184_v7 = vld [vmem:[%s2622_s1 + $0x40] sm:$0xff] }
 0x11e   : > { %1635 = vmatmul.mubr.msk.f32.gmra.mrb[4].mxu1 %vm366_vm8, %v178_v17  ;;  %1686 = vmatprep.subr.bf16.mxu1 %v1685_v18  ;;  %v1949_v53 = vpop.permute.xlu1 %1948  ;;  %v1944_v43 = vpop.permute.xlu0 %1943  ;;  %v1687_v44 = vpack.c.bf16 %v608_v19, %v606_v56  ;;  %v611_v57 = vsel %vm2174_vm13, %v2093_v51, %v604_v39  ;;  %v613_v45 = vsel %vm2174_vm13, %v2103_v54, %v605_v33  ;;  %v201_v51 = vld [vmem:[%s2622_s1 + $0xc8] sm:$0xff] }
 0x11f   : > { %1653 = vmatmul.mubr.msk.f32.vlgmr.msra.gmra.mrb[0].mxu0 %vm366_vm8, %v200_v52  ;;  %v1951_v46 = vunpack.i.h.bf16 %v1949_v53  ;;  %v1950_v47 = vunpack.i.l.bf16 %v1949_v53  ;;  %v1946_v49 = vunpack.i.h.bf16 %v1944_v43  ;;  %v1945_v8 = vunpack.i.l.bf16 %v1944_v43  ;;  %562 = vmatprep.mubr.f32.mxu1 %v1993_v31 }
 0x120   : > { %1688 = vmatpush1.bf16.msra.mxu1 %v1687_v44  ;;  %1728 = vmatpush1.bf16.msra.mxu0 %v1727_v48  ;;  %v1689_v38 = vpack.c.bf16 %v613_v45, %v611_v57  ;;  %v610_v54 = vsel %vm2153_vm12, %v2122_v1, %v588_v34  ;;  %v612_v50 = vsel %vm2153_vm12, %v2126_v2, %v589_v24 }
 0x121   : > { %v744_v58 = vsel %vm341_vm14, %v1951_v46, %v1946_v49  ;;  %v756_v59 = vsel %vm341_vm14, %v1946_v49, %v1951_v46  ;;  %v743_v60 = vsel %vm341_vm14, %v1950_v47, %v1945_v8  ;;  %v755_v48 = vsel %vm341_vm14, %v1945_v8, %v1950_v47  ;;  %1730 = vmatprep.subr.bf16.mxu0 %v1729_v55 }
 0x122   : > { %1268 = vmatprep.mubr.f32.mxu0 %v1993_v31  ;;  %1636 = vmatmul.mubr.msk.f32.gmra.mrb[6].mxu1 %vm366_vm8, %v179_v11  ;;  %v1959_v61 = vpop.permute.xlu1 %1958  ;;  %v1954_v62 = vpop.permute.xlu0 %1953  ;;  %v1691_v1 = vpack.c.bf16 %v612_v50, %v610_v54  ;;  %v760_v2 = vsel %vm2303_vm15, %v2034_v16, %v743_v60  ;;  %v762_v63 = vsel %vm2303_vm15, %v2046_v26, %v744_v58  ;;  %v202_v16 = vld [vmem:[%s2622_s1 + $0xd0] sm:$0xff] }
 0x123   : > { %1690 = vmatprep.subr.bf16.mxu1 %v1689_v38  ;;  %1654 = vmatmul.mubr.msk.f32.gmra.mrb[2].mxu0 %vm366_vm8, %v201_v51  ;;  %v1961_v0 = vunpack.i.h.bf16 %v1959_v61  ;;  %v1960_v55 = vunpack.i.l.bf16 %v1959_v61  ;;  %v1956_v3 = vunpack.i.h.bf16 %v1954_v62  ;;  %v1955_v4 = vunpack.i.l.bf16 %v1954_v62 }
 0x124   : > { %1692 = vmatpush1.bf16.msra.mxu1 %v1691_v1  ;;  %1732 = vmatpush1.bf16.msra.mxu0 %v1731_v20  ;;  %v1693_v14 = vpack.c.bf16 %v762_v63, %v760_v2  ;;  %v759_v26 = vsel %vm2309_vm0, %v2032_v15, %v755_v48  ;;  %v761_v17 = vsel %vm2309_vm0, %v2044_v25, %v756_v59 }
 0x125   : > { %v746_v18 = vsel %vm341_vm14, %v1961_v0, %v1956_v3  ;;  %v758_v52 = vsel %vm341_vm14, %v1956_v3, %v1961_v0  ;;  %v745_v56 = vsel %vm341_vm14, %v1960_v55, %v1955_v4  ;;  %v757_v19 = vsel %vm341_vm14, %v1955_v4, %v1960_v55  ;;  %690 = vmatprep.mubr.f32.mxu1 %v1993_v31  ;;  %v207_v55 = vld [vmem:[%s2622_s1 + $0xf8] sm:$0xff]  ;;  %v190_v3 = vld [vmem:[%s2622_s1 + $0x70] sm:$0xff]  ;;  %v208_v4 = vld [vmem:[%s2622_s1 + $0x100] sm:$0xff] }
 0x126   : > { %1274 = vmatprep.mubr.f32.mxu0 %v1993_v31  ;;  %v1969_v20 = vpop.permute.xlu1 %1968  ;;  %v1964_v24 = vpop.permute.xlu0 %1963  ;;  %1694 = vmatprep.subr.bf16.mxu1 %v1693_v14  ;;  %v1695_v15 = vpack.c.bf16 %v761_v17, %v759_v26  ;;  %v764_v25 = vsel %vm2303_vm15, %v2028_v10, %v745_v56  ;;  %v766_v33 = vsel %vm2303_vm15, %v2040_v23, %v746_v18  ;;  %v185_v10 = vld [vmem:[%s2622_s1 + $0x48] sm:$0xff]  ;;  %v203_v23 = vld [vmem:[%s2622_s1 + $0xd8] sm:$0xff] }
 0x127   : > { %1637 = vmatmul.mubr.msk.f32.vlgmr.msra.gmra.mrb[0].mxu1 %vm366_vm8, %v184_v7  ;;  %1655 = vmatmul.mubr.msk.f32.gmra.mrb[4].mxu0 %vm366_vm8, %v202_v16  ;;  %v1971_v34 = vunpack.i.h.bf16 %v1969_v20  ;;  %v1970_v39 = vunpack.i.l.bf16 %v1969_v20  ;;  %v1966_v53 = vunpack.i.h.bf16 %v1964_v24  ;;  %v1965_v43 = vunpack.i.l.bf16 %v1964_v24  ;;  %v210_v7 = vld [vmem:[%s2622_s1 + $0x110] sm:$0xff]  ;;  %v195_v16 = vld [vmem:[%s2622_s1 + $0x98] sm:$0xff] }
 0x128   : > { %696 = vmatprep.mubr.f32.mxu1 %v1993_v31  ;;  %1280 = vmatprep.mubr.f32.mxu0 %v1993_v31  ;;  %v1697_v36 = vpack.c.bf16 %v766_v33, %v764_v25  ;;  %v763_v44 = vsel %vm2309_vm0, %v2026_v9, %v757_v19  ;;  %v765_v57 = vsel %vm2309_vm0, %v2038_v22, %v758_v52  ;;  %v211_v14 = vld [vmem:[%s2622_s1 + $0x118] sm:$0xff] }
 0x129   : > { %v1421_v45 = vsel %vm585_vm11, %v1970_v39, %v1971_v34  ;;  %v1437_v46 = vsel %vm585_vm11, %v1971_v34, %v1970_v39  ;;  %v1420_v47 = vsel %vm585_vm11, %v1965_v43, %v1966_v53  ;;  %v1436_v49 = vsel %vm585_vm11, %v1966_v53, %v1965_v43  ;;  %1696 = vmatpush1.bf16.msra.mxu1 %v1695_v15 }
 0x12a   : > { %v1979_v8 = vpop.permute.xlu1 %1978  ;;  %v1974_v11 = vpop.permute.xlu0 %1973  ;;  %v1441_v38 = vsel %vm2174_vm13, %v2142_v12, %v1436_v49  ;;  %v1443_v9 = vsel %vm2174_vm13, %v2132_v5, %v1437_v46  ;;  %v1440_v22 = vsel %vm2153_vm12, %v2145_v13, %v1420_v47  ;;  %v1442_v37 = vsel %vm2153_vm12, %v2135_v6, %v1421_v45  ;;  %1698 = vmatprep.subr.bf16.mxu1 %v1697_v36  ;;  %v186_v5 = vld [vmem:[%s2622_s1 + $0x50] sm:$0xff]  ;;  %v204_v6 = vld [vmem:[%s2622_s1 + $0xe0] sm:$0xff] }
 0x12b   : > { %1638 = vmatmul.mubr.msk.f32.gmra.mrb[2].mxu1 %vm366_vm8, %v185_v10  ;;  %1656 = vmatmul.mubr.msk.f32.gmra.mrb[6].mxu0 %vm366_vm8, %v203_v23  ;;  %v1981_v51 = vunpack.i.h.bf16 %v1979_v8  ;;  %v1980_v54 = vunpack.i.l.bf16 %v1979_v8  ;;  %v1976_v12 = vunpack.i.h.bf16 %v1974_v11  ;;  %v1975_v50 = vunpack.i.l.bf16 %v1974_v11 }
 0x12c   : > { %702 = vmatprep.mubr.f32.mxu1 %v1993_v31  ;;  %1371 = vmatprep.mubr.f32.mxu0 %v1993_v31  ;;  %v1733_v13 = vpack.c.bf16 %v1443_v9, %v1441_v38  ;;  %v1735_v58 = vpack.c.bf16 %v1442_v37, %v1440_v22  ;;  %v1699_v59 = vpack.c.bf16 %v765_v57, %v763_v44 }
 0x12d   : > { %v1423_v60 = vsel %vm585_vm11, %v1980_v54, %v1981_v51  ;;  %v1439_v48 = vsel %vm585_vm11, %v1981_v51, %v1980_v54  ;;  %v1422_v61 = vsel %vm585_vm11, %v1975_v50, %v1976_v12  ;;  %v1438_v62 = vsel %vm585_vm11, %v1976_v12, %v1975_v50 }
 0x12e   : > { %v1446_v1 = vsel %vm2153_vm12, %v2160_v27, %v1423_v60  ;;  %v1444_v2 = vsel %vm2153_vm12, %v2183_v42, %v1422_v61  ;;  %1734 = vmatprep.subr.bf16.mxu0 %v1733_v13  ;;  %1700 = vmatpush1.bf16.msra.mxu1 %v1699_v59  ;;  %v1445_v63 = vsel %vm2174_vm13, %v2180_v41, %v1438_v62  ;;  %v205_v27 = vld [vmem:[%s2622_s1 + $0xe8] sm:$0xff] }
 0x12f   : > { %1639 = vmatmul.mubr.msk.f32.gmra.mrb[4].mxu1 %vm366_vm8, %v186_v5  ;;  %1657 = vmatmul.mubr.msk.f32.vlgmr.msra.gmra.mrb[0].mxu0 %vm366_vm8, %v204_v6  ;;  %v1447_v0 = vsel %vm2174_vm13, %v2166_v35, %v1439_v48  ;;  %v1739_v42 = vpack.c.bf16 %v1446_v1, %v1444_v2  ;;  %v188_v35 = vld [vmem:[%s2622_s1 + $0x60] sm:$0xff] }
 0x130   : > { %1736 = vmatpush1.bf16.msra.mxu0 %v1735_v58  ;;  %708 = vmatprep.mubr.f32.mxu1 %v1993_v31  ;;  %v1737_v41 = vpack.c.bf16 %v1447_v0, %v1445_v63 }
 0x131   : > { %1377 = vmatprep.mubr.f32.mxu0 %v1993_v31  ;;  %1741 = vmatprep.subr.bf16.mxu1 %v2056_v28  ;;  %v189_v28 = vld [vmem:[%s2622_s1 + $0x68] sm:$0xff] }
 0x132   : > { %1738 = vmatprep.subr.bf16.mxu0 %v1737_v41 }
 0x133   : > { %1640 = vmatmul.mubr.msk.f32.gmra.mrb[6].mxu1 %vm366_vm8, %v187_v21  ;;  %1658 = vmatmul.mubr.msk.f32.gmra.mrb[2].mxu0 %vm366_vm8, %v205_v27 }
 0x134   : > { %1740 = vmatpush1.bf16.msra.mxu0 %v1739_v42  ;;  %843 = vmatprep.mubr.f32.mxu1 %v1993_v31 }
 0x135   : > { %1383 = vmatprep.mubr.f32.mxu0 %v1993_v31 }
 0x137   : > { %1641 = vmatmul.mubr.msk.f32.vlgmr.msra.gmra.mrb[0].mxu1 %vm366_vm8, %v188_v35  ;;  %1659 = vmatmul.mubr.msk.f32.gmra.mrb[4].mxu0 %vm366_vm8, %v206_v40 }
 0x138   : > { %849 = vmatprep.mubr.f32.mxu1 %v1993_v31  ;;  %1389 = vmatprep.mubr.f32.mxu0 %v1993_v31 }
 0x139   : > { %1743 = vmatpush1.bf16.msra.mxu1 %v2060_v29  ;;  %v191_v29 = vld [vmem:[%s2622_s1 + $0x78] sm:$0xff] }
 0x13a   : > { %1742 = vmatprep.subr.bf16.mxu1 %v2064_v30  ;;  %v209_v30 = vld [vmem:[%s2622_s1 + $0x108] sm:$0xff] }
 0x13b   : > { %1642 = vmatmul.mubr.msk.f32.gmra.mrb[2].mxu1 %vm366_vm8, %v189_v28  ;;  %1660 = vmatmul.mubr.msk.f32.gmra.mrb[6].mxu0 %vm366_vm8, %v207_v55 }
 0x13c   : > { %855 = vmatprep.mubr.f32.mxu1 %v1993_v31  ;;  %1524 = vmatprep.mubr.f32.mxu0 %v1993_v31 }
 0x13d   : > { %1744 = vmatpush1.bf16.msra.mxu1 %v2071_v32  ;;  %v194_v32 = vld [vmem:[%s2622_s1 + $0x90] sm:$0xff] }
 0x13f   : > { %1643 = vmatmul.mubr.msk.f32.gmra.mrb[4].mxu1 %vm366_vm8, %v190_v3  ;;  %1661 = vmatmul.mubr.msk.f32.vlgmr.msra.gmra.mrb[0].mxu0 %vm366_vm8, %v208_v4 }
 0x140   : > { %861 = vmatprep.mubr.f32.mxu1 %v1993_v31  ;;  %1530 = vmatprep.mubr.f32.mxu0 %v1993_v31 }
 0x143   : > { %1644 = vmatmul.mubr.msk.f32.gmra.mrb[6].mxu1 %vm366_vm8, %v191_v29  ;;  %1662 = vmatmul.mubr.msk.f32.gmra.mrb[2].mxu0 %vm366_vm8, %v209_v30 }
 0x144   : > { %964 = vmatprep.mubr.f32.mxu1 %v1993_v31  ;;  %1536 = vmatprep.mubr.f32.mxu0 %v1993_v31 }
 0x147   : > { %1647 = vmatmul.mubr.msk.f32.vlgmr.msra.gmra.mrb[4].mxu1 %vm366_vm8, %v194_v32  ;;  %1663 = vmatmul.mubr.msk.f32.gmra.mrb[4].mxu0 %vm366_vm8, %v210_v7 }
 0x148   : > { %970 = vmatprep.mubr.f32.mxu1 %v1993_v31  ;;  %1542 = vmatprep.mubr.f32.mxu0 %v1993_v31 }
 0x14b   : > { %1648 = vmatmul.mubr.msk.f32.gmra.mrb[6].mxu1 %vm366_vm8, %v195_v16  ;;  %1664 = vmatmul.mubr.msk.f32.gmra.mrb[6].mxu0 %vm366_vm8, %v211_v14 }
 0x20a   : > { %v845_v26 = vpop.f32.mrb[0].mxu1 }
 0x20b   : > { %v847_v17 = vpop.f32.mrb[1].mxu1 }
 0x20e   : > { %v851_v18 = vpop.f32.mrb[2].mxu1 }
 0x20f   : > { %v853_v52 = vpop.f32.mrb[3].mxu1 }
 0x212   : > { %v1526_v31 = vpop.f32.mrb[0].mxu0 }
 0x213   : > { %v1745_v56 = vadd.f32 %v1526_v31, %v845_v26  ;;  %v1528_v19 = vpop.f32.mrb[1].mxu0 }
 0x214   : > { %v1746_v20 = vadd.f32 %v1528_v19, %v847_v17 }
 0x215   : > { %1557 = vst [vmem:[%s143_s18] sm:$0xff] %v1745_v56 }
 0x216   : > { %1558 = vst [vmem:[%s143_s18 + $0x8] sm:$0xff] %v1746_v20  ;;  %v1532_v24 = vpop.f32.mrb[2].mxu0 }
 0x217   : > { %v1747_v15 = vadd.f32 %v1532_v24, %v851_v18  ;;  %v1534_v25 = vpop.f32.mrb[3].mxu0 }
 0x218   : > { %v1748_v33 = vadd.f32 %v1534_v25, %v853_v52 }
 0x219   : > { %1559 = vst [vmem:[%s143_s18 + $0x10] sm:$0xff] %v1747_v15 }
 0x21a   : > { %1560 = vst [vmem:[%s143_s18 + $0x18] sm:$0xff] %v1748_v33  ;;  %v966_v34 = vpop.f32.mrb[4].mxu1  ;;  %v1538_v39 = vpop.f32.mrb[4].mxu0 }
 0x21b   : > { %v1749_v53 = vadd.f32 %v1538_v39, %v966_v34  ;;  %v968_v43 = vpop.f32.mrb[5].mxu1  ;;  %v1540_v10 = vpop.f32.mrb[5].mxu0 }
 0x21c   : > { %v1750_v23 = vadd.f32 %v1540_v10, %v968_v43 }
 0x21d   : > { %1561 = vst [vmem:[%s143_s18 + $0x20] sm:$0xff] %v1749_v53 }
 0x21e   : > { %1562 = vst [vmem:[%s143_s18 + $0x28] sm:$0xff] %v1750_v23  ;;  %v972_v36 = vpop.f32.mrb[6].mxu1  ;;  %v1544_v44 = vpop.f32.mrb[6].mxu0 }
 0x21f   : > { %v1751_v57 = vadd.f32 %v1544_v44, %v972_v36  ;;  %v974_v45 = vpop.f32.mrb[7].mxu1  ;;  %v1546_v46 = vpop.f32.mrb[7].mxu0 }
 0x220   : > { %v1752_v47 = vadd.f32 %v1546_v46, %v974_v45 }
 0x221   : > { %1563 = vst [vmem:[%s143_s18 + $0x30] sm:$0xff] %v1751_v57 }
 0x222   : > { %1564 = vst [vmem:[%s143_s18 + $0x38] sm:$0xff] %v1752_v47 }
 0x223 PF: > { %s12_s9 = sadd.s32 1, %s1988_s9  }
 0x224   : > { %p9_p4 = scmp.ge.s32.totalorder %s12_s9, 4  }
 0x226   :  { %11 = sbr.rel (!%p9_p4) target bundleno = 1 (0x1), region = 58 }

</bundles_post_ra>
